<compile_context>
chip_gen: v5e
topology: v5e:2x2
jax: 0.10.0
libtpu: 0.0.40
codegen_flags: <defaults>
</compile_context>

<pallas_src>
import functools
import math

import jax
import jax.numpy as jnp
from jax import lax
from jax.experimental import pallas as pl
from jax.experimental.pallas import tpu as pltpu


def _round_up(x, m):
    return ((x + m - 1) // m) * m


def _cdiv(a, b):
    return (a + b - 1) // b


_INV_SQRT2 = 1.0 / math.sqrt(2.0)
_SQRT_2_OVER_PI = math.sqrt(2.0 / math.pi)


def _gelu(x, approximate):
    if approximate:
        # tanh form routes to the EUP slot (separate VLIW slot, ~free) instead
        # of the long VPU erf polynomial.
        inner = _SQRT_2_OVER_PI * (x + 0.044715 * (x * x * x))
        return 0.5 * x * (1.0 + jnp.tanh(inner))
    # Exact erf-based GELU (matches torch.nn.GELU() default).
    return 0.5 * x * (1.0 + lax.erf(x * _INV_SQRT2))


def _conv_gelu_kernel(x_ref, w_ref, b_ref, o_ref, *, approximate):
    # x_ref: (tm, K) im2col tile; w_ref: (K, Cout_pad); b_ref: (1, Cout_pad)
    acc = jnp.dot(x_ref[...], w_ref[...], preferred_element_type=jnp.float32)
    acc = acc + b_ref[...]
    # Dropout2d(p=0.5) is identity in eval mode.
    o_ref[...] = _gelu(acc, approximate).astype(o_ref.dtype)


def _conv_gelu_kernel_ktiled(x_ref, w_ref, b_ref, o_ref, acc_ref, *, approximate):
    # Grid = (m tiles, k tiles); k axis is the reduction ("arbitrary", last).
    @pl.when(pl.program_id(1) == 0)
    def _():
        acc_ref[...] = jnp.zeros_like(acc_ref)

    acc_ref[...] += jnp.dot(x_ref[...], w_ref[...],
                            preferred_element_type=jnp.float32)

    @pl.when(pl.program_id(1) == pl.num_programs(1) - 1)
    def _():
        acc = acc_ref[...] + b_ref[...]
        o_ref[...] = _gelu(acc, approximate).astype(o_ref.dtype)


def cnn3_gelu_block(x_nchw, weight, bias, *, ks=3, padding=0, training=False,
                    compute_dtype=jnp.bfloat16, out_dtype=None,
                    gelu_approximate=False, channels_last_out=False):
    """Forward pass of Cnn3GeluBlock.

    x_nchw : (N, Cin, H, W)
    weight : (Cout, Cin, ks, ks)  (PyTorch conv layout)
    bias   : (Cout,)
    returns: (N, Cout, Hout, Wout)  (or NHWC if channels_last_out)
    """
    if training:
        # TODO(synk): training-mode Dropout2d not implemented (eval-mode kernel).
        raise NotImplementedError(
            "Cnn3GeluBlock Pallas kernel is eval-mode only (Dropout2d=identity).")

    n, c_in, h, w = x_nchw.shape
    c_out = weight.shape[0]
    if compute_dtype is None:
        compute_dtype = x_nchw.dtype
    if out_dtype is None:
        out_dtype = x_nchw.dtype

    if padding > 0:
        x_nchw = jnp.pad(
            x_nchw, ((0, 0), (0, 0), (padding, padding), (padding, padding)))
        h += 2 * padding
        w += 2 * padding

    h_out = h - ks + 1
    w_out = w - ks + 1
    m = n * h_out * w_out

    lhs_itemsize = jnp.dtype(compute_dtype).itemsize
    out_itemsize = jnp.dtype(out_dtype).itemsize
    row_align = {4: 8, 2: 16, 1: 32}.get(lhs_itemsize, 8)
    c_out_pad = _round_up(c_out, 128)          # lane-dense (unmasked) stores

    # Cast BEFORE the 9x im2col duplication (halves the materialized patch
    # buffer and all lhs HBM traffic when compute_dtype is bf16).
    x_nhwc = jnp.transpose(x_nchw, (0, 2, 3, 1)).astype(compute_dtype)

    # im2col: patch channel index ((kh*ks + kw)*Cin + cin) matches the
    # row-major flatten of the (kh, kw, Cin, Cout) weights.
    patches = jnp.concatenate(
        [x_nhwc[:, kh:kh + h_out, kw:kw + w_out, :]
         for kh in range(ks) for kw in range(ks)], axis=-1)
    k_dim = ks * ks * c_in
    lhs = patches.reshape(m, k_dim)

    rhs = jnp.transpose(weight, (2, 3, 1, 0)).reshape(k_dim, c_out)
    rhs = jnp.pad(rhs, ((0, 0), (0, c_out_pad - c_out))).astype(compute_dtype)
    b2d = jnp.pad(bias, (0, c_out_pad - c_out)).reshape(1, c_out_pad)
    b2d = b2d.astype(jnp.float32)

    # K-reduction tiling for large Cin (bounds VMEM, lets double-buffering
    # hide the lhs/weight DMAs). Requires Cin % 128 == 0 so tk = ks*ks*128
    # divides K exactly with no extra channel-padding copy.
    # TODO(synk): pre-im2col Cin padding to enable k-tiling for other Cin.
    use_k_tiling = (c_in >= 128) and (c_in % 128 == 0)
    tk = ks * ks * 128 if use_k_tiling else k_dim
    num_k = (k_dim // tk) if use_k_tiling else 1

    # ---- VMEM budget (conservative: fits v7x's 64 MiB physical VMEM) ------
    w_buffers = 2 if use_k_tiling else 1       # resident weights -> 1 buffer
    fixed = w_buffers * tk * c_out_pad * lhs_itemsize + 2 * c_out_pad * 4
    per_row = (2 * tk * lhs_itemsize + 2 * c_out_pad * out_itemsize
               + (4 * c_out_pad if use_k_tiling else 0))
    budget = 48 * 1024 * 1024
    avail = max(budget - fixed, row_align * per_row)
    tm_cap = max(row_align, (avail // per_row) // row_align * row_align)
    tm_cap = min(tm_cap, 2048)
    tm = min(tm_cap, _round_up(m, row_align))
    # >= 2 row tiles when possible so v7x's two TensorCores both get work;
    # the ragged last tile is masked on writeback (no jnp.pad copy of the
    # 9x-sized im2col buffer).
    if m > row_align and _cdiv(m, tm) < 2:
        tm = max(row_align, _round_up(_cdiv(m, 2), row_align))
    num_m = _cdiv(m, tm)

    vmem_need = fixed + tm * per_row
    vmem_limit = int(min(max(vmem_need + (4 << 20), 32 << 20), 60 << 20))

    cost = pl.CostEstimate(
        flops=2 * m * k_dim * c_out_pad + 4 * m * c_out_pad,
        transcendentals=m * c_out_pad,
        bytes_accessed=(m * k_dim * lhs_itemsize
                        + k_dim * c_out_pad * lhs_itemsize
                        + c_out_pad * 4
                        + m * c_out_pad * out_itemsize),
    )

    out_shape = jax.ShapeDtypeStruct((m, c_out_pad), out_dtype)
    kernel_small = functools.partial(_conv_gelu_kernel,
                                     approximate=gelu_approximate)
    kernel_ktiled = functools.partial(_conv_gelu_kernel_ktiled,
                                      approximate=gelu_approximate)

    def _call(single_buffer_hints):
        def spec(shape, index_map, resident):
            if resident and single_buffer_hints:
                # Grid-invariant block -> no double buffering (halves its VMEM).
                return pl.BlockSpec(shape, index_map,
                                    pipeline_mode=pl.Buffered(buffer_count=1))
            return pl.BlockSpec(shape, index_map)

        if use_k_tiling:
            grid_spec = pltpu.PrefetchScalarGridSpec(
                num_scalar_prefetch=0,
                grid=(num_m, num_k),
                in_specs=[
                    pl.BlockSpec((tm, tk), lambda i, k: (i, k)),
                    pl.BlockSpec((tk, c_out_pad), lambda i, k: (k, 0)),
                    spec((1, c_out_pad), lambda i, k: (0, 0), True),
                ],
                out_specs=pl.BlockSpec((tm, c_out_pad), lambda i, k: (i, 0)),
                scratch_shapes=[pltpu.VMEM((tm, c_out_pad), jnp.float32)],
            )
            kernel = kernel_ktiled
            dims = ("parallel", "arbitrary")
        else:
            grid_spec = pltpu.PrefetchScalarGridSpec(
                num_scalar_prefetch=0,
                grid=(num_m,),
                in_specs=[
                    pl.BlockSpec((tm, k_dim), lambda i: (i, 0)),
                    spec((k_dim, c_out_pad), lambda i: (0, 0), True),
                    spec((1, c_out_pad), lambda i: (0, 0), True),
                ],
                out_specs=pl.BlockSpec((tm, c_out_pad), lambda i: (i, 0)),
            )
            kernel = kernel_small
            dims = ("parallel",)

        return pl.pallas_call(
            kernel,
            out_shape=out_shape,
            grid_spec=grid_spec,
            compiler_params=pltpu.CompilerParams(
                dimension_semantics=dims,
                vmem_limit_bytes=vmem_limit),
            cost_estimate=cost,
        )(lhs, rhs, b2d)

    try:
        out = _call(True)
    except Exception:
        # pipeline_mode=pl.Buffered(1) hint rejected by this jax version;
        # fall back to default double-buffering (identical numerics).
        out = _call(False)

    out = out[:, :c_out].reshape(n, h_out, w_out, c_out)
    if channels_last_out:
        return out            # NHWC: skips a full-HBM output transpose
    return jnp.transpose(out, (0, 3, 1, 2))


def _reference(x_nchw, weight, bias, *, padding=0):
    y = lax.conv_general_dilated(
        x_nchw, weight,
        window_strides=(1, 1),
        padding=[(padding, padding), (padding, padding)],
        dimension_numbers=("NCHW", "OIHW", "NCHW"),
    )
    y = y + bias[None, :, None, None]
    return jax.nn.gelu(y, approximate=False)


if __name__ == "__main__":
    key = jax.random.PRNGKey(0)
    k_x, k_w, k_b = jax.random.split(key, 3)

    N, C_IN, C_OUT, H, W, KS = 2, 4, 8, 16, 16, 3

    x = jax.random.normal(k_x, (N, C_IN, H, W), dtype=jnp.float32)

    # Deterministic Conv2d-style init (uniform in +/- 1/sqrt(fan_in)).
    fan_in = C_IN * KS * KS
    bound = 1.0 / math.sqrt(fan_in)
    weight = jax.random.uniform(
        k_w, (C_OUT, C_IN, KS, KS), minval=-bound, maxval=bound,
        dtype=jnp.float32)
    bias = jax.random.uniform(
        k_b, (C_OUT,), minval=-bound, maxval=bound, dtype=jnp.float32)

    ref = jax.block_until_ready(_reference(x, weight, bias, padding=0))

    # Exact path (f32 MXU operands, erf GELU): matches torch at 1e-4.
    out_f32 = jax.block_until_ready(
        cnn3_gelu_block(x, weight, bias, ks=KS, padding=0,
                        compute_dtype=jnp.float32))
    assert out_f32.shape == (N, C_OUT, H - KS + 1, W - KS + 1)
    assert jnp.allclose(out_f32, ref, atol=1e-4, rtol=1e-4)

    # Default fast path (bf16 MXU operands, f32 accumulation): looser check.
    out_fast = jax.block_until_ready(
        cnn3_gelu_block(x, weight, bias, ks=KS, padding=0))
    assert out_fast.shape == ref.shape
    assert jnp.allclose(out_fast, ref, atol=5e-2, rtol=5e-2)

    print("KERNEL_OK")
</pallas_src>

<mosaic_0001>
module attributes {stable_mosaic.version = 11 : i64} {
  func.func @_conv_gelu_kernel(%arg0: i32, %arg1: memref<200x36xf32, #tpu.memory_space<vmem>>, %arg2: memref<36x128xf32, #tpu.memory_space<vmem>>, %arg3: memref<1x128xf32, #tpu.memory_space<vmem>>, %arg4: memref<200x128xf32, #tpu.memory_space<vmem>>) attributes {dimension_semantics = [#tpu.dimension_semantics<parallel>], iteration_bounds = array<i64: 2>, scalar_prefetch = 0 : i64, scratch_operands = 0 : i64, tpu.core_type = #tpu.core_type<tc>, window_params = [{transform_indices = @transform_0, window_bounds = array<i64: 200, 36>}, {pipeline_mode = #tpu.pipeline_mode<synchronous>, transform_indices = @transform_1, window_bounds = array<i64: 36, 128>}, {pipeline_mode = #tpu.pipeline_mode<synchronous>, transform_indices = @transform_2, window_bounds = array<i64: 1, 128>}, {transform_indices = @transform_3, window_bounds = array<i64: 200, 128>}]} {
    %c0 = arith.constant 0 : index
    %c0_0 = arith.constant 0 : index
    %0 = vector.load %arg1[%c0, %c0_0] : memref<200x36xf32, #tpu.memory_space<vmem>>, vector<200x36xf32>
    %c0_1 = arith.constant 0 : index
    %c0_2 = arith.constant 0 : index
    %1 = vector.load %arg2[%c0_1, %c0_2] : memref<36x128xf32, #tpu.memory_space<vmem>>, vector<36x128xf32>
    %cst = arith.constant dense<0.000000e+00> : vector<200x128xf32>
    %2 = tpu.matmul %0, %1, %cst {dimension_numbers = #tpu.dot_dimension_numbers<[1], [0], [0], [1], [0, 0, 1, 1], [], []>} : vector<200x36xf32>, vector<36x128xf32>, vector<200x128xf32> -> vector<200x128xf32>
    %c0_3 = arith.constant 0 : index
    %c0_4 = arith.constant 0 : index
    %3 = vector.load %arg3[%c0_3, %c0_4] : memref<1x128xf32, #tpu.memory_space<vmem>>, vector<1x128xf32>
    %4 = vector.broadcast %3 : vector<1x128xf32> to vector<200x128xf32>
    %5 = arith.addf %2, %4 : vector<200x128xf32>
    %cst_5 = arith.constant 5.000000e-01 : f32
    %6 = vector.broadcast %cst_5 : f32 to vector<200x128xf32>
    %7 = arith.mulf %6, %5 : vector<200x128xf32>
    %cst_6 = arith.constant 0.707106769 : f32
    %8 = vector.broadcast %cst_6 : f32 to vector<200x128xf32>
    %9 = arith.mulf %5, %8 : vector<200x128xf32>
    %10 = math.erf %9 : vector<200x128xf32>
    %cst_7 = arith.constant 1.000000e+00 : f32
    %11 = vector.broadcast %cst_7 : f32 to vector<200x128xf32>
    %12 = arith.addf %11, %10 : vector<200x128xf32>
    %13 = arith.mulf %7, %12 : vector<200x128xf32>
    %c0_8 = arith.constant 0 : index
    %c0_9 = arith.constant 0 : index
    %14 = vector.load %arg4[%c0_8, %c0_9] : memref<200x128xf32, #tpu.memory_space<vmem>>, vector<200x128xf32>
    tpu.vector_store %arg4[%c0_8, %c0_9], %13 {strides = array<i32>} : memref<200x128xf32, #tpu.memory_space<vmem>>, vector<200x128xf32>,
    return
  }
  func.func @transform_0(%arg0: i32) -> (i32, i32) {
    %c0_i32 = arith.constant 0 : i32
    %c0_i32_0 = arith.constant 0 : i32
    return %arg0, %c0_i32 : i32, i32
  }
  func.func @transform_1(%arg0: i32) -> (i32, i32) {
    %c0_i32 = arith.constant 0 : i32
    %c0_i32_0 = arith.constant 0 : i32
    %c0_i32_1 = arith.constant 0 : i32
    return %c0_i32, %c0_i32_0 : i32, i32
  }
  func.func @transform_2(%arg0: i32) -> (i32, i32) {
    %c0_i32 = arith.constant 0 : i32
    %c0_i32_0 = arith.constant 0 : i32
    %c0_i32_1 = arith.constant 0 : i32
    return %c0_i32, %c0_i32_0 : i32, i32
  }
  func.func @transform_3(%arg0: i32) -> (i32, i32) {
    %c0_i32 = arith.constant 0 : i32
    %c0_i32_0 = arith.constant 0 : i32
    return %arg0, %c0_i32 : i32, i32
  }
}

module attributes {stable_mosaic.version = 11 : i64} {
  func.func @_conv_gelu_kernel(%arg0: i32, %arg1: memref<200x36xf32, #tpu.memory_space<vmem>>, %arg2: memref<36x128xf32, #tpu.memory_space<vmem>>, %arg3: memref<1x128xf32, #tpu.memory_space<vmem>>, %arg4: memref<200x128xf32, #tpu.memory_space<vmem>>) attributes {dimension_semantics = [#tpu.dimension_semantics<parallel>], iteration_bounds = array<i64: 2>, scalar_prefetch = 0 : i64, scratch_operands = 0 : i64, tpu.core_type = #tpu.core_type<tc>, window_params = [{transform_indices = @transform_0, window_bounds = array<i64: 200, 36>}, {pipeline_mode = #tpu.pipeline_mode<synchronous>, transform_indices = @transform_1, window_bounds = array<i64: 36, 128>}, {pipeline_mode = #tpu.pipeline_mode<synchronous>, transform_indices = @transform_2, window_bounds = array<i64: 1, 128>}, {transform_indices = @transform_3, window_bounds = array<i64: 200, 128>}]} {
    %c0 = arith.constant 0 : index
    %c0_0 = arith.constant 0 : index
    %0 = vector.load %arg1[%c0, %c0_0] : memref<200x36xf32, #tpu.memory_space<vmem>>, vector<200x36xf32>
    %c0_1 = arith.constant 0 : index
    %c0_2 = arith.constant 0 : index
    %1 = vector.load %arg2[%c0_1, %c0_2] : memref<36x128xf32, #tpu.memory_space<vmem>>, vector<36x128xf32>
    %cst = arith.constant dense<0.000000e+00> : vector<200x128xf32>
    %2 = tpu.matmul %0, %1, %cst {dimension_numbers = #tpu.dot_dimension_numbers<[1], [0], [0], [1], [0, 0, 1, 1], [], []>} : vector<200x36xf32>, vector<36x128xf32>, vector<200x128xf32> -> vector<200x128xf32>
    %c0_3 = arith.constant 0 : index
    %c0_4 = arith.constant 0 : index
    %3 = vector.load %arg3[%c0_3, %c0_4] : memref<1x128xf32, #tpu.memory_space<vmem>>, vector<1x128xf32>
    %4 = vector.broadcast %3 : vector<1x128xf32> to vector<200x128xf32>
    %5 = arith.addf %2, %4 : vector<200x128xf32>
    %cst_5 = arith.constant 5.000000e-01 : f32
    %6 = vector.broadcast %cst_5 : f32 to vector<200x128xf32>
    %7 = arith.mulf %6, %5 : vector<200x128xf32>
    %cst_6 = arith.constant 0.707106769 : f32
    %8 = vector.broadcast %cst_6 : f32 to vector<200x128xf32>
    %9 = arith.mulf %5, %8 : vector<200x128xf32>
    %10 = math.erf %9 : vector<200x128xf32>
    %cst_7 = arith.constant 1.000000e+00 : f32
    %11 = vector.broadcast %cst_7 : f32 to vector<200x128xf32>
    %12 = arith.addf %11, %10 : vector<200x128xf32>
    %13 = arith.mulf %7, %12 : vector<200x128xf32>
    %c0_8 = arith.constant 0 : index
    %c0_9 = arith.constant 0 : index
    %14 = vector.load %arg4[%c0_8, %c0_9] : memref<200x128xf32, #tpu.memory_space<vmem>>, vector<200x128xf32>
    tpu.vector_store %arg4[%c0_8, %c0_9], %13 {strides = array<i32>} : memref<200x128xf32, #tpu.memory_space<vmem>>, vector<200x128xf32>,
    return
  }
  func.func @transform_0(%arg0: i32) -> (i32, i32) {
    %c0_i32 = arith.constant 0 : i32
    %c0_i32_0 = arith.constant 0 : i32
    return %arg0, %c0_i32 : i32, i32
  }
  func.func @transform_1(%arg0: i32) -> (i32, i32) {
    %c0_i32 = arith.constant 0 : i32
    %c0_i32_0 = arith.constant 0 : i32
    %c0_i32_1 = arith.constant 0 : i32
    return %c0_i32, %c0_i32_0 : i32, i32
  }
  func.func @transform_2(%arg0: i32) -> (i32, i32) {
    %c0_i32 = arith.constant 0 : i32
    %c0_i32_0 = arith.constant 0 : i32
    %c0_i32_1 = arith.constant 0 : i32
    return %c0_i32, %c0_i32_0 : i32, i32
  }
  func.func @transform_3(%arg0: i32) -> (i32, i32) {
    %c0_i32 = arith.constant 0 : i32
    %c0_i32_0 = arith.constant 0 : i32
    return %arg0, %c0_i32 : i32, i32
  }
}

</mosaic_0001>

<bundles_post_ra>
// kernel: tpu_custom_call.1
= control target key start
LH: loop header
LB: loop body
LE: loop exit
PB: predicated region body
PF: predicated region fallthrough
CT: control target
= control target key end

     0   :  { %8 = vsyncpa [#allocation3], 0  ;;  %s2973_s0 = inlined_call_operand.vmem [shape: f32[392,36], index: 0, kind: input, shape index: {}]   ;;  %s2974_s1 = inlined_call_operand.vmem [shape: f32[36,128], index: 1, kind: input, shape index: {}]   ;;  %s2975_s2 = inlined_call_operand.vmem [shape: f32[1,128], index: 2, kind: input, shape index: {}]   ;;  %s2976_s3 = inlined_call_operand.hbm [shape: f32[392,128], index: 3, kind: output, shape index: {}]  }
   0x1   :  { %10 = vsyncpa [#allocation3 + $0x1], 0  ;;  %s1882_s12 = smov 0   ;;  %s1884_s13 = smov 0  }
   0x2   :  { %s1886_s14 = smov 0   ;;  %s1888_s15 = smov 0  }
   0x3 LB: > { %s1903_s16 = sadd.s32 4294967295, %s1857_s15   ;;  %s1612_s17 = sadd.s32 4294967294, %s1857_s15   ;;  %s1857_s15 = sphi %s1888_s15, %s3009_s15   ;;  %s1853_s14 = sphi %s1886_s14, %s3008_s14   ;;  %s1849_s13 = sphi %s1884_s13, %s3007_s13   ;;  %s1845_s12 = sphi %s1882_s12, %s3006_s12  }
   0x4   : > { %s1907_s18 = sadd.s32 1, %s1857_s15   ;;  %s91_s19 = sadd.s32 1, %s1853_s14 }
   0x5   : > { %s88_s20 = ssub.s32 %s1857_s15, %s1907_s18  ;;  %p101_p0 = scmp.ne.s32.totalorder %s1853_s14, %s1849_s13 }
   0x6   : > { %p89_p1 = scmp.eq.s32.totalorder %s88_s20, 0  ;;  %p102_p2 = scmp.eq.s32.totalorder %s1903_s16, 1 }
   0x7   : > { %p107_p3 = scmp.ne.s32.totalorder %s1849_s13, %s1845_s12  ;;  %p108_p4 = scmp.eq.s32.totalorder %s1612_s17, 1 }
   0x8   : > { %s1918_s21 = scalar_select %p89_p1, %s1853_s14, %s91_s19  }
   0x9   : > { %p1920_p5 = por %p102_p2, %p101_p0  ;;  %p1924_p6 = por %p108_p4, %p107_p3 }
   0xa   : > { %p1615_p7 = scmp.ge.s32.totalorder %s1857_s15, 1  ;;  %p149_p8 = scmp.lt.s32.totalorder %s1857_s15, 3 }
   0xc   : > { %p150_p9 = pnand %p1615_p7, %p149_p8 }
   0xd   : > { %s1937_s28 = smul.u32 (!%p150_p9), 25, %s1903_s16  ;;  %s174_s19 = sand.u32 (!%p150_p9), 1, %s1849_s13  }
   0xe   : > { %153 = sbr.rel (%p150_p9) target bundleno = 482 (0x1e2), region = 32  ;;  %s2912_s30 = scalar_lea.sflag (!%p150_p9), [#allocation3], %s174_s19 }
   0xf   : > { %p182_p10 = scmp.lt.s32.totalorder (!%p150_p9), %s1937_s28, 48  ;;  %s2178_s25 = smul.u32 (!%p150_p9), 200, %s174_s19 }
  0x11   : > { %s2200_s26 = scalar_lea.vmem (!%p150_p9), [#allocation2], %s2178_s25 }
  0x13   : > { %v225_v0 = vld [vmem:[%s2974_s1 + $0x20] sm:$0xf]  ;;  %vm306_vm0 = vcmask 1043456   ;;  %v224_v1 = vld [vmem:[%s2974_s1 + $0x18] sm:$0xff]  ;;  %v223_v2 = vld [vmem:[%s2974_s1 + $0x10] sm:$0xff]  ;;  %s183_s6 = scalar_select %p182_p10, %s1937_s28, 48 }
  0x14   : > { %1617 = vmatpush.msk.msra.mxu0 %vm306_vm0, %v225_v0  ;;  %1676 = vmatpush.msk.msra.mxu1 %vm306_vm0, %v225_v0  ;;  %v222_v3 = vld [vmem:[%s2974_s1 + $0x8] sm:$0xff]  ;;  %v221_v4 = vld [vmem:[%s2974_s1] sm:$0xff]  ;;  %vm230_vm1 = vcmask 293888   ;;  %s1536_s4 = ssub.s32 (%p1920_p5), 49, %s1937_s28 }
  0x15   : > { %1677 = vmatpush.msk.msra.mxu2 %vm306_vm0, %v225_v0  ;;  %1678 = vmatpush.msk.msra.mxu3 %vm306_vm0, %v225_v0  ;;  %s1616_s9 = sshll.u32 %s183_s6, 3  ;;  %v2009_v30 = vld [vmem:[%s2975_s2] ss:$0 sm:$0xff]  ;;  %p1537_p11 = scmp.lt.s32.totalorder (%p1920_p5), %s1536_s4, 25 }
  0x16   : > { %322 = vmatpush.msra.mxu0 %v224_v1  ;;  %1679 = vmatpush.msra.mxu1 %v224_v1  ;;  %s1953_s17 = scalar_lea.vmem %s2973_s0, %s1616_s9 }
  0x17   : > { %1680 = vmatpush.msra.mxu2 %v224_v1  ;;  %1681 = vmatpush.msra.mxu3 %v224_v1  ;;  %v196_v5 = vld [vmem:[%s1953_s17] sm:$0xff]  ;;  %v202_v6 = vld [vmem:[%s1953_s17 + $0x30] sm:$0xff]  ;;  %v215_v8 = vld [vmem:[%s1953_s17 + $0x98] sm:$0xff] }
  0x18   : > { %323 = vmatpush.msra.mxu0 %v223_v2  ;;  %1682 = vmatpush.msra.mxu1 %v223_v2  ;;  %v208_v7 = vld [vmem:[%s1953_s17 + $0x60] sm:$0xff]  ;;  %v197_v9 = vld [vmem:[%s1953_s17 + $0x8] sm:$0xff]  ;;  %v203_v10 = vld [vmem:[%s1953_s17 + $0x38] sm:$0xff] }
  0x19   : > { %1683 = vmatpush.msra.mxu2 %v223_v2  ;;  %1684 = vmatpush.msra.mxu3 %v223_v2  ;;  %v209_v11 = vld [vmem:[%s1953_s17 + $0x68] sm:$0xff]  ;;  %v216_v12 = vld [vmem:[%s1953_s17 + $0xa0] sm:$0xff]  ;;  %v198_v13 = vld [vmem:[%s1953_s17 + $0x10] sm:$0xff] }
  0x1a   : > { %324 = vmatpush.msra.mxu0 %v222_v3  ;;  %1685 = vmatpush.msra.mxu1 %v222_v3  ;;  %v204_v14 = vld [vmem:[%s1953_s17 + $0x40] sm:$0xff]  ;;  %v210_v15 = vld [vmem:[%s1953_s17 + $0x70] sm:$0xff]  ;;  %v217_v16 = vld [vmem:[%s1953_s17 + $0xa8] sm:$0xff] }
  0x1b   : > { %1686 = vmatpush.msra.mxu2 %v222_v3  ;;  %1687 = vmatpush.msra.mxu3 %v222_v3  ;;  %v199_v17 = vld [vmem:[%s1953_s17 + $0x18] sm:$0xff]  ;;  %v205_v18 = vld [vmem:[%s1953_s17 + $0x48] sm:$0xff]  ;;  %v218_v20 = vld [vmem:[%s1953_s17 + $0xb0] sm:$0xff] }
  0x1c   : > { %325 = vmatpush.msra.mxu0 %v221_v4  ;;  %1688 = vmatpush.msra.mxu1 %v221_v4  ;;  %v211_v19 = vld [vmem:[%s1953_s17 + $0x78] sm:$0xff]  ;;  %v200_v21 = vld [vmem:[%s1953_s17 + $0x20] sm:$0xff]  ;;  %v206_v22 = vld [vmem:[%s1953_s17 + $0x50] sm:$0xff] }
  0x1d   : > { %1689 = vmatpush.msra.mxu2 %v221_v4  ;;  %1690 = vmatpush.msra.mxu3 %v221_v4  ;;  %v212_v23 = vld [vmem:[%s1953_s17 + $0x80] sm:$0xff]  ;;  %v219_v24 = vld [vmem:[%s1953_s17 + $0xb8] sm:$0xff]  ;;  %v201_v25 = vld [vmem:[%s1953_s17 + $0x28] sm:$0xff] }
  0x1e   : > { %1618 = vmatmul.msk.f32.vlgmr.msra.gmra.mxu0 %vm230_vm1, %v196_v5  ;;  %1624 = vmatmul.msk.f32.vlgmr.msra.gmra.mxu1 %vm230_vm1, %v202_v6  ;;  %v207_v26 = vld [vmem:[%s1953_s17 + $0x58] sm:$0xff]  ;;  %v213_v27 = vld [vmem:[%s1953_s17 + $0x88] sm:$0xff]  ;;  %v220_v28 = vld [vmem:[%s1953_s17 + $0xc0] sm:$0xff] }
  0x1f   : > { %1630 = vmatmul.msk.f32.vlgmr.msra.gmra.mxu2 %vm230_vm1, %v208_v7  ;;  %1637 = vmatmul.msk.f32.vlgmr.msra.gmra.mxu3 %vm230_vm1, %v215_v8  ;;  %v214_v29 = vld [vmem:[%s1953_s17 + $0x90] sm:$0xff] }
  0x26   : > { %1619 = vmatmul.msk.f32.gmra.mxu0 %vm230_vm1, %v197_v9  ;;  %1625 = vmatmul.msk.f32.gmra.mxu1 %vm230_vm1, %v203_v10 }
  0x27   : > { %1631 = vmatmul.msk.f32.gmra.mxu2 %vm230_vm1, %v209_v11  ;;  %1638 = vmatmul.msk.f32.gmra.mxu3 %vm230_vm1, %v216_v12 }
  0x2e   : > { %1620 = vmatmul.msk.f32.gmra.mxu0 %vm230_vm1, %v198_v13  ;;  %1626 = vmatmul.msk.f32.gmra.mxu1 %vm230_vm1, %v204_v14 }
  0x2f   : > { %1632 = vmatmul.msk.f32.gmra.mxu2 %vm230_vm1, %v210_v15  ;;  %1639 = vmatmul.msk.f32.gmra.mxu3 %vm230_vm1, %v217_v16 }
  0x36   : > { %1621 = vmatmul.msk.f32.gmra.mxu0 %vm230_vm1, %v199_v17  ;;  %1627 = vmatmul.msk.f32.gmra.mxu1 %vm230_vm1, %v205_v18 }
  0x37   : > { %1633 = vmatmul.msk.f32.gmra.mxu2 %vm230_vm1, %v211_v19  ;;  %1640 = vmatmul.msk.f32.gmra.mxu3 %vm230_vm1, %v218_v20 }
  0x3e   : > { %1622 = vmatmul.msk.f32.gmra.mxu0 %vm230_vm1, %v200_v21  ;;  %1628 = vmatmul.msk.f32.gmra.mxu1 %vm230_vm1, %v206_v22 }
  0x3f   : > { %1634 = vmatmul.msk.f32.gmra.mxu2 %vm230_vm1, %v212_v23  ;;  %1641 = vmatmul.msk.f32.gmra.mxu3 %vm230_vm1, %v219_v24 }
  0x46   : > { %1623 = vmatmul.msk.f32.gmra.mxu0 %vm230_vm1, %v201_v25  ;;  %1629 = vmatmul.msk.f32.gmra.mxu1 %vm230_vm1, %v207_v26 }
  0x47   : > { %1635 = vmatmul.msk.f32.gmra.mxu2 %vm230_vm1, %v213_v27  ;;  %1642 = vmatmul.msk.f32.gmra.mxu3 %vm230_vm1, %v220_v28 }
  0x4f   : > { %1636 = vmatmul.msk.f32.gmra.mxu2 %vm230_vm1, %v214_v29 }
  0x9b   : > { %v327_v31 = vpop.f32.mrf.mxu0  ;;  %v345_v32 = vpop.f32.mrf.mxu1 }
  0x9c   : > { %v2012_v33 = vadd.f32 %v2009_v30, %v327_v31  ;;  %v2015_v34 = vadd.f32 %v2009_v30, %v345_v32 }
  0x9e   : > { %v2018_v35 = vmul.f32 0.70710677, %v2012_v33  ;;  %v2021_v36 = vmul.f32 0.70710677, %v2015_v34 }
  0xa0   : > { %v452_v37 = vmul.f32 %v2018_v35, %v2018_v35  ;;  %v692_v38 = vmul.f32 %v2021_v36, %v2021_v36 }
  0xa2   : > { %v2027_v39 = vmin.f32 %v452_v37, 16.0  ;;  %v2029_v40 = vmin.f32 %v692_v38, 16.0  ;;  %v363_v41 = vpop.f32.mrf.mxu2  ;;  %v384_v42 = vpop.f32.mrf.mxu3 }
  0xa3   : > { %v2032_v43 = vadd.f32 %v2009_v30, %v363_v41  ;;  %v2035_v44 = vadd.f32 %v2009_v30, %v384_v42  ;;  %v330_v53 = vpop.f32.mrf.mxu0  ;;  %v348_v21 = vpop.f32.mrf.mxu1 }
  0xa4   : > { %v454_v45 = vmul.f32 2.1237322e-06, %v2027_v39  ;;  %v465_v46 = vmul.f32 3.8918573e-05, %v2027_v39  ;;  %v694_v47 = vmul.f32 2.1237322e-06, %v2029_v40  ;;  %v2058_v63 = vadd.f32 %v2009_v30, %v330_v53 }
  0xa5   : > { %v705_v48 = vmul.f32 3.8918573e-05, %v2029_v40  ;;  %v2042_v49 = vmul.f32 0.70710677, %v2032_v43  ;;  %v2047_v56 = vmul.f32 0.70710677, %v2035_v44  ;;  %v2080_v38 = vadd.f32 %v2009_v30, %v348_v21 }
  0xa6   : > { %v455_v50 = vadd.f32 0.00028619796, %v454_v45  ;;  %v466_v51 = vadd.f32 0.001143296, %v465_v46  ;;  %v695_v52 = vadd.f32 0.00028619796, %v694_v47 }
  0xa7   : > { %v706_v54 = vadd.f32 0.001143296, %v705_v48  ;;  %v932_v55 = vmul.f32 %v2042_v49, %v2042_v49  ;;  %v1212_v62 = vmul.f32 %v2047_v56, %v2047_v56  ;;  %v2069_v13 = vmul.f32 0.70710677, %v2058_v63 }
  0xa8   : > { %v456_v57 = vmul.f32 %v455_v50, %v2027_v39  ;;  %v467_v58 = vmul.f32 %v466_v51, %v2027_v39  ;;  %v696_v59 = vmul.f32 %v695_v52, %v2029_v40 }
  0xa9   : > { %v707_v60 = vmul.f32 %v706_v54, %v2029_v40  ;;  %v2053_v61 = vmin.f32 %v932_v55, 16.0  ;;  %v2065_v9 = vmin.f32 %v1212_v62, 16.0 }
  0xaa   : > { %v457_v0 = vadd.f32 0.0036580483, %v456_v57  ;;  %v468_v1 = vadd.f32 0.014752088, %v467_v58  ;;  %v697_v2 = vadd.f32 0.0036580483, %v696_v59  ;;  %v492_v58 = vmul.f32 %v2069_v13, %v2069_v13 }
  0xab   : > { %v708_v3 = vadd.f32 0.014752088, %v707_v60  ;;  %v934_v4 = vmul.f32 2.1237322e-06, %v2053_v61  ;;  %v945_v5 = vmul.f32 3.8918573e-05, %v2053_v61 }
  0xac   : > { %v458_v6 = vmul.f32 %v457_v0, %v2027_v39  ;;  %v469_v7 = vmul.f32 %v468_v1, %v2027_v39  ;;  %v698_v8 = vmul.f32 %v697_v2, %v2029_v40  ;;  %v1214_v20 = vmul.f32 2.1237322e-06, %v2065_v9 }
  0xad   : > { %v709_v10 = vmul.f32 %v708_v3, %v2029_v40  ;;  %v935_v11 = vadd.f32 0.00028619796, %v934_v4  ;;  %v946_v12 = vadd.f32 0.001143296, %v945_v5  ;;  %v1225_v25 = vmul.f32 3.8918573e-05, %v2065_v9  ;;  %v366_v3 = vpop.f32.mrf.mxu2 }
  0xae   : > { %v459_v14 = vadd.f32 0.05243302, %v458_v6  ;;  %v470_v15 = vadd.f32 0.112945676, %v469_v7  ;;  %v699_v16 = vadd.f32 0.05243302, %v698_v8 }
  0xaf   : > { %v710_v17 = vadd.f32 0.112945676, %v709_v10  ;;  %v936_v18 = vmul.f32 %v935_v11, %v2053_v61  ;;  %v947_v19 = vmul.f32 %v946_v12, %v2053_v61  ;;  %v1215_v29 = vadd.f32 0.00028619796, %v1214_v20 }
  0xb0   : > { %v460_v22 = vmul.f32 %v459_v14, %v2027_v39  ;;  %v471_v23 = vmul.f32 %v470_v15, %v2027_v39  ;;  %v700_v24 = vmul.f32 %v699_v16, %v2029_v40  ;;  %v1226_v51 = vadd.f32 0.001143296, %v1225_v25 }
  0xb1   : > { %v711_v26 = vmul.f32 %v710_v17, %v2029_v40  ;;  %v937_v27 = vadd.f32 0.0036580483, %v936_v18  ;;  %v948_v28 = vadd.f32 0.014752088, %v947_v19  ;;  %v1216_v46 = vmul.f32 %v1215_v29, %v2065_v9 }
  0xb2   : > { %v461_v31 = vadd.f32 0.18741608, %v460_v22  ;;  %v472_v32 = vadd.f32 0.4994258, %v471_v23  ;;  %v701_v37 = vadd.f32 0.18741608, %v700_v24  ;;  %v1227_v2 = vmul.f32 %v1226_v51, %v2065_v9 }
  0xb3   : > { %v712_v41 = vadd.f32 0.4994258, %v711_v26  ;;  %v938_v42 = vmul.f32 %v937_v27, %v2053_v61  ;;  %v949_v45 = vmul.f32 %v948_v28, %v2053_v61  ;;  %v1217_v55 = vadd.f32 0.0036580483, %v1216_v46 }
  0xb4   : > { %v462_v47 = vmul.f32 %v461_v31, %v2027_v39  ;;  %v473_v48 = vmul.f32 %v472_v32, %v2027_v39  ;;  %v702_v50 = vmul.f32 %v701_v37, %v2029_v40  ;;  %v2094_v59 = vmul.f32 0.70710677, %v2080_v38 }
  0xb5   : > { %v713_v52 = vmul.f32 %v712_v41, %v2029_v40  ;;  %v939_v53 = vadd.f32 0.05243302, %v938_v42  ;;  %v950_v54 = vadd.f32 0.112945676, %v949_v45  ;;  %v1218_v0 = vmul.f32 %v1217_v55, %v2065_v9 }
  0xb6   : > { %v2089_v57 = vadd.f32 1.0, %v473_v48  ;;  %v2102_v40 = vmul.f32 0.5, %v2012_v33  ;;  %v463_v1 = vadd.f32 1.1283791, %v462_v47  ;;  %v2107_v4 = vmul.f32 0.5, %v2015_v34 }
  0xb7   : > { %v2096_v60 = vadd.f32 1.0, %v713_v52  ;;  %v940_v39 = vmul.f32 %v939_v53, %v2053_v61  ;;  %v951_v62 = vmul.f32 %v950_v54, %v2053_v61  ;;  %v703_v5 = vadd.f32 1.1283791, %v702_v50 }
  0xb8   : > { %1733 = vrcp.f32 %v2089_v57  ;;  %v2111_v6 = vmul.f32 0.5, %v2032_v43  ;;  %v2114_v8 = vmul.f32 0.5, %v2035_v44  ;;  %v2116_v33 = vmin.f32 %v492_v58, 16.0 }
  0xb9   : > { %1735 = vrcp.f32 %v2096_v60  ;;  %v941_v7 = vadd.f32 0.18741608, %v940_v39  ;;  %v732_v10 = vmul.f32 %v2094_v59, %v2094_v59  ;;  %v484_v11 = vand.u32 2147483647, %v2089_v57 }
  0xba   : > { %v952_v12 = vadd.f32 0.4994258, %v951_v62  ;;  %v1219_v34 = vadd.f32 0.05243302, %v1218_v0  ;;  %v2122_v14 = vadd.f32 %v2009_v30, %v366_v3  ;;  %v464_v15 = vmul.f32 %v463_v1, %v2018_v35 }
  0xbb   : > { %v486_v43 = vand.u32 2147483648, %v2089_v57  ;;  %v942_v16 = vmul.f32 %v941_v7, %v2053_v61  ;;  %v1228_v44 = vadd.f32 0.014752088, %v1227_v2  ;;  %vm480_vm2 = vweird.f32 %v2089_v57 }
  0xbc   : > { %v704_v17 = vmul.f32 %v703_v5, %v2021_v36  ;;  %v724_v18 = vand.u32 2147483647, %v2096_v60  ;;  %v953_v19 = vmul.f32 %v952_v12, %v2053_v61  ;;  %vm720_vm3 = vweird.f32 %v2096_v60 }
  0xbd   : > { %v726_v21 = vand.u32 2147483648, %v2096_v60  ;;  %v1220_v35 = vmul.f32 %v1219_v34, %v2065_v9  ;;  %v1229_v22 = vmul.f32 %v1228_v44, %v2065_v9  ;;  %vm2136_vm4 = vcmp.eq.f32.partialorder %v484_v11, 8.507059e+37 }
  0xbe   : > { %v1734_v20 = vpop.eup %1733  ;;  %v2140_v36 = vadd.f32 1.0, %v953_v19  ;;  %v494_v61 = vmul.f32 2.1237322e-06, %v2116_v33  ;;  %v505_v26 = vmul.f32 3.8918573e-05, %v2116_v33  ;;  %v487_v27 = vor.u32 1.1754944e-38, %v486_v43 }
  0xbf   : > { %v1736_v23 = vpop.eup %1735  ;;  %v476_v24 = vmul.f32 %v1734_v20, %v2089_v57  ;;  %v943_v29 = vadd.f32 1.1283791, %v942_v16  ;;  %v1230_v31 = vadd.f32 0.112945676, %v1229_v22  ;;  %vm2145_vm5 = vcmp.eq.f32.partialorder %v724_v18, 8.507059e+37 }
  0xc0   : > { %v716_v28 = vmul.f32 %v1736_v23, %v2096_v60  ;;  %1737 = vrcp.f32 %v2140_v36  ;;  %v2150_v41 = vmin.f32 %v732_v10, 16.0  ;;  %vm481_vm6 = vweird.f32 %v1734_v20 }
  0xc1   : > { %v477_v32 = vsub.f32 1.0, %v476_v24  ;;  %v727_v45 = vor.u32 1.1754944e-38, %v726_v21  ;;  %v1231_v46 = vmul.f32 %v1230_v31, %v2065_v9  ;;  %v1221_v48 = vadd.f32 0.18741608, %v1220_v35  ;;  %vm482_vm8 = vmor %vm480_vm2, %vm481_vm6 }
  0xc2   : > { %v717_v42 = vsub.f32 1.0, %v716_v28  ;;  %v495_v50 = vadd.f32 0.00028619796, %v494_v61  ;;  %v506_v51 = vadd.f32 0.001143296, %v505_v26  ;;  %vm721_vm7 = vweird.f32 %v1736_v23 }
  0xc3   : > { %v478_v47 = vmul.f32 %v1734_v20, %v477_v32  ;;  %v2154_v53 = vmul.f32 %v943_v29, %v2042_v49  ;;  %v1232_v54 = vadd.f32 0.4994258, %v1231_v46  ;;  %v734_v62 = vmul.f32 2.1237322e-06, %v2150_v41  ;;  %vm722_vm10 = vmor %vm720_vm3, %vm721_vm7 }
  0xc4   : > { %v718_v52 = vmul.f32 %v1736_v23, %v717_v42  ;;  %v496_v58 = vmul.f32 %v495_v50, %v2116_v33  ;;  %v507_v39 = vmul.f32 %v506_v51, %v2116_v33  ;;  %vm960_vm9 = vweird.f32 %v2140_v36 }
  0xc5   : > { %v479_v55 = vadd.f32 %v1734_v20, %v478_v47  ;;  %v964_v1 = vand.u32 2147483647, %v2140_v36  ;;  %v1233_v49 = vmul.f32 %v1232_v54, %v2065_v9  ;;  %v735_v10 = vadd.f32 0.00028619796, %v734_v62 }
  0xc6   : > { %v719_v0 = vadd.f32 %v1736_v23, %v718_v52  ;;  %v1738_v2 = vpop.eup %1737  ;;  %v497_v5 = vadd.f32 0.0036580483, %v496_v58  ;;  %v508_v7 = vadd.f32 0.014752088, %v507_v39  ;;  %v966_v34 = vand.u32 2147483648, %v2140_v36 }
  0xc7   : > { %v483_v3 = vsel %vm482_vm8, %v1734_v20, %v479_v55  ;;  %v956_v12 = vmul.f32 %v1738_v2, %v2140_v36  ;;  %v2173_v44 = vadd.f32 1.0, %v1233_v49  ;;  %v736_v21 = vmul.f32 %v735_v10, %v2150_v41 }
  0xc8   : > { %v488_v57 = vsel %vm2136_vm4, %v487_v27, %v483_v3  ;;  %v723_v11 = vsel %vm722_vm10, %v1736_v23, %v719_v0  ;;  %v498_v60 = vmul.f32 %v497_v5, %v2116_v33  ;;  %v509_v20 = vmul.f32 %v508_v7, %v2116_v33 }
  0xc9   : > { %v489_v43 = vmul.f32 %v488_v57, %v464_v15  ;;  %v728_v16 = vsel %vm2145_vm5, %v727_v45, %v723_v11  ;;  %v957_v19 = vsub.f32 1.0, %v956_v12  ;;  %v1222_v22 = vmul.f32 %v1221_v48, %v2065_v9 }
  0xca   : > { %v729_v18 = vmul.f32 %v728_v16, %v704_v17  ;;  %1739 = vrcp.f32 %v2173_v44  ;;  %v745_v15 = vmul.f32 3.8918573e-05, %v2150_v41  ;;  %vm961_vm11 = vweird.f32 %v1738_v2 }
  0xcb   : > { %v1643_v35 = vclamps-f32 %v489_v43, 1.0  ;;  %v958_v24 = vmul.f32 %v1738_v2, %v957_v19  ;;  %v499_v25 = vadd.f32 0.05243302, %v498_v60  ;;  %vm2185_vm12 = vcmp.eq.f32.partialorder %v964_v1, 8.507059e+37  ;;  %vm962_vm13 = vmor %vm960_vm9, %vm961_vm11 }
  0xcc   : > { %v1649_v23 = vclamps-f32 %v729_v18, 1.0  ;;  %v510_v17 = vadd.f32 0.112945676, %v509_v20  ;;  %v737_v27 = vadd.f32 0.0036580483, %v736_v21  ;;  %v967_v31 = vor.u32 1.1754944e-38, %v966_v34  ;;  %v333_v21 = vpop.f32.mrf.mxu0 }
  0xcd   : > { %v1452_v61 = vadd.f32 1.0, %v1643_v35  ;;  %v959_v29 = vadd.f32 %v1738_v2, %v958_v24  ;;  %v500_v9 = vmul.f32 %v499_v25, %v2116_v33  ;;  %v746_v45 = vadd.f32 0.001143296, %v745_v15 }
  0xce   : > { %v1458_v28 = vadd.f32 1.0, %v1649_v23  ;;  %v511_v37 = vmul.f32 %v510_v17, %v2116_v33  ;;  %v738_v42 = vmul.f32 %v737_v27, %v2150_v41  ;;  %v2197_v50 = vmul.f32 0.70710677, %v2122_v14 }
  0xcf   : > { %v1477_v32 = vmul.f32 %v1452_v61, %v2102_v40  ;;  %v963_v47 = vsel %vm962_vm13, %v1738_v2, %v959_v29  ;;  %v501_v48 = vadd.f32 0.18741608, %v500_v9  ;;  %v2206_v36 = vmul.f32 0.5, %v2058_v63  ;;  %v387_v63 = vpop.f32.mrf.mxu3 }
  0xd0   : > { %v1483_v46 = vmul.f32 %v1458_v28, %v2107_v4  ;;  %v1740_v51 = vpop.eup %1739  ;;  %v968_v40 = vsel %vm2185_vm12, %v967_v31, %v963_v47  ;;  %v512_v52 = vadd.f32 0.4994258, %v511_v37  ;;  %v747_v4 = vmul.f32 %v746_v45, %v2150_v41 }
  0xd1   : > { %1502 = vst [vmem:[%s2200_s26] sm:$0xff] %v1477_v32  ;;  %v969_v54 = vmul.f32 %v968_v40, %v2154_v53  ;;  %v1223_v55 = vadd.f32 1.1283791, %v1222_v22  ;;  %v1236_v58 = vmul.f32 %v1740_v51, %v2173_v44  ;;  %v739_v39 = vadd.f32 0.05243302, %v738_v42 }
  0xd2   : > { %1508 = vst [vmem:[%s2200_s26 + $0x30] sm:$0xff] %v1483_v46  ;;  %v1244_v62 = vand.u32 2147483647, %v2173_v44  ;;  %v513_v0 = vmul.f32 %v512_v52, %v2116_v33  ;;  %v748_v1 = vadd.f32 0.014752088, %v747_v4  ;;  %v972_v49 = vmul.f32 %v2197_v50, %v2197_v50 }
  0xd3   : > { %v1655_v2 = vclamps-f32 %v969_v54, 1.0  ;;  %v1237_v3 = vsub.f32 1.0, %v1236_v58  ;;  %v1246_v5 = vand.u32 2147483648, %v2173_v44  ;;  %v502_v7 = vmul.f32 %v501_v48, %v2116_v33 }
  0xd4   : > { %vm1241_vm14 = vweird.f32 %v1740_v51  ;;  %v2218_v53 = vadd.f32 1.0, %v513_v0  ;;  %v749_v10 = vmul.f32 %v748_v1, %v2150_v41  ;;  %v2221_v57 = vmin.f32 %v972_v49, 16.0 }
  0xd5   : > { %v1464_v11 = vadd.f32 1.0, %v1655_v2  ;;  %v1238_v12 = vmul.f32 %v1740_v51, %v1237_v3  ;;  %v740_v34 = vmul.f32 %v739_v39, %v2150_v41  ;;  %v2225_v43 = vadd.f32 %v2009_v30, %v387_v63  ;;  %v351_v63 = vpop.f32.mrf.mxu1 }
  0xd6   : > { %v1224_v16 = vmul.f32 %v1223_v55, %v2047_v56  ;;  %vm1240_vm15 = vweird.f32 %v2173_v44  ;;  %1741 = vrcp.f32 %v2218_v53  ;;  %v2231_v33 = vmul.f32 0.5, %v2080_v38 }
  0xd7   : > { %v1489_v60 = vmul.f32 %v1464_v11, %v2111_v6  ;;  %v1239_v18 = vadd.f32 %v1740_v51, %v1238_v12  ;;  %v503_v19 = vadd.f32 1.1283791, %v502_v7  ;;  %v750_v20 = vadd.f32 0.112945676, %v749_v10  ;;  %vm1242_vm0 = vmor %vm1240_vm15, %vm1241_vm14 }
  0xd8   : > { %vm1245_vm1 = vcmp.eq.f32.partialorder %v1244_v62, 8.507059e+37  ;;  %v1247_v35 = vor.u32 1.1754944e-38, %v1246_v5  ;;  %v974_v22 = vmul.f32 2.1237322e-06, %v2221_v57  ;;  %v985_v56 = vmul.f32 3.8918573e-05, %v2221_v57 }
  0xd9   : > { %1514 = vst [vmem:[%s2200_s26 + $0x60] sm:$0xff] %v1489_v60  ;;  %v1243_v44 = vsel %vm1242_vm0, %v1740_v51, %v1239_v18  ;;  %v741_v15 = vadd.f32 0.18741608, %v740_v34  ;;  %v751_v38 = vmul.f32 %v750_v20, %v2150_v41  ;;  %v2240_v23 = vmul.f32 0.70710677, %v2225_v43 }
  0xda   : > { %v1248_v6 = vsel %vm1245_vm1, %v1247_v35, %v1243_v44  ;;  %v975_v24 = vadd.f32 0.00028619796, %v974_v22  ;;  %v986_v25 = vadd.f32 0.001143296, %v985_v56  ;;  %v2243_v61 = vadd.f32 %v2009_v30, %v333_v21 }
  0xdb   : > { %v1249_v26 = vmul.f32 %v1248_v6, %v1224_v16  ;;  %v504_v17 = vmul.f32 %v503_v19, %v2069_v13  ;;  %v752_v27 = vadd.f32 0.4994258, %v751_v38  ;;  %v1252_v28 = vmul.f32 %v2240_v23, %v2240_v23 }
  0xdc   : > { %v1742_v29 = vpop.eup %1741  ;;  %v524_v31 = vand.u32 2147483647, %v2218_v53  ;;  %v976_v9 = vmul.f32 %v975_v24, %v2221_v57  ;;  %v987_v32 = vmul.f32 %v986_v25, %v2221_v57  ;;  %v2252_v37 = vmul.f32 0.70710677, %v2243_v61 }
  0xdd   : > { %v1662_v42 = vclamps-f32 %v1249_v26, 1.0  ;;  %v516_v45 = vmul.f32 %v1742_v29, %v2218_v53  ;;  %v526_v46 = vand.u32 2147483648, %v2218_v53  ;;  %v753_v13 = vmul.f32 %v752_v27, %v2150_v41 }
  0xde   : > { %v977_v47 = vadd.f32 0.0036580483, %v976_v9  ;;  %v988_v48 = vadd.f32 0.014752088, %v987_v32  ;;  %v2257_v51 = vmin.f32 %v1252_v28, 16.0  ;;  %v532_v40 = vmul.f32 %v2252_v37, %v2252_v37 }
  0xdf   : > { %v1471_v52 = vadd.f32 1.0, %v1662_v42  ;;  %v517_v4 = vsub.f32 1.0, %v516_v45  ;;  %v742_v54 = vmul.f32 %v741_v15, %v2150_v41  ;;  %v2262_v55 = vadd.f32 1.0, %v753_v13 }
  0xe0   : > { %v978_v58 = vmul.f32 %v977_v47, %v2221_v57  ;;  %v989_v39 = vmul.f32 %v988_v48, %v2221_v57  ;;  %v1254_v62 = vmul.f32 2.1237322e-06, %v2257_v51  ;;  %v1265_v0 = vmul.f32 3.8918573e-05, %v2257_v51 }
  0xe1   : > { %v1496_v1 = vmul.f32 %v1471_v52, %v2114_v8  ;;  %v518_v49 = vmul.f32 %v1742_v29, %v517_v4  ;;  %vm521_vm2 = vweird.f32 %v1742_v29  ;;  %1743 = vrcp.f32 %v2262_v55 }
  0xe2   : > { %vm520_vm3 = vweird.f32 %v2218_v53  ;;  %vm2271_vm4 = vcmp.eq.f32.partialorder %v524_v31, 8.507059e+37  ;;  %v979_v2 = vadd.f32 0.05243302, %v978_v58  ;;  %v2275_v3 = vmin.f32 %v532_v40, 16.0 }
  0xe3   : > { %1521 = vst [vmem:[%s2200_s26 + $0x98] sm:$0xff] %v1496_v1  ;;  %v519_v5 = vadd.f32 %v1742_v29, %v518_v49  ;;  %v527_v7 = vor.u32 1.1754944e-38, %v526_v46  ;;  %v990_v10 = vadd.f32 0.112945676, %v989_v39  ;;  %v1255_v11 = vadd.f32 0.00028619796, %v1254_v62  ;;  %vm522_vm5 = vmor %vm520_vm3, %vm521_vm2 }
  0xe4   : > { %v743_v8 = vadd.f32 1.1283791, %v742_v54  ;;  %v980_v12 = vmul.f32 %v979_v2, %v2221_v57  ;;  %v1266_v34 = vadd.f32 0.001143296, %v1265_v0  ;;  %v2280_v16 = vadd.f32 %v2009_v30, %v351_v63 }
  0xe5   : > { %v523_v53 = vsel %vm522_vm5, %v1742_v29, %v519_v5  ;;  %v991_v60 = vmul.f32 %v990_v10, %v2221_v57  ;;  %v1256_v18 = vmul.f32 %v1255_v11, %v2257_v51  ;;  %v534_v19 = vmul.f32 2.1237322e-06, %v2275_v3 }
  0xe6   : > { %v528_v20 = vsel %vm2271_vm4, %v527_v7, %v523_v53  ;;  %v981_v21 = vadd.f32 0.18741608, %v980_v12  ;;  %v1267_v35 = vmul.f32 %v1266_v34, %v2257_v51  ;;  %v545_v22 = vmul.f32 3.8918573e-05, %v2275_v3 }
  0xe7   : > { %v1744_v56 = vpop.eup %1743  ;;  %v529_v44 = vmul.f32 %v528_v20, %v504_v17  ;;  %v992_v15 = vadd.f32 0.4994258, %v991_v60  ;;  %v1257_v38 = vadd.f32 0.0036580483, %v1256_v18  ;;  %v535_v6 = vadd.f32 0.00028619796, %v534_v19 }
  0xe8   : > { %v756_v24 = vmul.f32 %v1744_v56, %v2262_v55  ;;  %v764_v25 = vand.u32 2147483647, %v2262_v55  ;;  %v766_v26 = vand.u32 2147483648, %v2262_v55  ;;  %v1268_v27 = vadd.f32 0.014752088, %v1267_v35 }
  0xe9   : > { %v1644_v28 = vclamps-f32 %v529_v44, 1.0  ;;  %v993_v29 = vmul.f32 %v992_v15, %v2221_v57  ;;  %v1258_v31 = vmul.f32 %v1257_v38, %v2257_v51  ;;  %v536_v9 = vmul.f32 %v535_v6, %v2275_v3 }
  0xea   : > { %v757_v32 = vsub.f32 1.0, %v756_v24  ;;  %v982_v17 = vmul.f32 %v981_v21, %v2221_v57  ;;  %v1269_v42 = vmul.f32 %v1268_v27, %v2257_v51  ;;  %v546_v45 = vadd.f32 0.001143296, %v545_v22  ;;  %v369_v22 = vpop.f32.mrf.mxu2 }
  0xeb   : > { %v1453_v46 = vadd.f32 1.0, %v1644_v28  ;;  %v2297_v13 = vadd.f32 1.0, %v993_v29  ;;  %v1259_v47 = vadd.f32 0.05243302, %v1258_v31  ;;  %v537_v48 = vadd.f32 0.0036580483, %v536_v9 }
  0xec   : > { %v758_v40 = vmul.f32 %v1744_v56, %v757_v32  ;;  %vm761_vm6 = vweird.f32 %v1744_v56  ;;  %v1270_v52 = vadd.f32 0.112945676, %v1269_v42  ;;  %v547_v4 = vmul.f32 %v546_v45, %v2275_v3 }
  0xed   : > { %v1478_v54 = vmul.f32 %v1453_v46, %v2206_v36  ;;  %vm760_vm7 = vweird.f32 %v2262_v55  ;;  %v2303_v57 = vmul.f32 0.5, %v2122_v14  ;;  %1745 = vrcp.f32 %v2297_v13 }
  0xee   : > { %v759_v58 = vadd.f32 %v1744_v56, %v758_v40  ;;  %v983_v39 = vadd.f32 1.1283791, %v982_v17  ;;  %v1260_v62 = vmul.f32 %v1259_v47, %v2257_v51  ;;  %v1271_v0 = vmul.f32 %v1270_v52, %v2257_v51  ;;  %vm762_vm8 = vmor %vm760_vm7, %vm761_vm6 }
  0xef   : > { %1503 = vst [vmem:[%s2200_s26 + $0x8] sm:$0xff] %v1478_v54  ;;  %v767_v1 = vor.u32 1.1754944e-38, %v766_v26  ;;  %v538_v49 = vmul.f32 %v537_v48, %v2275_v3  ;;  %v548_v63 = vadd.f32 0.014752088, %v547_v4  ;;  %v2311_v36 = vmul.f32 0.70710677, %v2280_v16 }
  0xf0   : > { %v744_v14 = vmul.f32 %v743_v8, %v2094_v59  ;;  %v763_v55 = vsel %vm762_vm8, %v1744_v56, %v759_v58  ;;  %vm765_vm9 = vcmp.eq.f32.partialorder %v764_v25, 8.507059e+37  ;;  %v1272_v41 = vadd.f32 0.4994258, %v1271_v0 }
  0xf1   : > { %v768_v2 = vsel %vm765_vm9, %v767_v1, %v763_v55  ;;  %v539_v5 = vadd.f32 0.05243302, %v538_v49  ;;  %v549_v7 = vmul.f32 %v548_v63, %v2275_v3  ;;  %v772_v10 = vmul.f32 %v2311_v36, %v2311_v36 }
  0xf2   : > { %v769_v11 = vmul.f32 %v768_v2, %v744_v14  ;;  %v984_v12 = vmul.f32 %v983_v39, %v2197_v50  ;;  %v1261_v34 = vadd.f32 0.18741608, %v1260_v62  ;;  %v1273_v53 = vmul.f32 %v1272_v41, %v2257_v51  ;;  %v390_v50 = vpop.f32.mrf.mxu3 }
  0xf3   : > { %v1746_v60 = vpop.eup %1745  ;;  %vm1000_vm10 = vweird.f32 %v2297_v13  ;;  %v540_v59 = vmul.f32 %v539_v5, %v2275_v3  ;;  %v550_v8 = vadd.f32 0.112945676, %v549_v7  ;;  %v2321_v18 = vmin.f32 %v772_v10, 16.0 }
  0xf4   : > { %v1650_v19 = vclamps-f32 %v769_v11, 1.0  ;;  %v996_v20 = vmul.f32 %v1746_v60, %v2297_v13  ;;  %v1004_v21 = vand.u32 2147483647, %v2297_v13  ;;  %v1006_v35 = vand.u32 2147483648, %v2297_v13 }
  0xf5   : > { %v2326_v56 = vadd.f32 1.0, %v1273_v53  ;;  %v541_v44 = vadd.f32 0.18741608, %v540_v59  ;;  %v551_v15 = vmul.f32 %v550_v8, %v2275_v3  ;;  %v774_v38 = vmul.f32 2.1237322e-06, %v2321_v18 }
  0xf6   : > { %v1459_v6 = vadd.f32 1.0, %v1650_v19  ;;  %v997_v24 = vsub.f32 1.0, %v996_v20  ;;  %v1262_v25 = vmul.f32 %v1261_v34, %v2257_v51  ;;  %v785_v26 = vmul.f32 3.8918573e-05, %v2321_v18 }
  0xf7   : > { %vm1001_vm11 = vweird.f32 %v1746_v60  ;;  %1747 = vrcp.f32 %v2326_v56  ;;  %v2334_v27 = vadd.f32 %v2009_v30, %v369_v22  ;;  %v2337_v28 = vadd.f32 %v2009_v30, %v390_v50 }
  0xf8   : > { %v1484_v29 = vmul.f32 %v1459_v6, %v2231_v33  ;;  %v998_v31 = vmul.f32 %v1746_v60, %v997_v24  ;;  %v542_v9 = vmul.f32 %v541_v44, %v2275_v3  ;;  %v552_v32 = vadd.f32 0.4994258, %v551_v15  ;;  %vm1002_vm13 = vmor %vm1000_vm10, %vm1001_vm11 }
  0xf9   : > { %vm2341_vm12 = vcmp.eq.f32.partialorder %v1004_v21, 8.507059e+37  ;;  %v1007_v51 = vor.u32 1.1754944e-38, %v1006_v35  ;;  %v775_v42 = vadd.f32 0.00028619796, %v774_v38  ;;  %v786_v45 = vadd.f32 0.001143296, %v785_v26 }
  0xfa   : > { %1509 = vst [vmem:[%s2200_s26 + $0x38] sm:$0xff] %v1484_v29  ;;  %v999_v46 = vadd.f32 %v1746_v60, %v998_v31  ;;  %v1263_v47 = vadd.f32 1.1283791, %v1262_v25  ;;  %v1284_v48 = vand.u32 2147483647, %v2326_v56  ;;  %v553_v40 = vmul.f32 %v552_v32, %v2275_v3 }
  0xfb   : > { %v1286_v33 = vand.u32 2147483648, %v2326_v56  ;;  %v776_v52 = vmul.f32 %v775_v42, %v2321_v18  ;;  %v787_v4 = vmul.f32 %v786_v45, %v2321_v18  ;;  %v2355_v54 = vmul.f32 0.70710677, %v2334_v27 }
  0xfc   : > { %v1003_v58 = vsel %vm1002_vm13, %v1746_v60, %v999_v46  ;;  %v543_v39 = vadd.f32 1.1283791, %v542_v9  ;;  %v2357_v62 = vadd.f32 1.0, %v553_v40  ;;  %v2360_v0 = vmul.f32 0.70710677, %v2337_v28 }
  0xfd   : > { %v1748_v3 = vpop.eup %1747  ;;  %v1008_v13 = vsel %vm2341_vm12, %v1007_v51, %v1003_v58  ;;  %v777_v1 = vadd.f32 0.0036580483, %v776_v52  ;;  %v788_v49 = vadd.f32 0.014752088, %v787_v4  ;;  %v1012_v63 = vmul.f32 %v2355_v54, %v2355_v54 }
  0xfe   : > { %v1009_v14 = vmul.f32 %v1008_v13, %v984_v12  ;;  %v2367_v55 = vmul.f32 0.5, %v2225_v43  ;;  %v1276_v41 = vmul.f32 %v1748_v3, %v2326_v56  ;;  %1749 = vrcp.f32 %v2357_v62 }
  0xff   : > { %v1264_v2 = vmul.f32 %v1263_v47, %v2240_v23  ;;  %vm1280_vm14 = vweird.f32 %v2326_v56  ;;  %vm2373_vm15 = vcmp.eq.f32.partialorder %v1284_v48, 8.507059e+37  ;;  %v778_v7 = vmul.f32 %v777_v1, %v2321_v18 }
 0x100   : > { %v1656_v10 = vclamps-f32 %v1009_v14, 1.0  ;;  %v1277_v11 = vsub.f32 1.0, %v1276_v41  ;;  %v789_v12 = vmul.f32 %v788_v49, %v2321_v18  ;;  %v2379_v43 = vmin.f32 %v1012_v63, 16.0 }
 0x101   : > { %vm1281_vm0 = vweird.f32 %v1748_v3  ;;  %v1287_v34 = vor.u32 1.1754944e-38, %v1286_v33  ;;  %v544_v53 = vmul.f32 %v543_v39, %v2252_v37  ;;  %v1292_v23 = vmul.f32 %v2360_v0, %v2360_v0  ;;  %v336_v33 = vpop.f32.mrf.mxu0 }
 0x102   : > { %v1465_v60 = vadd.f32 1.0, %v1656_v10  ;;  %v1278_v59 = vmul.f32 %v1748_v3, %v1277_v11  ;;  %v790_v8 = vadd.f32 0.112945676, %v789_v12  ;;  %v1014_v19 = vmul.f32 2.1237322e-06, %v2379_v43  ;;  %vm1282_vm2 = vmor %vm1280_vm14, %vm1281_vm0 }
 0x103   : > { %vm560_vm1 = vweird.f32 %v2357_v62  ;;  %v779_v20 = vadd.f32 0.05243302, %v778_v7  ;;  %v1025_v21 = vmul.f32 3.8918573e-05, %v2379_v43  ;;  %v2387_v35 = vmin.f32 %v1292_v23, 16.0 }
 0x104   : > { %v1750_v22 = vpop.eup %1749  ;;  %v1490_v50 = vmul.f32 %v1465_v60, %v2303_v57  ;;  %v1279_v37 = vadd.f32 %v1748_v3, %v1278_v59  ;;  %v791_v44 = vmul.f32 %v790_v8, %v2321_v18  ;;  %v1015_v15 = vadd.f32 0.00028619796, %v1014_v19 }
 0x105   : > { %v556_v38 = vmul.f32 %v1750_v22, %v2357_v62  ;;  %v564_v6 = vand.u32 2147483647, %v2357_v62  ;;  %v566_v24 = vand.u32 2147483648, %v2357_v62  ;;  %v1026_v25 = vadd.f32 0.001143296, %v1025_v21 }
 0x106   : > { %1515 = vst [vmem:[%s2200_s26 + $0x68] sm:$0xff] %v1490_v50  ;;  %v1283_v26 = vsel %vm1282_vm2, %v1748_v3, %v1279_v37  ;;  %v792_v29 = vadd.f32 0.4994258, %v791_v44  ;;  %v1016_v57 = vmul.f32 %v1015_v15, %v2379_v43  ;;  %v1294_v31 = vmul.f32 2.1237322e-06, %v2387_v35 }
 0x107   : > { %v1288_v9 = vsel %vm2373_vm15, %v1287_v34, %v1283_v26  ;;  %v557_v32 = vsub.f32 1.0, %v556_v38  ;;  %v780_v56 = vmul.f32 %v779_v20, %v2321_v18  ;;  %v1027_v17 = vmul.f32 %v1026_v25, %v2379_v43 }
 0x108   : > { %v1289_v51 = vmul.f32 %v1288_v9, %v1264_v2  ;;  %v793_v42 = vmul.f32 %v792_v29, %v2321_v18  ;;  %v1017_v45 = vadd.f32 0.0036580483, %v1016_v57  ;;  %v1295_v46 = vadd.f32 0.00028619796, %v1294_v31 }
 0x109   : > { %v558_v47 = vmul.f32 %v1750_v22, %v557_v32  ;;  %vm561_vm3 = vweird.f32 %v1750_v22  ;;  %v1028_v48 = vadd.f32 0.014752088, %v1027_v17  ;;  %v1305_v40 = vmul.f32 3.8918573e-05, %v2387_v35  ;;  %v372_v32 = vpop.f32.mrf.mxu2 }
 0x10a   : > { %v1663_v52 = vclamps-f32 %v1289_v51, 1.0  ;;  %v2406_v4 = vadd.f32 1.0, %v793_v42  ;;  %v1018_v58 = vmul.f32 %v1017_v45, %v2379_v43  ;;  %v1296_v39 = vmul.f32 %v1295_v46, %v2387_v35  ;;  %vm562_vm4 = vmor %vm560_vm1, %vm561_vm3 }
 0x10b   : > { %v559_v3 = vadd.f32 %v1750_v22, %v558_v47  ;;  %v567_v13 = vor.u32 1.1754944e-38, %v566_v24  ;;  %v781_v1 = vadd.f32 0.18741608, %v780_v56  ;;  %v1029_v49 = vmul.f32 %v1028_v48, %v2379_v43  ;;  %v354_v24 = vpop.f32.mrf.mxu1 }
 0x10c   : > { %v1472_v63 = vadd.f32 1.0, %v1663_v52  ;;  %1751 = vrcp.f32 %v2406_v4  ;;  %v1306_v14 = vadd.f32 0.001143296, %v1305_v40  ;;  %v2415_v41 = vadd.f32 %v2009_v30, %v336_v33 }
 0x10d   : > { %v563_v2 = vsel %vm562_vm4, %v1750_v22, %v559_v3  ;;  %vm565_vm5 = vcmp.eq.f32.partialorder %v564_v6, 8.507059e+37  ;;  %v1019_v5 = vadd.f32 0.05243302, %v1018_v58  ;;  %v1030_v7 = vadd.f32 0.112945676, %v1029_v49 }
 0x10e   : > { %v1497_v10 = vmul.f32 %v1472_v63, %v2367_v55  ;;  %v568_v11 = vsel %vm565_vm5, %v567_v13, %v563_v2  ;;  %v1297_v12 = vadd.f32 0.0036580483, %v1296_v39  ;;  %v782_v23 = vmul.f32 %v781_v1, %v2321_v18 }
 0x10f   : > { %v569_v34 = vmul.f32 %v568_v11, %v544_v53  ;;  %v1020_v62 = vmul.f32 %v1019_v5, %v2379_v43  ;;  %v1031_v60 = vmul.f32 %v1030_v7, %v2379_v43  ;;  %v404_v59 = vmul.f32 0.5, %v2243_v61 }
 0x110   : > { %1522 = vst [vmem:[%s2200_s26 + $0xa0] sm:$0xff] %v1497_v10  ;;  %v1298_v8 = vmul.f32 %v1297_v12, %v2387_v35  ;;  %v1307_v19 = vmul.f32 %v1306_v14, %v2387_v35  ;;  %v2426_v20 = vmul.f32 0.70710677, %v2415_v41  ;;  %v2429_v21 = vmul.f32 0.5, %v2280_v16 }
 0x111   : > { %v1645_v55 = vclamps-f32 %v569_v34, 1.0  ;;  %v1021_v53 = vadd.f32 0.18741608, %v1020_v62  ;;  %v1032_v18 = vadd.f32 0.4994258, %v1031_v60  ;;  %v2432_v50 = vmul.f32 0.5, %v2334_v27 }
 0x112   : > { %v1752_v22 = vpop.eup %1751  ;;  %v2435_v37 = vmul.f32 0.5, %v2337_v28  ;;  %v1308_v61 = vadd.f32 0.014752088, %v1307_v19  ;;  %v572_v44 = vmul.f32 %v2426_v20, %v2426_v20  ;;  %v783_v38 = vadd.f32 1.1283791, %v782_v23 }
 0x113   : > { %v1454_v15 = vadd.f32 1.0, %v1645_v55  ;;  %v796_v6 = vmul.f32 %v1752_v22, %v2406_v4  ;;  %v1299_v16 = vadd.f32 0.05243302, %v1298_v8  ;;  %v804_v25 = vand.u32 2147483647, %v2406_v4 }
 0x114   : > { %v1033_v26 = vmul.f32 %v1032_v18, %v2379_v43  ;;  %v1309_v27 = vmul.f32 %v1308_v61, %v2387_v35  ;;  %v2443_v29 = vmin.f32 %v572_v44, 16.0  ;;  %v806_v31 = vand.u32 2147483648, %v2406_v4 }
 0x115   : > { %v1479_v28 = vmul.f32 %v1454_v15, %v404_v59  ;;  %v797_v57 = vsub.f32 1.0, %v796_v6  ;;  %v1022_v9 = vmul.f32 %v1021_v53, %v2379_v43  ;;  %vm801_vm6 = vweird.f32 %v1752_v22  ;;  %v2462_v43 = vld [vmem:[%s2975_s2] ss:$0 sm:$0xff] }
 0x116   : > { %v2447_v56 = vadd.f32 1.0, %v1033_v26  ;;  %v1310_v17 = vadd.f32 0.112945676, %v1309_v27  ;;  %v2450_v51 = vadd.f32 %v2009_v30, %v354_v24  ;;  %v1300_v45 = vmul.f32 %v1299_v16, %v2387_v35 }
 0x117   : > { %1504 = vst [vmem:[%s2200_s26 + $0x10] sm:$0xff] %v1479_v28  ;;  %v798_v42 = vmul.f32 %v1752_v22, %v797_v57  ;;  %v574_v46 = vmul.f32 2.1237322e-06, %v2443_v29  ;;  %v585_v47 = vmul.f32 3.8918573e-05, %v2443_v29  ;;  %v784_v48 = vmul.f32 %v783_v38, %v2311_v36 }
 0x118   : > { %vm800_vm7 = vweird.f32 %v2406_v4  ;;  %1753 = vrcp.f32 %v2447_v56  ;;  %v2465_v30 = vadd.f32 %v2462_v43, %v372_v32  ;;  %v1023_v33 = vadd.f32 1.1283791, %v1022_v9 }
 0x119   : > { %v799_v40 = vadd.f32 %v1752_v22, %v798_v42  ;;  %v1311_v52 = vmul.f32 %v1310_v17, %v2387_v35  ;;  %v575_v58 = vadd.f32 0.00028619796, %v574_v46  ;;  %vm802_vm8 = vmor %vm800_vm7, %vm801_vm6  ;;  %vm805_vm9 = vcmp.eq.f32.partialorder %v804_v25, 8.507059e+37 }
 0x11a   : > { %v807_v36 = vor.u32 1.1754944e-38, %v806_v31  ;;  %v586_v4 = vadd.f32 0.001143296, %v585_v47  ;;  %v2470_v39 = vmul.f32 0.70710677, %v2450_v51  ;;  %v1024_v10 = vmul.f32 %v1023_v33, %v2355_v54 }
 0x11b   : > { %v803_v3 = vsel %vm802_vm8, %v1752_v22, %v799_v40  ;;  %v1301_v13 = vadd.f32 0.18741608, %v1300_v45  ;;  %v1312_v1 = vadd.f32 0.4994258, %v1311_v52  ;;  %v576_v49 = vmul.f32 %v575_v58, %v2443_v29 }
 0x11c   : > { %v808_v63 = vsel %vm805_vm9, %v807_v36, %v803_v3  ;;  %v587_v14 = vmul.f32 %v586_v4, %v2443_v29  ;;  %v812_v2 = vmul.f32 %v2470_v39, %v2470_v39  ;;  %v2477_v5 = vmul.f32 0.70710677, %v2465_v30 }
 0x11d   : > { %v809_v7 = vmul.f32 %v808_v63, %v784_v48  ;;  %v1313_v11 = vmul.f32 %v1312_v1, %v2387_v35  ;;  %v577_v12 = vadd.f32 0.0036580483, %v576_v49  ;;  %v1044_v23 = vand.u32 2147483647, %v2447_v56 }
 0x11e   : > { %v1754_v34 = vpop.eup %1753  ;;  %v588_v62 = vadd.f32 0.014752088, %v587_v14  ;;  %v2482_v60 = vmin.f32 %v812_v2, 16.0  ;;  %v1052_v59 = vmul.f32 %v2477_v5, %v2477_v5  ;;  %v1046_v55 = vand.u32 2147483648, %v2447_v56 }
 0x11f   : > { %v1651_v8 = vclamps-f32 %v809_v7, 1.0  ;;  %v1036_v19 = vmul.f32 %v1754_v34, %v2447_v56  ;;  %v2488_v53 = vadd.f32 1.0, %v1313_v11  ;;  %v578_v54 = vmul.f32 %v577_v12, %v2443_v29  ;;  %v393_v12 = vpop.f32.mrf.mxu3 }
 0x120   : > { %v589_v18 = vmul.f32 %v588_v62, %v2443_v29  ;;  %v814_v22 = vmul.f32 2.1237322e-06, %v2482_v60  ;;  %v825_v61 = vmul.f32 3.8918573e-05, %v2482_v60  ;;  %vm1040_vm10 = vweird.f32 %v2447_v56 }
 0x121   : > { %v1460_v44 = vadd.f32 1.0, %v1651_v8  ;;  %v1037_v15 = vsub.f32 1.0, %v1036_v19  ;;  %1755 = vrcp.f32 %v2488_v53  ;;  %vm1041_vm11 = vweird.f32 %v1754_v34 }
 0x122   : > { %v1302_v38 = vmul.f32 %v1301_v13, %v2387_v35  ;;  %v579_v6 = vadd.f32 0.05243302, %v578_v54  ;;  %v2497_v16 = vmin.f32 %v1052_v59, 16.0  ;;  %v590_v26 = vadd.f32 0.112945676, %v589_v18  ;;  %vm1042_vm13 = vmor %vm1040_vm10, %vm1041_vm11 }
 0x123   : > { %v1485_v24 = vmul.f32 %v1460_v44, %v2429_v21  ;;  %v1038_v25 = vmul.f32 %v1754_v34, %v1037_v15  ;;  %v815_v27 = vadd.f32 0.00028619796, %v814_v22  ;;  %vm2500_vm12 = vcmp.eq.f32.partialorder %v1044_v23, 8.507059e+37 }
 0x124   : > { %v1047_v57 = vor.u32 1.1754944e-38, %v1046_v55  ;;  %v580_v31 = vmul.f32 %v579_v6, %v2443_v29  ;;  %v826_v9 = vadd.f32 0.001143296, %v825_v61  ;;  %v591_v35 = vmul.f32 %v590_v26, %v2443_v29 }
 0x125   : > { %1510 = vst [vmem:[%s2200_s26 + $0x40] sm:$0xff] %v1485_v24  ;;  %v1039_v32 = vadd.f32 %v1754_v34, %v1038_v25  ;;  %v816_v17 = vmul.f32 %v815_v27, %v2482_v60  ;;  %v1054_v42 = vmul.f32 2.1237322e-06, %v2497_v16  ;;  %v1303_v21 = vadd.f32 1.1283791, %v1302_v38 }
 0x126   : > { %v581_v45 = vadd.f32 0.18741608, %v580_v31  ;;  %v827_v46 = vmul.f32 %v826_v9, %v2482_v60  ;;  %v1065_v47 = vmul.f32 3.8918573e-05, %v2497_v16  ;;  %v592_v33 = vadd.f32 0.4994258, %v591_v35 }
 0x127   : > { %v1756_v48 = vpop.eup %1755  ;;  %v1043_v40 = vsel %vm1042_vm13, %v1754_v34, %v1039_v32  ;;  %v817_v52 = vadd.f32 0.0036580483, %v816_v17  ;;  %v1055_v58 = vadd.f32 0.00028619796, %v1054_v42  ;;  %v1324_v3 = vand.u32 2147483647, %v2488_v53 }
 0x128   : > { %v1048_v36 = vsel %vm2500_vm12, %v1047_v57, %v1043_v40  ;;  %v1316_v4 = vmul.f32 %v1756_v48, %v2488_v53  ;;  %v1326_v56 = vand.u32 2147483648, %v2488_v53  ;;  %v593_v1 = vmul.f32 %v592_v33, %v2443_v29 }
 0x129   : > { %v1049_v13 = vmul.f32 %v1048_v36, %v1024_v10  ;;  %v818_v49 = vmul.f32 %v817_v52, %v2482_v60  ;;  %v828_v63 = vadd.f32 0.014752088, %v827_v46  ;;  %v582_v2 = vmul.f32 %v581_v45, %v2443_v29 }
 0x12a   : > { %v1317_v14 = vsub.f32 1.0, %v1316_v4  ;;  %v1056_v7 = vmul.f32 %v1055_v58, %v2497_v16  ;;  %v1066_v11 = vadd.f32 0.001143296, %v1065_v47  ;;  %v2523_v23 = vadd.f32 1.0, %v593_v1 }
 0x12b   : > { %v1657_v34 = vclamps-f32 %v1049_v13, 1.0  ;;  %v819_v62 = vadd.f32 0.05243302, %v818_v49  ;;  %v829_v59 = vmul.f32 %v828_v63, %v2482_v60  ;;  %vm1321_vm14 = vweird.f32 %v1756_v48 }
 0x12c   : > { %v1318_v8 = vmul.f32 %v1756_v48, %v1317_v14  ;;  %v1057_v10 = vadd.f32 0.0036580483, %v1056_v7  ;;  %v1067_v19 = vmul.f32 %v1066_v11, %v2497_v16  ;;  %vm1320_vm15 = vweird.f32 %v2488_v53 }
 0x12d   : > { %v1466_v55 = vadd.f32 1.0, %v1657_v34  ;;  %1757 = vrcp.f32 %v2523_v23  ;;  %v2530_v29 = vadd.f32 %v2462_v43, %v393_v12  ;;  %v1327_v18 = vor.u32 1.1754944e-38, %v1326_v56  ;;  %vm1322_vm0 = vmor %vm1320_vm15, %vm1321_vm14 }
 0x12e   : > { %v1319_v54 = vadd.f32 %v1756_v48, %v1318_v8  ;;  %v820_v22 = vmul.f32 %v819_v62, %v2482_v60  ;;  %v830_v61 = vadd.f32 0.112945676, %v829_v59  ;;  %v583_v15 = vadd.f32 1.1283791, %v582_v2 }
 0x12f   : > { %v1491_v44 = vmul.f32 %v1466_v55, %v2432_v50  ;;  %v1058_v38 = vmul.f32 %v1057_v10, %v2497_v16  ;;  %v1068_v6 = vadd.f32 0.014752088, %v1067_v19  ;;  %v1304_v53 = vmul.f32 %v1303_v21, %v2360_v0  ;;  %v339_v50 = vpop.f32.mrf.mxu0  ;;  %v357_v10 = vpop.f32.mrf.mxu1 }
 0x130   : > { %v1323_v24 = vsel %vm1322_vm0, %v1756_v48, %v1319_v54  ;;  %vm1325_vm1 = vcmp.eq.f32.partialorder %v1324_v3, 8.507059e+37  ;;  %v831_v25 = vmul.f32 %v830_v61, %v2482_v60  ;;  %v2540_v57 = vmul.f32 0.70710677, %v2530_v29 }
 0x131   : > { %1516 = vst [vmem:[%s2200_s26 + $0x70] sm:$0xff] %v1491_v44  ;;  %v1328_v26 = vsel %vm1325_vm1, %v1327_v18, %v1323_v24  ;;  %v1059_v27 = vadd.f32 0.05243302, %v1058_v38  ;;  %v1069_v28 = vmul.f32 %v1068_v6, %v2497_v16  ;;  %v2543_v9 = vmul.f32 0.5, %v2415_v41 }
 0x132   : > { %v1329_v31 = vmul.f32 %v1328_v26, %v1304_v53  ;;  %v821_v32 = vadd.f32 0.18741608, %v820_v22  ;;  %v832_v35 = vadd.f32 0.4994258, %v831_v25  ;;  %v584_v17 = vmul.f32 %v583_v15, %v2426_v20 }
 0x133   : > { %v1758_v0 = vpop.eup %1757  ;;  %v1060_v42 = vmul.f32 %v1059_v27, %v2497_v16  ;;  %v1070_v21 = vadd.f32 0.112945676, %v1069_v28  ;;  %v1332_v45 = vmul.f32 %v2540_v57, %v2540_v57  ;;  %v604_v48 = vand.u32 2147483647, %v2523_v23 }
 0x134   : > { %v1664_v46 = vclamps-f32 %v1329_v31, 1.0  ;;  %v596_v47 = vmul.f32 %v1758_v0, %v2523_v23  ;;  %v2552_v40 = vadd.f32 %v2462_v43, %v339_v50  ;;  %v833_v41 = vmul.f32 %v832_v35, %v2482_v60 }
 0x135   : > { %v1061_v33 = vadd.f32 0.18741608, %v1060_v42  ;;  %v1071_v52 = vmul.f32 %v1070_v21, %v2497_v16  ;;  %v2556_v20 = vmin.f32 %v1332_v45, 16.0  ;;  %v606_v4 = vand.u32 2147483648, %v2523_v23 }
 0x136   : > { %v1473_v58 = vadd.f32 1.0, %v1664_v46  ;;  %v597_v36 = vsub.f32 1.0, %v596_v47  ;;  %v822_v3 = vmul.f32 %v821_v32, %v2482_v60  ;;  %vm601_vm2 = vweird.f32 %v1758_v0 }
 0x137   : > { %v2560_v56 = vadd.f32 1.0, %v833_v41  ;;  %v1072_v13 = vadd.f32 0.4994258, %v1071_v52  ;;  %v1334_v1 = vmul.f32 2.1237322e-06, %v2556_v20  ;;  %vm600_vm3 = vweird.f32 %v2523_v23 }
 0x138   : > { %v1498_v49 = vmul.f32 %v1473_v58, %v2435_v37  ;;  %v598_v63 = vmul.f32 %v1758_v0, %v597_v36  ;;  %v1345_v14 = vmul.f32 3.8918573e-05, %v2556_v20  ;;  %v2566_v2 = vmul.f32 0.70710677, %v2552_v40  ;;  %vm602_vm5 = vmor %vm600_vm3, %vm601_vm2 }
 0x139   : > { %vm2569_vm4 = vcmp.eq.f32.partialorder %v604_v48, 8.507059e+37  ;;  %1759 = vrcp.f32 %v2560_v56  ;;  %v1062_v60 = vmul.f32 %v1061_v33, %v2497_v16  ;;  %v607_v12 = vor.u32 1.1754944e-38, %v606_v4 }
 0x13a   : > { %1523 = vst [vmem:[%s2200_s26 + $0xa8] sm:$0xff] %v1498_v49  ;;  %v599_v11 = vadd.f32 %v1758_v0, %v598_v63  ;;  %v1073_v37 = vmul.f32 %v1072_v13, %v2497_v16  ;;  %v1335_v34 = vadd.f32 0.00028619796, %v1334_v1  ;;  %v823_v62 = vadd.f32 1.1283791, %v822_v3 }
 0x13b   : > { %v844_v59 = vand.u32 2147483647, %v2560_v56  ;;  %v1346_v23 = vadd.f32 0.001143296, %v1345_v14  ;;  %v612_v8 = vmul.f32 %v2566_v2, %v2566_v2  ;;  %v846_v55 = vand.u32 2147483648, %v2560_v56 }
 0x13c   : > { %v603_v19 = vsel %vm602_vm5, %v1758_v0, %v599_v11  ;;  %v2582_v54 = vadd.f32 1.0, %v1073_v37  ;;  %v1336_v18 = vmul.f32 %v1335_v34, %v2556_v20  ;;  %v1063_v22 = vadd.f32 1.1283791, %v1062_v60 }
 0x13d   : > { %v608_v16 = vsel %vm2569_vm4, %v607_v12, %v603_v19  ;;  %v1347_v61 = vmul.f32 %v1346_v23, %v2556_v20  ;;  %v2588_v44 = vmin.f32 %v612_v8, 16.0  ;;  %v2591_v38 = vmul.f32 0.5, %v2450_v51  ;;  %v375_v19 = vpop.f32.mrf.mxu2 }
 0x13e   : > { %v609_v15 = vmul.f32 %v608_v16, %v584_v17  ;;  %1761 = vrcp.f32 %v2582_v54  ;;  %v2595_v6 = vadd.f32 %v2462_v43, %v357_v10  ;;  %v824_v24 = vmul.f32 %v823_v62, %v2470_v39 }
 0x13f   : > { %v1760_v53 = vpop.eup %1759  ;;  %vm840_vm6 = vweird.f32 %v2560_v56  ;;  %v1337_v25 = vadd.f32 0.0036580483, %v1336_v18  ;;  %v1348_v26 = vadd.f32 0.014752088, %v1347_v61  ;;  %vm2600_vm7 = vcmp.eq.f32.partialorder %v844_v59, 8.507059e+37  ;;  %v396_v61 = vpop.f32.mrf.mxu3 }
 0x140   : > { %v1646_v27 = vclamps-f32 %v609_v15, 1.0  ;;  %v836_v28 = vmul.f32 %v1760_v53, %v2560_v56  ;;  %v847_v51 = vor.u32 1.1754944e-38, %v846_v55  ;;  %v1064_v31 = vmul.f32 %v1063_v22, %v2477_v5 }
 0x141   : > { %v1338_v32 = vmul.f32 %v1337_v25, %v2556_v20  ;;  %v1349_v35 = vmul.f32 %v1348_v26, %v2556_v20  ;;  %v614_v39 = vmul.f32 2.1237322e-06, %v2588_v44  ;;  %v625_v42 = vmul.f32 3.8918573e-05, %v2588_v44 }
 0x142   : > { %v1455_v0 = vadd.f32 1.0, %v1646_v27  ;;  %v837_v17 = vsub.f32 1.0, %v836_v28  ;;  %v2610_v21 = vmul.f32 0.70710677, %v2595_v6  ;;  %vm841_vm8 = vweird.f32 %v1760_v53 }
 0x143   : > { %vm1080_vm9 = vweird.f32 %v2582_v54  ;;  %v1350_v45 = vadd.f32 0.112945676, %v1349_v35  ;;  %v615_v46 = vadd.f32 0.00028619796, %v614_v39  ;;  %v626_v41 = vadd.f32 0.001143296, %v625_v42  ;;  %vm842_vm10 = vmor %vm840_vm6, %vm841_vm8 }
 0x144   : > { %v1762_v5 = vpop.eup %1761  ;;  %v1480_v47 = vmul.f32 %v1455_v0, %v2543_v9  ;;  %v838_v48 = vmul.f32 %v1760_v53, %v837_v17  ;;  %v852_v33 = vmul.f32 %v2610_v21, %v2610_v21  ;;  %v1084_v58 = vand.u32 2147483647, %v2582_v54 }
 0x145   : > { %v1076_v52 = vmul.f32 %v1762_v5, %v2582_v54  ;;  %v1339_v36 = vadd.f32 0.05243302, %v1338_v32  ;;  %v1351_v4 = vmul.f32 %v1350_v45, %v2556_v20  ;;  %v616_v13 = vmul.f32 %v615_v46, %v2588_v44 }
 0x146   : > { %1505 = vst [vmem:[%s2200_s26 + $0x18] sm:$0xff] %v1480_v47  ;;  %v839_v3 = vadd.f32 %v1760_v53, %v838_v48  ;;  %v627_v1 = vmul.f32 %v626_v41, %v2588_v44  ;;  %v2622_v49 = vmin.f32 %v852_v33, 16.0  ;;  %vm1081_vm11 = vweird.f32 %v1762_v5 }
 0x147   : > { %v1077_v9 = vsub.f32 1.0, %v1076_v52  ;;  %v1086_v63 = vand.u32 2147483648, %v2582_v54  ;;  %v1352_v14 = vadd.f32 0.4994258, %v1351_v4  ;;  %v617_v60 = vadd.f32 0.0036580483, %v616_v13  ;;  %vm1082_vm12 = vmor %vm1080_vm9, %vm1081_vm11 }
 0x148   : > { %v843_v7 = vsel %vm842_vm10, %v1760_v53, %v839_v3  ;;  %v628_v11 = vadd.f32 0.014752088, %v627_v1  ;;  %v854_v12 = vmul.f32 2.1237322e-06, %v2622_v49  ;;  %v1340_v62 = vmul.f32 %v1339_v36, %v2556_v20 }
 0x149   : > { %v848_v37 = vsel %vm2600_vm7, %v847_v51, %v843_v7  ;;  %v1078_v34 = vmul.f32 %v1762_v5, %v1077_v9  ;;  %v1353_v59 = vmul.f32 %v1352_v14, %v2556_v20  ;;  %v618_v23 = vmul.f32 %v617_v60, %v2588_v44 }
 0x14a   : > { %v849_v56 = vmul.f32 %v848_v37, %v824_v24  ;;  %v629_v8 = vmul.f32 %v628_v11, %v2588_v44  ;;  %v855_v10 = vadd.f32 0.00028619796, %v854_v12  ;;  %v1087_v18 = vor.u32 1.1754944e-38, %v1086_v63  ;;  %v360_v37 = vpop.f32.mrf.mxu1 }
 0x14b   : > { %v1079_v55 = vadd.f32 %v1762_v5, %v1078_v34  ;;  %v2635_v16 = vadd.f32 1.0, %v1353_v59  ;;  %v865_v22 = vmul.f32 3.8918573e-05, %v2622_v49  ;;  %v619_v53 = vadd.f32 0.05243302, %v618_v23 }
 0x14c   : > { %v1652_v15 = vclamps-f32 %v849_v56, 1.0  ;;  %v630_v24 = vadd.f32 0.112945676, %v629_v8  ;;  %v856_v25 = vmul.f32 %v855_v10, %v2622_v49  ;;  %vm1085_vm13 = vcmp.eq.f32.partialorder %v1084_v58, 8.507059e+37 }
 0x14d   : > { %v1083_v26 = vsel %vm1082_vm12, %v1762_v5, %v1079_v55  ;;  %1763 = vrcp.f32 %v2635_v16  ;;  %v2644_v27 = vadd.f32 %v2462_v43, %v375_v19  ;;  %v1341_v51 = vadd.f32 0.18741608, %v1340_v62 }
 0x14e   : > { %v1461_v28 = vadd.f32 1.0, %v1652_v15  ;;  %v1088_v50 = vsel %vm1085_vm13, %v1087_v18, %v1083_v26  ;;  %v2647_v32 = vadd.f32 %v2462_v43, %v396_v61  ;;  %v620_v35 = vmul.f32 %v619_v53, %v2588_v44 }
 0x14f   : > { %v1089_v54 = vmul.f32 %v1088_v50, %v1064_v31  ;;  %v631_v39 = vmul.f32 %v630_v24, %v2588_v44  ;;  %v857_v0 = vadd.f32 0.0036580483, %v856_v25  ;;  %v417_v42 = vmul.f32 0.5, %v2465_v30  ;;  %v342_v25 = vpop.f32.mrf.mxu0 }
 0x150   : > { %v1486_v17 = vmul.f32 %v1461_v28, %v2591_v38  ;;  %v866_v45 = vadd.f32 0.001143296, %v865_v22  ;;  %v621_v5 = vadd.f32 0.18741608, %v620_v35  ;;  %v2656_v41 = vmul.f32 0.5, %v2530_v29 }
 0x151   : > { %v1658_v46 = vclamps-f32 %v1089_v54, 1.0  ;;  %v632_v47 = vadd.f32 0.4994258, %v631_v39  ;;  %v858_v48 = vmul.f32 %v857_v0, %v2622_v49  ;;  %v2660_v33 = vmul.f32 0.70710677, %v2644_v27 }
 0x152   : > { %1511 = vst [vmem:[%s2200_s26 + $0x48] sm:$0xff] %v1486_v17  ;;  %v867_v31 = vmul.f32 %v866_v45, %v2622_v49  ;;  %v2663_v52 = vmul.f32 0.70710677, %v2647_v32  ;;  %v1342_v58 = vmul.f32 %v1341_v51, %v2556_v20  ;;  %v1364_v36 = vand.u32 2147483647, %v2635_v16 }
 0x153   : > { %v1764_v38 = vpop.eup %1763  ;;  %v1467_v30 = vadd.f32 1.0, %v1658_v46  ;;  %v633_v4 = vmul.f32 %v632_v47, %v2588_v44  ;;  %v622_v3 = vmul.f32 %v621_v5, %v2588_v44  ;;  %v1092_v1 = vmul.f32 %v2660_v33, %v2660_v33 }
 0x154   : > { %v1356_v29 = vmul.f32 %v1764_v38, %v2635_v16  ;;  %v868_v13 = vadd.f32 0.014752088, %v867_v31  ;;  %v1366_v63 = vand.u32 2147483648, %v2635_v16  ;;  %v859_v7 = vadd.f32 0.05243302, %v858_v48 }
 0x155   : > { %v1492_v9 = vmul.f32 %v1467_v30, %v417_v42  ;;  %v2673_v14 = vadd.f32 1.0, %v633_v4  ;;  %v2676_v11 = vmin.f32 %v1092_v1, 16.0  ;;  %v1372_v12 = vmul.f32 %v2663_v52, %v2663_v52 }
 0x156   : > { %v1357_v60 = vsub.f32 1.0, %v1356_v29  ;;  %v869_v20 = vmul.f32 %v868_v13, %v2622_v49  ;;  %v1343_v44 = vadd.f32 1.1283791, %v1342_v58  ;;  %vm1360_vm14 = vweird.f32 %v2635_v16 }
 0x157   : > { %1517 = vst [vmem:[%s2200_s26 + $0x78] sm:$0xff] %v1492_v9  ;;  %vm2682_vm15 = vcmp.eq.f32.partialorder %v1364_v36, 8.507059e+37  ;;  %1765 = vrcp.f32 %v2673_v14  ;;  %vm1361_vm0 = vweird.f32 %v1764_v38  ;;  %v623_v62 = vadd.f32 1.1283791, %v622_v3 }
 0x158   : > { %v1358_v34 = vmul.f32 %v1764_v38, %v1357_v60  ;;  %v870_v59 = vadd.f32 0.112945676, %v869_v20  ;;  %v1367_v56 = vor.u32 1.1754944e-38, %v1366_v63  ;;  %v1094_v23 = vmul.f32 2.1237322e-06, %v2676_v11  ;;  %vm1362_vm1 = vmor %vm1360_vm14, %vm1361_vm0 }
 0x159   : > { %v1105_v8 = vmul.f32 3.8918573e-05, %v2676_v11  ;;  %v2689_v10 = vmin.f32 %v1372_v12, 16.0  ;;  %v644_v55 = vand.u32 2147483647, %v2673_v14  ;;  %v860_v18 = vmul.f32 %v859_v7, %v2622_v49 }
 0x15a   : > { %v1359_v19 = vadd.f32 %v1764_v38, %v1358_v34  ;;  %v871_v22 = vmul.f32 %v870_v59, %v2622_v49  ;;  %v1344_v61 = vmul.f32 %v1343_v44, %v2540_v57  ;;  %v1095_v15 = vadd.f32 0.00028619796, %v1094_v23 }
 0x15b   : > { %v1106_v53 = vadd.f32 0.001143296, %v1105_v8  ;;  %v1374_v24 = vmul.f32 2.1237322e-06, %v2689_v10  ;;  %v646_v28 = vand.u32 2147483648, %v2673_v14  ;;  %v2706_v45 = vadd.f32 %v2462_v43, %v342_v25 }
 0x15c   : > { %v1363_v26 = vsel %vm1362_vm1, %v1764_v38, %v1359_v19  ;;  %v872_v50 = vadd.f32 0.4994258, %v871_v22  ;;  %v1385_v51 = vmul.f32 3.8918573e-05, %v2689_v10  ;;  %v1096_v57 = vmul.f32 %v1095_v15, %v2676_v11 }
 0x15d   : > { %v1766_v54 = vpop.eup %1765  ;;  %v1368_v35 = vsel %vm2682_vm15, %v1367_v56, %v1363_v26  ;;  %v1107_v16 = vmul.f32 %v1106_v53, %v2676_v11  ;;  %v1375_v39 = vadd.f32 0.00028619796, %v1374_v24  ;;  %v861_v42 = vadd.f32 0.18741608, %v860_v18 }
 0x15e   : > { %v1369_v0 = vmul.f32 %v1368_v35, %v1344_v61  ;;  %v636_v17 = vmul.f32 %v1766_v54, %v2673_v14  ;;  %v873_v46 = vmul.f32 %v872_v50, %v2622_v49  ;;  %v1097_v5 = vadd.f32 0.0036580483, %v1096_v57 }
 0x15f   : > { %v1108_v47 = vadd.f32 0.014752088, %v1107_v16  ;;  %v1376_v48 = vmul.f32 %v1375_v39, %v2689_v10  ;;  %vm641_vm2 = vweird.f32 %v1766_v54  ;;  %v1386_v30 = vadd.f32 0.001143296, %v1385_v51 }
 0x160   : > { %v1665_v31 = vclamps-f32 %v1369_v0, 1.0  ;;  %v637_v38 = vsub.f32 1.0, %v636_v17  ;;  %v2710_v58 = vadd.f32 1.0, %v873_v46  ;;  %v1098_v36 = vmul.f32 %v1097_v5, %v2676_v11 }
 0x161   : > { %v1109_v4 = vmul.f32 %v1108_v47, %v2676_v11  ;;  %v1377_v29 = vadd.f32 0.0036580483, %v1376_v48  ;;  %v1387_v1 = vmul.f32 %v1386_v30, %v2689_v10  ;;  %v2716_v9 = vmul.f32 0.70710677, %v2706_v45 }
 0x162   : > { %v1474_v3 = vadd.f32 1.0, %v1665_v31  ;;  %v638_v13 = vmul.f32 %v1766_v54, %v637_v38  ;;  %v624_v63 = vmul.f32 %v623_v62, %v2566_v2  ;;  %vm640_vm3 = vweird.f32 %v2673_v14 }
 0x163   : > { %vm2720_vm4 = vcmp.eq.f32.partialorder %v644_v55, 8.507059e+37  ;;  %1767 = vrcp.f32 %v2710_v58  ;;  %v1099_v12 = vadd.f32 0.05243302, %v1098_v36  ;;  %v1110_v44 = vadd.f32 0.112945676, %v1109_v4  ;;  %vm642_vm5 = vmor %vm640_vm3, %vm641_vm2 }
 0x164   : > { %v1499_v60 = vmul.f32 %v1474_v3, %v2656_v41  ;;  %v639_v20 = vadd.f32 %v1766_v54, %v638_v13  ;;  %v647_v34 = vor.u32 1.1754944e-38, %v646_v28  ;;  %v862_v59 = vmul.f32 %v861_v42, %v2622_v49 }
 0x165   : > { %v1378_v2 = vmul.f32 %v1377_v29, %v2689_v10  ;;  %v1388_v14 = vadd.f32 0.014752088, %v1387_v1  ;;  %v1100_v56 = vmul.f32 %v1099_v12, %v2676_v11  ;;  %v1111_v23 = vmul.f32 %v1110_v44, %v2676_v11 }
 0x166   : > { %1524 = vst [vmem:[%s2200_s26 + $0xb0] sm:$0xff] %v1499_v60  ;;  %v643_v62 = vsel %vm642_vm5, %v1766_v54, %v639_v20  ;;  %v652_v41 = vmul.f32 %v2716_v9, %v2716_v9  ;;  %v2738_v49 = vadd.f32 %v2462_v43, %v360_v37  ;;  %v406_v24 = vmul.f32 0.5, %v2552_v40  ;;  %v378_v37 = vpop.f32.mrf.mxu2 }
 0x167   : > { %v648_v8 = vsel %vm2720_vm4, %v647_v34, %v643_v62  ;;  %v1379_v19 = vadd.f32 0.05243302, %v1378_v2  ;;  %v1389_v55 = vmul.f32 %v1388_v14, %v2689_v10  ;;  %v1101_v22 = vadd.f32 0.18741608, %v1100_v56 }
 0x168   : > { %v649_v18 = vmul.f32 %v648_v8, %v624_v63  ;;  %v1112_v61 = vadd.f32 0.4994258, %v1111_v23  ;;  %v2740_v15 = vmin.f32 %v652_v41, 16.0  ;;  %v863_v25 = vadd.f32 1.1283791, %v862_v59 }
 0x169   : > { %v1768_v53 = vpop.eup %1767  ;;  %v1380_v26 = vmul.f32 %v1379_v19, %v2689_v10  ;;  %v1390_v28 = vadd.f32 0.112945676, %v1389_v55  ;;  %v884_v54 = vand.u32 2147483647, %v2710_v58  ;;  %v2747_v35 = vmul.f32 0.70710677, %v2738_v49 }
 0x16a   : > { %v1647_v50 = vclamps-f32 %v649_v18, 1.0  ;;  %v876_v51 = vmul.f32 %v1768_v53, %v2710_v58  ;;  %v1102_v57 = vmul.f32 %v1101_v22, %v2676_v11  ;;  %v1113_v16 = vmul.f32 %v1112_v61, %v2676_v11 }
 0x16b   : > { %v1391_v39 = vmul.f32 %v1390_v28, %v2689_v10  ;;  %v654_v40 = vmul.f32 2.1237322e-06, %v2740_v15  ;;  %v1381_v42 = vadd.f32 0.18741608, %v1380_v26  ;;  %v665_v46 = vmul.f32 3.8918573e-05, %v2740_v15 }
 0x16c   : > { %v1456_v0 = vadd.f32 1.0, %v1647_v50  ;;  %v877_v17 = vsub.f32 1.0, %v876_v51  ;;  %v886_v5 = vand.u32 2147483648, %v2710_v58  ;;  %v2755_v47 = vadd.f32 1.0, %v1113_v16 }
 0x16d   : > { %v1392_v48 = vadd.f32 0.4994258, %v1391_v39  ;;  %v655_v31 = vadd.f32 0.00028619796, %v654_v40  ;;  %vm881_vm6 = vweird.f32 %v1768_v53  ;;  %v666_v11 = vadd.f32 0.001143296, %v665_v46 }
 0x16e   : > { %v1481_v38 = vmul.f32 %v1456_v0, %v406_v24  ;;  %v878_v30 = vmul.f32 %v1768_v53, %v877_v17  ;;  %v864_v36 = vmul.f32 %v863_v25, %v2610_v21  ;;  %vm880_vm7 = vweird.f32 %v2710_v58 }
 0x16f   : > { %vm2759_vm8 = vcmp.eq.f32.partialorder %v884_v54, 8.507059e+37  ;;  %1769 = vrcp.f32 %v2755_v47  ;;  %v1103_v3 = vadd.f32 1.1283791, %v1102_v57  ;;  %v1393_v13 = vmul.f32 %v1392_v48, %v2689_v10  ;;  %vm882_vm9 = vmor %vm880_vm7, %vm881_vm6 }
 0x170   : > { %1506 = vst [vmem:[%s2200_s26 + $0x20] sm:$0xff] %v1481_v38  ;;  %v879_v29 = vadd.f32 %v1768_v53, %v878_v30  ;;  %v656_v1 = vmul.f32 %v655_v31, %v2740_v15  ;;  %v887_v63 = vor.u32 1.1754944e-38, %v886_v5  ;;  %v1382_v7 = vmul.f32 %v1381_v42, %v2689_v10 }
 0x171   : > { %v667_v21 = vmul.f32 %v666_v11, %v2740_v15  ;;  %v892_v58 = vmul.f32 %v2747_v35, %v2747_v35  ;;  %v1124_v20 = vand.u32 2147483647, %v2755_v47  ;;  %v2772_v12 = vadd.f32 1.0, %v1393_v13 }
 0x172   : > { %v883_v60 = vsel %vm882_vm9, %v1768_v53, %v879_v29  ;;  %v657_v44 = vadd.f32 0.0036580483, %v656_v1  ;;  %v1126_v59 = vand.u32 2147483648, %v2755_v47  ;;  %v412_v10 = vmul.f32 0.5, %v2595_v6 }
 0x173   : > { %v888_v34 = vsel %vm2759_vm8, %v887_v63, %v883_v60  ;;  %v668_v2 = vadd.f32 0.014752088, %v667_v21  ;;  %v2777_v14 = vmin.f32 %v892_v58, 16.0  ;;  %v1104_v56 = vmul.f32 %v1103_v3, %v2660_v33 }
 0x174   : > { %v889_v62 = vmul.f32 %v888_v34, %v864_v36  ;;  %1771 = vrcp.f32 %v2772_v12  ;;  %v658_v41 = vmul.f32 %v657_v44, %v2740_v15  ;;  %v2786_v55 = vadd.f32 %v2462_v43, %v378_v37 }
 0x175   : > { %v1770_v23 = vpop.eup %1769  ;;  %v669_v8 = vmul.f32 %v668_v2, %v2740_v15  ;;  %v894_v19 = vmul.f32 2.1237322e-06, %v2777_v14  ;;  %vm1120_vm10 = vweird.f32 %v2755_v47  ;;  %v1383_v6 = vadd.f32 1.1283791, %v1382_v7 }
 0x176   : > { %v1653_v18 = vclamps-f32 %v889_v62, 1.0  ;;  %v1116_v22 = vmul.f32 %v1770_v23, %v2755_v47  ;;  %vm2790_vm11 = vcmp.eq.f32.partialorder %v1124_v20, 8.507059e+37  ;;  %v1127_v61 = vor.u32 1.1754944e-38, %v1126_v59  ;;  %v399_v47 = vpop.f32.mrf.mxu3 }
 0x177   : > { %v659_v53 = vadd.f32 0.05243302, %v658_v41  ;;  %v670_v24 = vadd.f32 0.112945676, %v669_v8  ;;  %v895_v28 = vadd.f32 0.00028619796, %v894_v19  ;;  %vm1121_vm12 = vweird.f32 %v1770_v23 }
 0x178   : > { %v1462_v25 = vadd.f32 1.0, %v1653_v18  ;;  %v1117_v26 = vsub.f32 1.0, %v1116_v22  ;;  %v905_v50 = vmul.f32 3.8918573e-05, %v2777_v14  ;;  %v2798_v57 = vmul.f32 0.70710677, %v2786_v55  ;;  %vm1122_vm13 = vmor %vm1120_vm10, %vm1121_vm12 }
 0x179   : > { %v660_v51 = vmul.f32 %v659_v53, %v2740_v15  ;;  %v671_v54 = vmul.f32 %v670_v24, %v2740_v15  ;;  %v896_v0 = vmul.f32 %v895_v28, %v2777_v14  ;;  %v1384_v42 = vmul.f32 %v1383_v6, %v2663_v52 }
 0x17a   : > { %v1772_v16 = vpop.eup %1771  ;;  %v1487_v39 = vmul.f32 %v1462_v25, %v412_v10  ;;  %v1118_v40 = vmul.f32 %v1770_v23, %v1117_v26  ;;  %v906_v17 = vadd.f32 0.001143296, %v905_v50  ;;  %v1404_v5 = vand.u32 2147483647, %v2772_v12 }
 0x17b   : > { %v1396_v46 = vmul.f32 %v1772_v16, %v2772_v12  ;;  %v672_v48 = vadd.f32 0.4994258, %v671_v54  ;;  %v897_v38 = vadd.f32 0.0036580483, %v896_v0  ;;  %v1132_v11 = vmul.f32 %v2798_v57, %v2798_v57 }
 0x17c   : > { %1512 = vst [vmem:[%s2200_s26 + $0x50] sm:$0xff] %v1487_v39  ;;  %v1119_v31 = vadd.f32 %v1770_v23, %v1118_v40  ;;  %v907_v30 = vmul.f32 %v906_v17, %v2777_v14  ;;  %v1406_v52 = vand.u32 2147483648, %v2772_v12  ;;  %v661_v4 = vadd.f32 0.18741608, %v660_v51  ;;  %v381_v40 = vpop.f32.mrf.mxu2 }
 0x17d   : > { %v1397_v36 = vsub.f32 1.0, %v1396_v46  ;;  %v673_v29 = vmul.f32 %v672_v48, %v2740_v15  ;;  %v898_v13 = vmul.f32 %v897_v38, %v2777_v14  ;;  %v2814_v63 = vmin.f32 %v1132_v11, 16.0 }
 0x17e   : > { %v1123_v3 = vsel %vm1122_vm13, %v1770_v23, %v1119_v31  ;;  %v908_v1 = vadd.f32 0.014752088, %v907_v30  ;;  %vm1401_vm14 = vweird.f32 %v1772_v16  ;;  %vm1400_vm15 = vweird.f32 %v2772_v12 }
 0x17f   : > { %v1128_v7 = vsel %vm2790_vm11, %v1127_v61, %v1123_v3  ;;  %v1398_v21 = vmul.f32 %v1772_v16, %v1397_v36  ;;  %v2818_v58 = vadd.f32 1.0, %v673_v29  ;;  %v1134_v44 = vmul.f32 2.1237322e-06, %v2814_v63  ;;  %vm1402_vm1 = vmor %vm1400_vm15, %vm1401_vm14 }
 0x180   : > { %v1129_v60 = vmul.f32 %v1128_v7, %v1104_v56  ;;  %v909_v20 = vmul.f32 %v908_v1, %v2777_v14  ;;  %vm1405_vm0 = vcmp.eq.f32.partialorder %v1404_v5, 8.507059e+37  ;;  %v899_v34 = vadd.f32 0.05243302, %v898_v13 }
 0x181   : > { %v1399_v37 = vadd.f32 %v1772_v16, %v1398_v21  ;;  %1773 = vrcp.f32 %v2818_v58  ;;  %v1407_v2 = vor.u32 1.1754944e-38, %v1406_v52  ;;  %v662_v10 = vmul.f32 %v661_v4, %v2740_v15 }
 0x182   : > { %v1659_v59 = vclamps-f32 %v1129_v60, 1.0  ;;  %v2826_v62 = vadd.f32 %v2462_v43, %v399_v47  ;;  %v910_v23 = vadd.f32 0.112945676, %v909_v20  ;;  %v1135_v12 = vadd.f32 0.00028619796, %v1134_v44 }
 0x183   : > { %v1403_v56 = vsel %vm1402_vm1, %v1772_v16, %v1399_v37  ;;  %v1145_v41 = vmul.f32 3.8918573e-05, %v2814_v63  ;;  %v418_v8 = vmul.f32 0.5, %v2644_v27  ;;  %v900_v6 = vmul.f32 %v899_v34, %v2777_v14 }
 0x184   : > { %v1468_v19 = vadd.f32 1.0, %v1659_v59  ;;  %v1408_v18 = vsel %vm1405_vm0, %v1407_v2, %v1403_v56  ;;  %v911_v33 = vmul.f32 %v910_v23, %v2777_v14  ;;  %v1136_v15 = vmul.f32 %v1135_v12, %v2814_v63 }
 0x185   : > { %v1409_v22 = vmul.f32 %v1408_v18, %v1384_v42  ;;  %v1146_v53 = vadd.f32 0.001143296, %v1145_v41  ;;  %v2834_v24 = vmul.f32 0.70710677, %v2826_v62  ;;  %v425_v26 = vmul.f32 0.5, %v2647_v32 }
 0x186   : > { %v1493_v61 = vmul.f32 %v1468_v19, %v418_v8  ;;  %v663_v50 = vadd.f32 1.1283791, %v662_v10  ;;  %v912_v27 = vadd.f32 0.4994258, %v911_v33  ;;  %v684_v54 = vand.u32 2147483647, %v2818_v58 }
 0x187   : > { %v1774_v25 = vpop.eup %1773  ;;  %v1666_v28 = vclamps-f32 %v1409_v22, 1.0  ;;  %v1147_v16 = vmul.f32 %v1146_v53, %v2814_v63  ;;  %v1412_v39 = vmul.f32 %v2834_v24, %v2834_v24  ;;  %v686_v17 = vand.u32 2147483648, %v2818_v58 }
 0x188   : > { %1518 = vst [vmem:[%s2200_s26 + $0x80] sm:$0xff] %v1493_v61  ;;  %v676_v51 = vmul.f32 %v1774_v25, %v2818_v58  ;;  %v901_v42 = vadd.f32 0.18741608, %v900_v6  ;;  %v913_v32 = vmul.f32 %v912_v27, %v2777_v14  ;;  %v1137_v5 = vadd.f32 0.0036580483, %v1136_v15 }
 0x189   : > { %v1475_v0 = vadd.f32 1.0, %v1666_v28  ;;  %v1148_v48 = vadd.f32 0.014752088, %v1147_v16  ;;  %v2845_v31 = vmin.f32 %v1412_v39, 16.0  ;;  %vm681_vm2 = vweird.f32 %v1774_v25 }
 0x18a   : > { %v677_v46 = vsub.f32 1.0, %v676_v51  ;;  %v2847_v30 = vadd.f32 1.0, %v913_v32  ;;  %v2850_v11 = vadd.f32 %v2462_v43, %v381_v40  ;;  %vm680_vm3 = vweird.f32 %v2818_v58 }
 0x18b   : > { %v1500_v38 = vmul.f32 %v1475_v0, %v425_v26  ;;  %v1149_v52 = vmul.f32 %v1148_v48, %v2814_v63  ;;  %v1414_v4 = vmul.f32 2.1237322e-06, %v2845_v31  ;;  %v1425_v29 = vmul.f32 3.8918573e-05, %v2845_v31  ;;  %vm682_vm4 = vmor %vm680_vm3, %vm681_vm2 }
 0x18c   : > { %v678_v36 = vmul.f32 %v1774_v25, %v677_v46  ;;  %1775 = vrcp.f32 %v2847_v30  ;;  %v1138_v13 = vmul.f32 %v1137_v5, %v2814_v63  ;;  %v664_v43 = vmul.f32 %v663_v50, %v2716_v9 }
 0x18d   : > { %1525 = vst [vmem:[%s2200_s26 + $0xb8] sm:$0xff] %v1500_v38  ;;  %v1150_v1 = vadd.f32 0.112945676, %v1149_v52  ;;  %v1415_v7 = vadd.f32 0.00028619796, %v1414_v4  ;;  %v687_v21 = vor.u32 1.1754944e-38, %v686_v17  ;;  %v902_v58 = vmul.f32 %v901_v42, %v2777_v14 }
 0x18e   : > { %v679_v3 = vadd.f32 %v1774_v25, %v678_v36  ;;  %v1426_v47 = vadd.f32 0.001143296, %v1425_v29  ;;  %v2862_v60 = vmul.f32 0.70710677, %v2850_v11  ;;  %vm685_vm5 = vcmp.eq.f32.partialorder %v684_v54, 8.507059e+37 }
 0x18f   : > { %v1151_v44 = vmul.f32 %v1150_v1, %v2814_v63  ;;  %v1416_v34 = vmul.f32 %v1415_v7, %v2845_v31  ;;  %v1139_v10 = vadd.f32 0.05243302, %v1138_v13  ;;  %v407_v12 = vmul.f32 0.5, %v2706_v45 }
 0x190   : > { %v683_v20 = vsel %vm682_vm4, %v1774_v25, %v679_v3  ;;  %v1427_v59 = vmul.f32 %v1426_v47, %v2845_v31  ;;  %v1172_v9 = vmul.f32 %v2862_v60, %v2862_v60  ;;  %v903_v19 = vadd.f32 1.1283791, %v902_v58 }
 0x191   : > { %v688_v37 = vsel %vm685_vm5, %v687_v21, %v683_v20  ;;  %v1152_v56 = vadd.f32 0.4994258, %v1151_v44  ;;  %v924_v22 = vand.u32 2147483647, %v2847_v30  ;;  %v1417_v33 = vadd.f32 0.0036580483, %v1416_v34 }
 0x192   : > { %v689_v2 = vmul.f32 %v688_v37, %v664_v43  ;;  %v1776_v23 = vpop.eup %1775  ;;  %v1428_v41 = vadd.f32 0.014752088, %v1427_v59  ;;  %v2871_v8 = vmin.f32 %v1172_v9, 16.0  ;;  %v1140_v45 = vmul.f32 %v1139_v10, %v2814_v63 }
 0x193   : > { %v916_v18 = vmul.f32 %v1776_v23, %v2847_v30  ;;  %v1153_v6 = vmul.f32 %v1152_v56, %v2814_v63  ;;  %vm921_vm6 = vweird.f32 %v1776_v23  ;;  %v926_v28 = vand.u32 2147483648, %v2847_v30 }
 0x194   : > { %v1648_v14 = vclamps-f32 %v689_v2, 1.0  ;;  %v1429_v61 = vmul.f32 %v1428_v41, %v2845_v31  ;;  %v1174_v15 = vmul.f32 2.1237322e-06, %v2871_v8  ;;  %v1185_v26 = vmul.f32 3.8918573e-05, %v2871_v8 }
 0x195   : > { %v917_v25 = vsub.f32 1.0, %v916_v18  ;;  %v1154_v50 = vadd.f32 1.0, %v1153_v6  ;;  %v1418_v40 = vmul.f32 %v1417_v33, %v2845_v31  ;;  %vm920_vm7 = vweird.f32 %v2847_v30 }
 0x196   : > { %v1457_v53 = vadd.f32 1.0, %v1648_v14  ;;  %v1430_v27 = vadd.f32 0.112945676, %v1429_v61  ;;  %v1175_v16 = vadd.f32 0.00028619796, %v1174_v15  ;;  %vm922_vm8 = vmor %vm920_vm7, %vm921_vm6  ;;  %v927_v32 = vor.u32 1.1754944e-38, %v926_v28 }
 0x197   : > { %v918_v54 = vmul.f32 %v1776_v23, %v917_v25  ;;  %v1186_v39 = vadd.f32 0.001143296, %v1185_v26  ;;  %1777 = vrcp.f32 %v1154_v50  ;;  %v1141_v17 = vadd.f32 0.18741608, %v1140_v45 }
 0x198   : > { %v1482_v51 = vmul.f32 %v1457_v53, %v407_v12  ;;  %v1431_v42 = vmul.f32 %v1430_v27, %v2845_v31  ;;  %v1176_v46 = vmul.f32 %v1175_v16, %v2871_v8  ;;  %v904_v48 = vmul.f32 %v903_v19, %v2747_v35 }
 0x199   : > { %v919_v0 = vadd.f32 %v1776_v23, %v918_v54  ;;  %v1187_v5 = vmul.f32 %v1186_v39, %v2871_v8  ;;  %vm925_vm9 = vcmp.eq.f32.partialorder %v924_v22, 8.507059e+37  ;;  %v1419_v4 = vadd.f32 0.05243302, %v1418_v40 }
 0x19a   : > { %1507 = vst [vmem:[%s2200_s26 + $0x28] sm:$0xff] %v1482_v51  ;;  %v1432_v36 = vadd.f32 0.4994258, %v1431_v42  ;;  %v1142_v30 = vmul.f32 %v1141_v17, %v2814_v63  ;;  %v1177_v7 = vadd.f32 0.0036580483, %v1176_v46  ;;  %v413_v44 = vmul.f32 0.5, %v2738_v49 }
 0x19b   : > { %v923_v38 = vsel %vm922_vm8, %v1776_v23, %v919_v0  ;;  %v1188_v29 = vadd.f32 0.014752088, %v1187_v5  ;;  %v1420_v20 = vmul.f32 %v1419_v4, %v2845_v31  ;;  %v1164_v9 = vand.u32 2147483647, %v1154_v50 }
 0x19c   : > { %v928_v52 = vsel %vm925_vm9, %v927_v32, %v923_v38  ;;  %v1433_v13 = vmul.f32 %v1432_v36, %v2845_v31  ;;  %v1143_v34 = vadd.f32 1.1283791, %v1142_v30  ;;  %v1166_v63 = vand.u32 2147483648, %v1154_v50 }
 0x19d   : > { %v929_v3 = vmul.f32 %v928_v52, %v904_v48  ;;  %v1778_v1 = vpop.eup %1777  ;;  %v1189_v43 = vmul.f32 %v1188_v29, %v2871_v8  ;;  %v1178_v2 = vmul.f32 %v1177_v7, %v2871_v8  ;;  %v1421_v12 = vadd.f32 0.18741608, %v1420_v20 }
 0x19e   : > { %v1156_v47 = vmul.f32 %v1778_v1, %v1154_v50  ;;  %v1434_v35 = vadd.f32 1.0, %v1433_v13  ;;  %vm1161_vm10 = vweird.f32 %v1778_v1  ;;  %vm1160_vm11 = vweird.f32 %v1154_v50 }
 0x19f   : > { %v1654_v21 = vclamps-f32 %v929_v3, 1.0  ;;  %v1190_v58 = vadd.f32 0.112945676, %v1189_v43  ;;  %vm1162_vm12 = vmor %vm1160_vm11, %vm1161_vm10  ;;  %v1167_v49 = vor.u32 1.1754944e-38, %v1166_v63  ;;  %v1179_v19 = vadd.f32 0.05243302, %v1178_v2 }
 0x1a0   : > { %v1157_v59 = vsub.f32 1.0, %v1156_v47  ;;  %1779 = vrcp.f32 %v1434_v35  ;;  %v1144_v18 = vmul.f32 %v1143_v34, %v2798_v57  ;;  %vm1165_vm13 = vcmp.eq.f32.partialorder %v1164_v9, 8.507059e+37 }
 0x1a1   : > { %v1463_v37 = vadd.f32 1.0, %v1654_v21  ;;  %v1191_v23 = vmul.f32 %v1190_v58, %v2871_v8  ;;  %v1422_v15 = vmul.f32 %v1421_v12, %v2845_v31  ;;  %v1180_v45 = vmul.f32 %v1179_v19, %v2871_v8 }
 0x1a2   : > { %v1158_v56 = vmul.f32 %v1778_v1, %v1157_v59  ;;  %v419_v27 = vmul.f32 0.5, %v2786_v55  ;;  %v1446_v57 = vand.u32 2147483648, %v1434_v35  ;;  %v1444_v39 = vand.u32 2147483647, %v1434_v35 }
 0x1a3   : > { %v1488_v10 = vmul.f32 %v1463_v37, %v413_v44  ;;  %v1192_v14 = vadd.f32 0.4994258, %v1191_v23  ;;  %v1423_v51 = vadd.f32 1.1283791, %v1422_v15  ;;  %v1181_v40 = vadd.f32 0.18741608, %v1180_v45 }
 0x1a4   : > { %v1159_v41 = vadd.f32 %v1778_v1, %v1158_v56  ;;  %vm1440_vm15 = vweird.f32 %v1434_v35  ;;  %v1447_v17 = vor.u32 1.1754944e-38, %v1446_v57  ;;  %vm1445_vm1 = vcmp.eq.f32.partialorder %v1444_v39, 8.507059e+37 }
 0x1a5   : > { %1513 = vst [vmem:[%s2200_s26 + $0x58] sm:$0xff] %v1488_v10  ;;  %v1193_v6 = vmul.f32 %v1192_v14, %v2871_v8  ;;  %v1424_v42 = vmul.f32 %v1423_v51, %v2834_v24  ;;  %v1182_v5 = vmul.f32 %v1181_v40, %v2871_v8  ;;  %v426_v4 = vmul.f32 0.5, %v2826_v62 }
 0x1a6   : > { %v1163_v22 = vsel %vm1162_vm12, %v1778_v1, %v1159_v41  ;;  %v1780_v33 = vpop.eup %1779 }
 0x1a7   : > { %v1168_v61 = vsel %vm1165_vm13, %v1167_v49, %v1163_v22  ;;  %v1436_v25 = vmul.f32 %v1780_v33, %v1434_v35  ;;  %v1194_v26 = vadd.f32 1.0, %v1193_v6  ;;  %vm1441_vm14 = vweird.f32 %v1780_v33 }
 0x1a8   : > { %v1169_v53 = vmul.f32 %v1168_v61, %v1144_v18  ;;  %vm1442_vm0 = vmor %vm1440_vm15, %vm1441_vm14  ;;  %v1183_v29 = vadd.f32 1.1283791, %v1182_v5  ;;  %v420_v35 = vmul.f32 0.5, %v2850_v11 }
 0x1a9   : > { %v1437_v50 = vsub.f32 1.0, %v1436_v25  ;;  %1781 = vrcp.f32 %v1194_v26  ;;  %v1206_v3 = vand.u32 2147483648, %v1194_v26  ;;  %v1204_v1 = vand.u32 2147483647, %v1194_v26 }
 0x1aa   : > { %v1660_v28 = vclamps-f32 %v1169_v53, 1.0  ;;  %vm1200_vm3 = vweird.f32 %v1194_v26  ;;  %v1184_v43 = vmul.f32 %v1183_v29, %v2862_v60 }
 0x1ab   : > { %v1438_v16 = vmul.f32 %v1780_v33, %v1437_v50  ;;  %v1207_v8 = vor.u32 1.1754944e-38, %v1206_v3  ;;  %vm1205_vm5 = vcmp.eq.f32.partialorder %v1204_v1, 8.507059e+37 }
 0x1ac   : > { %v1469_v54 = vadd.f32 1.0, %v1660_v28 }
 0x1ad   : > { %v1439_v31 = vadd.f32 %v1780_v33, %v1438_v16 }
 0x1ae   : > { %v1494_v0 = vmul.f32 %v1469_v54, %v419_v27 }
 0x1af   : > { %v1443_v32 = vsel %vm1442_vm0, %v1780_v33, %v1439_v31  ;;  %v1782_v46 = vpop.eup %1781 }
 0x1b0   : > { %1519 = vst [vmem:[%s2200_s26 + $0x88] sm:$0xff] %v1494_v0  ;;  %v1448_v55 = vsel %vm1445_vm1, %v1447_v17, %v1443_v32  ;;  %v1196_v38 = vmul.f32 %v1782_v46, %v1194_v26  ;;  %vm1201_vm2 = vweird.f32 %v1782_v46 }
 0x1b1   : > { %v1449_v48 = vmul.f32 %v1448_v55, %v1424_v42  ;;  %vm1202_vm4 = vmor %vm1200_vm3, %vm1201_vm2 }
 0x1b2   : > { %v1197_v52 = vsub.f32 1.0, %v1196_v38 }
 0x1b3   : > { %v1667_v36 = vclamps-f32 %v1449_v48, 1.0 }
 0x1b4   : > { %v1198_v13 = vmul.f32 %v1782_v46, %v1197_v52 }
 0x1b5   : > { %v1476_v30 = vadd.f32 1.0, %v1667_v36 }
 0x1b6   : > { %v1199_v7 = vadd.f32 %v1782_v46, %v1198_v13 }
 0x1b7   : > { %v1501_v24 = vmul.f32 %v1476_v30, %v426_v4 }
 0x1b8   : > { %v1203_v21 = vsel %vm1202_vm4, %v1782_v46, %v1199_v7 }
 0x1b9   : > { %1526 = vst [vmem:[%s2200_s26 + $0xc0] sm:$0xff] %v1501_v24  ;;  %v1208_v47 = vsel %vm1205_vm5, %v1207_v8, %v1203_v21 }
 0x1ba   : > { %v1209_v62 = vmul.f32 %v1208_v47, %v1184_v43 }
 0x1bc   : > { %v1661_v20 = vclamps-f32 %v1209_v62, 1.0 }
 0x1be   : > { %v1470_v58 = vadd.f32 1.0, %v1661_v20  ;;  %1534 = sbr.rel (!%p1920_p5) target bundleno = 482 (0x1e2), region = 36 }
 0x1c0   : > { %v1495_v44 = vmul.f32 %v1470_v58, %v420_v35 }
 0x1c2   : > { %1520 = vst [vmem:[%s2200_s26 + $0x90] sm:$0xff] %v1495_v44 }
 0x1c3   : > { %s3011_s4 = smov (!%p1537_p11, %s1536_s4), 25 }
 0x1c4   : > { %s1668_s5 = sshll.u32 %s3011_s4, 3 }
 0x1c5   : > { %s1540_s6 = ssub.s32 200, %s1668_s5 }
 0x1c6   : > { %s1541_s7 = sshll.u32 %s1540_s6, 4 }
 0x1c7   : > { %1542 = vsyncadd %s2912_s30, %s1541_s7  ;;  %p2921_p12 = scmp.ne.s32.totalorder %s1668_s5, 0  ;;  %s1675_s22 = smul.u32 200, %s1903_s16 }
 0x1c8   : > { %s1547_s9 = sshll.u32 %s2200_s26, 4  ;;  %s1672_s28 = sshll.u32 %s3011_s4, 7  ;;  %s2931_s9 = int_to_ptr.vmem [resolvable:$true] %s1547_s9 }
 0x1c9   : > { %s1545_s17 = scalar_lea.hbm %s2976_s3, %s1675_s22  ;;  %s1784_s20 = sshra.s32 %s2931_s9, 4  ;;  %s1785_s20 = int_to_ptr.vmem [resolvable:$true] %s1784_s20 }
 0x1ca   : > { %s1549_s19 = sshll.u32 %s1545_s17, 4  ;;  %s1786_s24 = sshrl.u32 %s1672_s28, 4  ;;  %s2933_s19 = int_to_ptr.hbm [resolvable:$true] %s1549_s19 }
 0x1cb   : > { %s1791_s25 = scalar_lea.vmem %s1785_s20, %s1786_s24  ;;  %s1859_s16 = smov [#allocation2]  }
 0x1cc   : > { %p1792_p13 = scmp.ne.s32.totalorder %s1785_s20, %s1791_s25  ;;  %s1795_s26 = scalar_lea.vmem %s1859_s16, 400 }
 0x1cd   : > { %p1797_p2 = scmp.lt.s32.totalorder %s1795_s26, %s1791_s25 }
 0x1ce   : > { %p1793_p0 = pnand %p1792_p13, %p2921_p12 }
 0x1d0   : > { %p1794_p1 = pneg %p1793_p0 }
 0x1d2   : > { %p1799_p3 = pnand %p1797_p2, %p1794_p1 }
 0x1d4   : > { %1802 = shalt.err (!%p1799_p3)
}
 0x1d5   : > { %s1803_s27 = sshra.s32 %s2933_s19, 4  ;;  %s1814_s7 = scalar_lea.hbm %s2976_s3, 392  ;;  %s1804_s27 = int_to_ptr.hbm [resolvable:$true] %s1803_s27 }
 0x1d6   : > { %s1810_s29 = scalar_lea.hbm %s1804_s27, %s1786_s24  ;;  %p1815_p8 = scmp.lt.s32.totalorder %s1804_s27, %s2976_s3 }
 0x1d7   : > { %p1811_p4 = scmp.ne.s32.totalorder %s1804_s27, %s1810_s29  ;;  %p1816_p9 = scmp.lt.s32.totalorder %s1814_s7, %s1810_s29 }
 0x1d9   : > { %p1812_p5 = pnand %p1811_p4, %p2921_p12  ;;  %p1817_p10 = por %p1816_p9, %p1815_p8 }
 0x1db   : > { %p1813_p7 = pneg %p1812_p5 }
 0x1dd   : > { %p1818_p11 = pnand %p1817_p10, %p1813_p7 }
 0x1df   : > { %1821 = shalt.err (!%p1818_p11)
}
 0x1e0   : > { %s1860_s11 = smov 128   ;;  %s1861_s17 = smov 8  }
 0x1e1   : > { %1555 = dma.vmem_to_hbm [thread:$0]  (%p2921_p12), %s2931_s9, %s1672_s28, %s2933_s19, %s2912_s30, %s1860_s11, %s1860_s11, %s1861_s17  }
 0x1e2 PF: > { %p1697_p13 = scmp.ge.s32.totalorder %s1857_s15, 2  ;;  %s1564_s20 = sand.u32 1, %s1845_s12  }
 0x1e3   : > { %s1565_s24 = scalar_lea.sflag [#allocation3], %s1564_s20 }
 0x1e4   : > { %p1694_p0 = pnand %p1697_p13, %p1924_p6 }
 0x1e6   : > { %p1695_p1 = pneg %p1694_p0 }
 0x1e8   : > { %1840 = dma.done.wait (%p1695_p1), %s1565_s24, 3200  }
 0x1e9   : > { %1842 = vsyncadd (%p1695_p1), %s1565_s24, 4294964096  ;;  %p13_p2 = scmp.ge.s32.totalorder %s1907_s18, 4   ;;  %s3006_s12 = smov %s1849_s13 }
 0x1ea   : > { %s3007_s13 = smov %s1853_s14  ;;  %s3008_s14 = smov %s1918_s21 }
 0x1eb   : > { %s3009_s15 = smov %s1907_s18  ;;  %15 = sbr.rel (!%p13_p2) target bundleno = 3 (0x3), region = 67 }
 0x1f0   :  { %1571 = vsyncpa [#allocation3], 1 }
 0x1f1   :  { %1573 = vsyncpa [#allocation3 + $0x1], 1 }

// kernel: tpu_custom_call.1
= control target key start
LH: loop header
LB: loop body
LE: loop exit
PB: predicated region body
PF: predicated region fallthrough
CT: control target
= control target key end

     0   :  { %8 = vsyncpa [#allocation3], 0  ;;  %s2973_s0 = inlined_call_operand.vmem [shape: f32[392,36], index: 0, kind: input, shape index: {}]   ;;  %s2974_s1 = inlined_call_operand.vmem [shape: f32[36,128], index: 1, kind: input, shape index: {}]   ;;  %s2975_s2 = inlined_call_operand.vmem [shape: f32[1,128], index: 2, kind: input, shape index: {}]   ;;  %s2976_s3 = inlined_call_operand.hbm [shape: f32[392,128], index: 3, kind: output, shape index: {}]  }
   0x1   :  { %10 = vsyncpa [#allocation3 + $0x1], 0  ;;  %s1882_s12 = smov 0   ;;  %s1884_s13 = smov 0  }
   0x2   :  { %s1886_s14 = smov 0   ;;  %s1888_s15 = smov 0  }
   0x3 LB: > { %s1903_s16 = sadd.s32 4294967295, %s1857_s15   ;;  %s1612_s17 = sadd.s32 4294967294, %s1857_s15   ;;  %s1857_s15 = sphi %s1888_s15, %s3009_s15   ;;  %s1853_s14 = sphi %s1886_s14, %s3008_s14   ;;  %s1849_s13 = sphi %s1884_s13, %s3007_s13   ;;  %s1845_s12 = sphi %s1882_s12, %s3006_s12  }
   0x4   : > { %s1907_s18 = sadd.s32 1, %s1857_s15   ;;  %s91_s19 = sadd.s32 1, %s1853_s14 }
   0x5   : > { %s88_s20 = ssub.s32 %s1857_s15, %s1907_s18  ;;  %p101_p0 = scmp.ne.s32.totalorder %s1853_s14, %s1849_s13 }
   0x6   : > { %p89_p1 = scmp.eq.s32.totalorder %s88_s20, 0  ;;  %p102_p2 = scmp.eq.s32.totalorder %s1903_s16, 1 }
   0x7   : > { %p107_p3 = scmp.ne.s32.totalorder %s1849_s13, %s1845_s12  ;;  %p108_p4 = scmp.eq.s32.totalorder %s1612_s17, 1 }
   0x8   : > { %s1918_s21 = scalar_select %p89_p1, %s1853_s14, %s91_s19  }
   0x9   : > { %p1920_p5 = por %p102_p2, %p101_p0  ;;  %p1924_p6 = por %p108_p4, %p107_p3 }
   0xa   : > { %p1615_p7 = scmp.ge.s32.totalorder %s1857_s15, 1  ;;  %p149_p8 = scmp.lt.s32.totalorder %s1857_s15, 3 }
   0xc   : > { %p150_p9 = pnand %p1615_p7, %p149_p8 }
   0xd   : > { %s1937_s28 = smul.u32 (!%p150_p9), 25, %s1903_s16  ;;  %s174_s19 = sand.u32 (!%p150_p9), 1, %s1849_s13  }
   0xe   : > { %153 = sbr.rel (%p150_p9) target bundleno = 482 (0x1e2), region = 32  ;;  %s2912_s30 = scalar_lea.sflag (!%p150_p9), [#allocation3], %s174_s19 }
   0xf   : > { %p182_p10 = scmp.lt.s32.totalorder (!%p150_p9), %s1937_s28, 48  ;;  %s2178_s25 = smul.u32 (!%p150_p9), 200, %s174_s19 }
  0x11   : > { %s2200_s26 = scalar_lea.vmem (!%p150_p9), [#allocation2], %s2178_s25 }
  0x13   : > { %v225_v0 = vld [vmem:[%s2974_s1 + $0x20] sm:$0xf]  ;;  %vm306_vm0 = vcmask 1043456   ;;  %v224_v1 = vld [vmem:[%s2974_s1 + $0x18] sm:$0xff]  ;;  %v223_v2 = vld [vmem:[%s2974_s1 + $0x10] sm:$0xff]  ;;  %s183_s6 = scalar_select %p182_p10, %s1937_s28, 48 }
  0x14   : > { %1617 = vmatpush.msk.msra.mxu0 %vm306_vm0, %v225_v0  ;;  %1676 = vmatpush.msk.msra.mxu1 %vm306_vm0, %v225_v0  ;;  %v222_v3 = vld [vmem:[%s2974_s1 + $0x8] sm:$0xff]  ;;  %v221_v4 = vld [vmem:[%s2974_s1] sm:$0xff]  ;;  %vm230_vm1 = vcmask 293888   ;;  %s1536_s4 = ssub.s32 (%p1920_p5), 49, %s1937_s28 }
  0x15   : > { %1677 = vmatpush.msk.msra.mxu2 %vm306_vm0, %v225_v0  ;;  %1678 = vmatpush.msk.msra.mxu3 %vm306_vm0, %v225_v0  ;;  %s1616_s9 = sshll.u32 %s183_s6, 3  ;;  %v2009_v30 = vld [vmem:[%s2975_s2] ss:$0 sm:$0xff]  ;;  %p1537_p11 = scmp.lt.s32.totalorder (%p1920_p5), %s1536_s4, 25 }
  0x16   : > { %322 = vmatpush.msra.mxu0 %v224_v1  ;;  %1679 = vmatpush.msra.mxu1 %v224_v1  ;;  %s1953_s17 = scalar_lea.vmem %s2973_s0, %s1616_s9 }
  0x17   : > { %1680 = vmatpush.msra.mxu2 %v224_v1  ;;  %1681 = vmatpush.msra.mxu3 %v224_v1  ;;  %v196_v5 = vld [vmem:[%s1953_s17] sm:$0xff]  ;;  %v202_v6 = vld [vmem:[%s1953_s17 + $0x30] sm:$0xff]  ;;  %v215_v8 = vld [vmem:[%s1953_s17 + $0x98] sm:$0xff] }
  0x18   : > { %323 = vmatpush.msra.mxu0 %v223_v2  ;;  %1682 = vmatpush.msra.mxu1 %v223_v2  ;;  %v208_v7 = vld [vmem:[%s1953_s17 + $0x60] sm:$0xff]  ;;  %v197_v9 = vld [vmem:[%s1953_s17 + $0x8] sm:$0xff]  ;;  %v203_v10 = vld [vmem:[%s1953_s17 + $0x38] sm:$0xff] }
  0x19   : > { %1683 = vmatpush.msra.mxu2 %v223_v2  ;;  %1684 = vmatpush.msra.mxu3 %v223_v2  ;;  %v209_v11 = vld [vmem:[%s1953_s17 + $0x68] sm:$0xff]  ;;  %v216_v12 = vld [vmem:[%s1953_s17 + $0xa0] sm:$0xff]  ;;  %v198_v13 = vld [vmem:[%s1953_s17 + $0x10] sm:$0xff] }
  0x1a   : > { %324 = vmatpush.msra.mxu0 %v222_v3  ;;  %1685 = vmatpush.msra.mxu1 %v222_v3  ;;  %v204_v14 = vld [vmem:[%s1953_s17 + $0x40] sm:$0xff]  ;;  %v210_v15 = vld [vmem:[%s1953_s17 + $0x70] sm:$0xff]  ;;  %v217_v16 = vld [vmem:[%s1953_s17 + $0xa8] sm:$0xff] }
  0x1b   : > { %1686 = vmatpush.msra.mxu2 %v222_v3  ;;  %1687 = vmatpush.msra.mxu3 %v222_v3  ;;  %v199_v17 = vld [vmem:[%s1953_s17 + $0x18] sm:$0xff]  ;;  %v205_v18 = vld [vmem:[%s1953_s17 + $0x48] sm:$0xff]  ;;  %v218_v20 = vld [vmem:[%s1953_s17 + $0xb0] sm:$0xff] }
  0x1c   : > { %325 = vmatpush.msra.mxu0 %v221_v4  ;;  %1688 = vmatpush.msra.mxu1 %v221_v4  ;;  %v211_v19 = vld [vmem:[%s1953_s17 + $0x78] sm:$0xff]  ;;  %v200_v21 = vld [vmem:[%s1953_s17 + $0x20] sm:$0xff]  ;;  %v206_v22 = vld [vmem:[%s1953_s17 + $0x50] sm:$0xff] }
  0x1d   : > { %1689 = vmatpush.msra.mxu2 %v221_v4  ;;  %1690 = vmatpush.msra.mxu3 %v221_v4  ;;  %v212_v23 = vld [vmem:[%s1953_s17 + $0x80] sm:$0xff]  ;;  %v219_v24 = vld [vmem:[%s1953_s17 + $0xb8] sm:$0xff]  ;;  %v201_v25 = vld [vmem:[%s1953_s17 + $0x28] sm:$0xff] }
  0x1e   : > { %1618 = vmatmul.msk.f32.vlgmr.msra.gmra.mxu0 %vm230_vm1, %v196_v5  ;;  %1624 = vmatmul.msk.f32.vlgmr.msra.gmra.mxu1 %vm230_vm1, %v202_v6  ;;  %v207_v26 = vld [vmem:[%s1953_s17 + $0x58] sm:$0xff]  ;;  %v213_v27 = vld [vmem:[%s1953_s17 + $0x88] sm:$0xff]  ;;  %v220_v28 = vld [vmem:[%s1953_s17 + $0xc0] sm:$0xff] }
  0x1f   : > { %1630 = vmatmul.msk.f32.vlgmr.msra.gmra.mxu2 %vm230_vm1, %v208_v7  ;;  %1637 = vmatmul.msk.f32.vlgmr.msra.gmra.mxu3 %vm230_vm1, %v215_v8  ;;  %v214_v29 = vld [vmem:[%s1953_s17 + $0x90] sm:$0xff] }
  0x26   : > { %1619 = vmatmul.msk.f32.gmra.mxu0 %vm230_vm1, %v197_v9  ;;  %1625 = vmatmul.msk.f32.gmra.mxu1 %vm230_vm1, %v203_v10 }
  0x27   : > { %1631 = vmatmul.msk.f32.gmra.mxu2 %vm230_vm1, %v209_v11  ;;  %1638 = vmatmul.msk.f32.gmra.mxu3 %vm230_vm1, %v216_v12 }
  0x2e   : > { %1620 = vmatmul.msk.f32.gmra.mxu0 %vm230_vm1, %v198_v13  ;;  %1626 = vmatmul.msk.f32.gmra.mxu1 %vm230_vm1, %v204_v14 }
  0x2f   : > { %1632 = vmatmul.msk.f32.gmra.mxu2 %vm230_vm1, %v210_v15  ;;  %1639 = vmatmul.msk.f32.gmra.mxu3 %vm230_vm1, %v217_v16 }
  0x36   : > { %1621 = vmatmul.msk.f32.gmra.mxu0 %vm230_vm1, %v199_v17  ;;  %1627 = vmatmul.msk.f32.gmra.mxu1 %vm230_vm1, %v205_v18 }
  0x37   : > { %1633 = vmatmul.msk.f32.gmra.mxu2 %vm230_vm1, %v211_v19  ;;  %1640 = vmatmul.msk.f32.gmra.mxu3 %vm230_vm1, %v218_v20 }
  0x3e   : > { %1622 = vmatmul.msk.f32.gmra.mxu0 %vm230_vm1, %v200_v21  ;;  %1628 = vmatmul.msk.f32.gmra.mxu1 %vm230_vm1, %v206_v22 }
  0x3f   : > { %1634 = vmatmul.msk.f32.gmra.mxu2 %vm230_vm1, %v212_v23  ;;  %1641 = vmatmul.msk.f32.gmra.mxu3 %vm230_vm1, %v219_v24 }
  0x46   : > { %1623 = vmatmul.msk.f32.gmra.mxu0 %vm230_vm1, %v201_v25  ;;  %1629 = vmatmul.msk.f32.gmra.mxu1 %vm230_vm1, %v207_v26 }
  0x47   : > { %1635 = vmatmul.msk.f32.gmra.mxu2 %vm230_vm1, %v213_v27  ;;  %1642 = vmatmul.msk.f32.gmra.mxu3 %vm230_vm1, %v220_v28 }
  0x4f   : > { %1636 = vmatmul.msk.f32.gmra.mxu2 %vm230_vm1, %v214_v29 }
  0x9b   : > { %v327_v31 = vpop.f32.mrf.mxu0  ;;  %v345_v32 = vpop.f32.mrf.mxu1 }
  0x9c   : > { %v2012_v33 = vadd.f32 %v2009_v30, %v327_v31  ;;  %v2015_v34 = vadd.f32 %v2009_v30, %v345_v32 }
  0x9e   : > { %v2018_v35 = vmul.f32 0.70710677, %v2012_v33  ;;  %v2021_v36 = vmul.f32 0.70710677, %v2015_v34 }
  0xa0   : > { %v452_v37 = vmul.f32 %v2018_v35, %v2018_v35  ;;  %v692_v38 = vmul.f32 %v2021_v36, %v2021_v36 }
  0xa2   : > { %v2027_v39 = vmin.f32 %v452_v37, 16.0  ;;  %v2029_v40 = vmin.f32 %v692_v38, 16.0  ;;  %v363_v41 = vpop.f32.mrf.mxu2  ;;  %v384_v42 = vpop.f32.mrf.mxu3 }
  0xa3   : > { %v2032_v43 = vadd.f32 %v2009_v30, %v363_v41  ;;  %v2035_v44 = vadd.f32 %v2009_v30, %v384_v42  ;;  %v330_v53 = vpop.f32.mrf.mxu0  ;;  %v348_v21 = vpop.f32.mrf.mxu1 }
  0xa4   : > { %v454_v45 = vmul.f32 2.1237322e-06, %v2027_v39  ;;  %v465_v46 = vmul.f32 3.8918573e-05, %v2027_v39  ;;  %v694_v47 = vmul.f32 2.1237322e-06, %v2029_v40  ;;  %v2058_v63 = vadd.f32 %v2009_v30, %v330_v53 }
  0xa5   : > { %v705_v48 = vmul.f32 3.8918573e-05, %v2029_v40  ;;  %v2042_v49 = vmul.f32 0.70710677, %v2032_v43  ;;  %v2047_v56 = vmul.f32 0.70710677, %v2035_v44  ;;  %v2080_v38 = vadd.f32 %v2009_v30, %v348_v21 }
  0xa6   : > { %v455_v50 = vadd.f32 0.00028619796, %v454_v45  ;;  %v466_v51 = vadd.f32 0.001143296, %v465_v46  ;;  %v695_v52 = vadd.f32 0.00028619796, %v694_v47 }
  0xa7   : > { %v706_v54 = vadd.f32 0.001143296, %v705_v48  ;;  %v932_v55 = vmul.f32 %v2042_v49, %v2042_v49  ;;  %v1212_v62 = vmul.f32 %v2047_v56, %v2047_v56  ;;  %v2069_v13 = vmul.f32 0.70710677, %v2058_v63 }
  0xa8   : > { %v456_v57 = vmul.f32 %v455_v50, %v2027_v39  ;;  %v467_v58 = vmul.f32 %v466_v51, %v2027_v39  ;;  %v696_v59 = vmul.f32 %v695_v52, %v2029_v40 }
  0xa9   : > { %v707_v60 = vmul.f32 %v706_v54, %v2029_v40  ;;  %v2053_v61 = vmin.f32 %v932_v55, 16.0  ;;  %v2065_v9 = vmin.f32 %v1212_v62, 16.0 }
  0xaa   : > { %v457_v0 = vadd.f32 0.0036580483, %v456_v57  ;;  %v468_v1 = vadd.f32 0.014752088, %v467_v58  ;;  %v697_v2 = vadd.f32 0.0036580483, %v696_v59  ;;  %v492_v58 = vmul.f32 %v2069_v13, %v2069_v13 }
  0xab   : > { %v708_v3 = vadd.f32 0.014752088, %v707_v60  ;;  %v934_v4 = vmul.f32 2.1237322e-06, %v2053_v61  ;;  %v945_v5 = vmul.f32 3.8918573e-05, %v2053_v61 }
  0xac   : > { %v458_v6 = vmul.f32 %v457_v0, %v2027_v39  ;;  %v469_v7 = vmul.f32 %v468_v1, %v2027_v39  ;;  %v698_v8 = vmul.f32 %v697_v2, %v2029_v40  ;;  %v1214_v20 = vmul.f32 2.1237322e-06, %v2065_v9 }
  0xad   : > { %v709_v10 = vmul.f32 %v708_v3, %v2029_v40  ;;  %v935_v11 = vadd.f32 0.00028619796, %v934_v4  ;;  %v946_v12 = vadd.f32 0.001143296, %v945_v5  ;;  %v1225_v25 = vmul.f32 3.8918573e-05, %v2065_v9  ;;  %v366_v3 = vpop.f32.mrf.mxu2 }
  0xae   : > { %v459_v14 = vadd.f32 0.05243302, %v458_v6  ;;  %v470_v15 = vadd.f32 0.112945676, %v469_v7  ;;  %v699_v16 = vadd.f32 0.05243302, %v698_v8 }
  0xaf   : > { %v710_v17 = vadd.f32 0.112945676, %v709_v10  ;;  %v936_v18 = vmul.f32 %v935_v11, %v2053_v61  ;;  %v947_v19 = vmul.f32 %v946_v12, %v2053_v61  ;;  %v1215_v29 = vadd.f32 0.00028619796, %v1214_v20 }
  0xb0   : > { %v460_v22 = vmul.f32 %v459_v14, %v2027_v39  ;;  %v471_v23 = vmul.f32 %v470_v15, %v2027_v39  ;;  %v700_v24 = vmul.f32 %v699_v16, %v2029_v40  ;;  %v1226_v51 = vadd.f32 0.001143296, %v1225_v25 }
  0xb1   : > { %v711_v26 = vmul.f32 %v710_v17, %v2029_v40  ;;  %v937_v27 = vadd.f32 0.0036580483, %v936_v18  ;;  %v948_v28 = vadd.f32 0.014752088, %v947_v19  ;;  %v1216_v46 = vmul.f32 %v1215_v29, %v2065_v9 }
  0xb2   : > { %v461_v31 = vadd.f32 0.18741608, %v460_v22  ;;  %v472_v32 = vadd.f32 0.4994258, %v471_v23  ;;  %v701_v37 = vadd.f32 0.18741608, %v700_v24  ;;  %v1227_v2 = vmul.f32 %v1226_v51, %v2065_v9 }
  0xb3   : > { %v712_v41 = vadd.f32 0.4994258, %v711_v26  ;;  %v938_v42 = vmul.f32 %v937_v27, %v2053_v61  ;;  %v949_v45 = vmul.f32 %v948_v28, %v2053_v61  ;;  %v1217_v55 = vadd.f32 0.0036580483, %v1216_v46 }
  0xb4   : > { %v462_v47 = vmul.f32 %v461_v31, %v2027_v39  ;;  %v473_v48 = vmul.f32 %v472_v32, %v2027_v39  ;;  %v702_v50 = vmul.f32 %v701_v37, %v2029_v40  ;;  %v2094_v59 = vmul.f32 0.70710677, %v2080_v38 }
  0xb5   : > { %v713_v52 = vmul.f32 %v712_v41, %v2029_v40  ;;  %v939_v53 = vadd.f32 0.05243302, %v938_v42  ;;  %v950_v54 = vadd.f32 0.112945676, %v949_v45  ;;  %v1218_v0 = vmul.f32 %v1217_v55, %v2065_v9 }
  0xb6   : > { %v2089_v57 = vadd.f32 1.0, %v473_v48  ;;  %v2102_v40 = vmul.f32 0.5, %v2012_v33  ;;  %v463_v1 = vadd.f32 1.1283791, %v462_v47  ;;  %v2107_v4 = vmul.f32 0.5, %v2015_v34 }
  0xb7   : > { %v2096_v60 = vadd.f32 1.0, %v713_v52  ;;  %v940_v39 = vmul.f32 %v939_v53, %v2053_v61  ;;  %v951_v62 = vmul.f32 %v950_v54, %v2053_v61  ;;  %v703_v5 = vadd.f32 1.1283791, %v702_v50 }
  0xb8   : > { %1733 = vrcp.f32 %v2089_v57  ;;  %v2111_v6 = vmul.f32 0.5, %v2032_v43  ;;  %v2114_v8 = vmul.f32 0.5, %v2035_v44  ;;  %v2116_v33 = vmin.f32 %v492_v58, 16.0 }
  0xb9   : > { %1735 = vrcp.f32 %v2096_v60  ;;  %v941_v7 = vadd.f32 0.18741608, %v940_v39  ;;  %v732_v10 = vmul.f32 %v2094_v59, %v2094_v59  ;;  %v484_v11 = vand.u32 2147483647, %v2089_v57 }
  0xba   : > { %v952_v12 = vadd.f32 0.4994258, %v951_v62  ;;  %v1219_v34 = vadd.f32 0.05243302, %v1218_v0  ;;  %v2122_v14 = vadd.f32 %v2009_v30, %v366_v3  ;;  %v464_v15 = vmul.f32 %v463_v1, %v2018_v35 }
  0xbb   : > { %v486_v43 = vand.u32 2147483648, %v2089_v57  ;;  %v942_v16 = vmul.f32 %v941_v7, %v2053_v61  ;;  %v1228_v44 = vadd.f32 0.014752088, %v1227_v2  ;;  %vm480_vm2 = vweird.f32 %v2089_v57 }
  0xbc   : > { %v704_v17 = vmul.f32 %v703_v5, %v2021_v36  ;;  %v724_v18 = vand.u32 2147483647, %v2096_v60  ;;  %v953_v19 = vmul.f32 %v952_v12, %v2053_v61  ;;  %vm720_vm3 = vweird.f32 %v2096_v60 }
  0xbd   : > { %v726_v21 = vand.u32 2147483648, %v2096_v60  ;;  %v1220_v35 = vmul.f32 %v1219_v34, %v2065_v9  ;;  %v1229_v22 = vmul.f32 %v1228_v44, %v2065_v9  ;;  %vm2136_vm4 = vcmp.eq.f32.partialorder %v484_v11, 8.507059e+37 }
  0xbe   : > { %v1734_v20 = vpop.eup %1733  ;;  %v2140_v36 = vadd.f32 1.0, %v953_v19  ;;  %v494_v61 = vmul.f32 2.1237322e-06, %v2116_v33  ;;  %v505_v26 = vmul.f32 3.8918573e-05, %v2116_v33  ;;  %v487_v27 = vor.u32 1.1754944e-38, %v486_v43 }
  0xbf   : > { %v1736_v23 = vpop.eup %1735  ;;  %v476_v24 = vmul.f32 %v1734_v20, %v2089_v57  ;;  %v943_v29 = vadd.f32 1.1283791, %v942_v16  ;;  %v1230_v31 = vadd.f32 0.112945676, %v1229_v22  ;;  %vm2145_vm5 = vcmp.eq.f32.partialorder %v724_v18, 8.507059e+37 }
  0xc0   : > { %v716_v28 = vmul.f32 %v1736_v23, %v2096_v60  ;;  %1737 = vrcp.f32 %v2140_v36  ;;  %v2150_v41 = vmin.f32 %v732_v10, 16.0  ;;  %vm481_vm6 = vweird.f32 %v1734_v20 }
  0xc1   : > { %v477_v32 = vsub.f32 1.0, %v476_v24  ;;  %v727_v45 = vor.u32 1.1754944e-38, %v726_v21  ;;  %v1231_v46 = vmul.f32 %v1230_v31, %v2065_v9  ;;  %v1221_v48 = vadd.f32 0.18741608, %v1220_v35  ;;  %vm482_vm8 = vmor %vm480_vm2, %vm481_vm6 }
  0xc2   : > { %v717_v42 = vsub.f32 1.0, %v716_v28  ;;  %v495_v50 = vadd.f32 0.00028619796, %v494_v61  ;;  %v506_v51 = vadd.f32 0.001143296, %v505_v26  ;;  %vm721_vm7 = vweird.f32 %v1736_v23 }
  0xc3   : > { %v478_v47 = vmul.f32 %v1734_v20, %v477_v32  ;;  %v2154_v53 = vmul.f32 %v943_v29, %v2042_v49  ;;  %v1232_v54 = vadd.f32 0.4994258, %v1231_v46  ;;  %v734_v62 = vmul.f32 2.1237322e-06, %v2150_v41  ;;  %vm722_vm10 = vmor %vm720_vm3, %vm721_vm7 }
  0xc4   : > { %v718_v52 = vmul.f32 %v1736_v23, %v717_v42  ;;  %v496_v58 = vmul.f32 %v495_v50, %v2116_v33  ;;  %v507_v39 = vmul.f32 %v506_v51, %v2116_v33  ;;  %vm960_vm9 = vweird.f32 %v2140_v36 }
  0xc5   : > { %v479_v55 = vadd.f32 %v1734_v20, %v478_v47  ;;  %v964_v1 = vand.u32 2147483647, %v2140_v36  ;;  %v1233_v49 = vmul.f32 %v1232_v54, %v2065_v9  ;;  %v735_v10 = vadd.f32 0.00028619796, %v734_v62 }
  0xc6   : > { %v719_v0 = vadd.f32 %v1736_v23, %v718_v52  ;;  %v1738_v2 = vpop.eup %1737  ;;  %v497_v5 = vadd.f32 0.0036580483, %v496_v58  ;;  %v508_v7 = vadd.f32 0.014752088, %v507_v39  ;;  %v966_v34 = vand.u32 2147483648, %v2140_v36 }
  0xc7   : > { %v483_v3 = vsel %vm482_vm8, %v1734_v20, %v479_v55  ;;  %v956_v12 = vmul.f32 %v1738_v2, %v2140_v36  ;;  %v2173_v44 = vadd.f32 1.0, %v1233_v49  ;;  %v736_v21 = vmul.f32 %v735_v10, %v2150_v41 }
  0xc8   : > { %v488_v57 = vsel %vm2136_vm4, %v487_v27, %v483_v3  ;;  %v723_v11 = vsel %vm722_vm10, %v1736_v23, %v719_v0  ;;  %v498_v60 = vmul.f32 %v497_v5, %v2116_v33  ;;  %v509_v20 = vmul.f32 %v508_v7, %v2116_v33 }
  0xc9   : > { %v489_v43 = vmul.f32 %v488_v57, %v464_v15  ;;  %v728_v16 = vsel %vm2145_vm5, %v727_v45, %v723_v11  ;;  %v957_v19 = vsub.f32 1.0, %v956_v12  ;;  %v1222_v22 = vmul.f32 %v1221_v48, %v2065_v9 }
  0xca   : > { %v729_v18 = vmul.f32 %v728_v16, %v704_v17  ;;  %1739 = vrcp.f32 %v2173_v44  ;;  %v745_v15 = vmul.f32 3.8918573e-05, %v2150_v41  ;;  %vm961_vm11 = vweird.f32 %v1738_v2 }
  0xcb   : > { %v1643_v35 = vclamps-f32 %v489_v43, 1.0  ;;  %v958_v24 = vmul.f32 %v1738_v2, %v957_v19  ;;  %v499_v25 = vadd.f32 0.05243302, %v498_v60  ;;  %vm2185_vm12 = vcmp.eq.f32.partialorder %v964_v1, 8.507059e+37  ;;  %vm962_vm13 = vmor %vm960_vm9, %vm961_vm11 }
  0xcc   : > { %v1649_v23 = vclamps-f32 %v729_v18, 1.0  ;;  %v510_v17 = vadd.f32 0.112945676, %v509_v20  ;;  %v737_v27 = vadd.f32 0.0036580483, %v736_v21  ;;  %v967_v31 = vor.u32 1.1754944e-38, %v966_v34  ;;  %v333_v21 = vpop.f32.mrf.mxu0 }
  0xcd   : > { %v1452_v61 = vadd.f32 1.0, %v1643_v35  ;;  %v959_v29 = vadd.f32 %v1738_v2, %v958_v24  ;;  %v500_v9 = vmul.f32 %v499_v25, %v2116_v33  ;;  %v746_v45 = vadd.f32 0.001143296, %v745_v15 }
  0xce   : > { %v1458_v28 = vadd.f32 1.0, %v1649_v23  ;;  %v511_v37 = vmul.f32 %v510_v17, %v2116_v33  ;;  %v738_v42 = vmul.f32 %v737_v27, %v2150_v41  ;;  %v2197_v50 = vmul.f32 0.70710677, %v2122_v14 }
  0xcf   : > { %v1477_v32 = vmul.f32 %v1452_v61, %v2102_v40  ;;  %v963_v47 = vsel %vm962_vm13, %v1738_v2, %v959_v29  ;;  %v501_v48 = vadd.f32 0.18741608, %v500_v9  ;;  %v2206_v36 = vmul.f32 0.5, %v2058_v63  ;;  %v387_v63 = vpop.f32.mrf.mxu3 }
  0xd0   : > { %v1483_v46 = vmul.f32 %v1458_v28, %v2107_v4  ;;  %v1740_v51 = vpop.eup %1739  ;;  %v968_v40 = vsel %vm2185_vm12, %v967_v31, %v963_v47  ;;  %v512_v52 = vadd.f32 0.4994258, %v511_v37  ;;  %v747_v4 = vmul.f32 %v746_v45, %v2150_v41 }
  0xd1   : > { %1502 = vst [vmem:[%s2200_s26] sm:$0xff] %v1477_v32  ;;  %v969_v54 = vmul.f32 %v968_v40, %v2154_v53  ;;  %v1223_v55 = vadd.f32 1.1283791, %v1222_v22  ;;  %v1236_v58 = vmul.f32 %v1740_v51, %v2173_v44  ;;  %v739_v39 = vadd.f32 0.05243302, %v738_v42 }
  0xd2   : > { %1508 = vst [vmem:[%s2200_s26 + $0x30] sm:$0xff] %v1483_v46  ;;  %v1244_v62 = vand.u32 2147483647, %v2173_v44  ;;  %v513_v0 = vmul.f32 %v512_v52, %v2116_v33  ;;  %v748_v1 = vadd.f32 0.014752088, %v747_v4  ;;  %v972_v49 = vmul.f32 %v2197_v50, %v2197_v50 }
  0xd3   : > { %v1655_v2 = vclamps-f32 %v969_v54, 1.0  ;;  %v1237_v3 = vsub.f32 1.0, %v1236_v58  ;;  %v1246_v5 = vand.u32 2147483648, %v2173_v44  ;;  %v502_v7 = vmul.f32 %v501_v48, %v2116_v33 }
  0xd4   : > { %vm1241_vm14 = vweird.f32 %v1740_v51  ;;  %v2218_v53 = vadd.f32 1.0, %v513_v0  ;;  %v749_v10 = vmul.f32 %v748_v1, %v2150_v41  ;;  %v2221_v57 = vmin.f32 %v972_v49, 16.0 }
  0xd5   : > { %v1464_v11 = vadd.f32 1.0, %v1655_v2  ;;  %v1238_v12 = vmul.f32 %v1740_v51, %v1237_v3  ;;  %v740_v34 = vmul.f32 %v739_v39, %v2150_v41  ;;  %v2225_v43 = vadd.f32 %v2009_v30, %v387_v63  ;;  %v351_v63 = vpop.f32.mrf.mxu1 }
  0xd6   : > { %v1224_v16 = vmul.f32 %v1223_v55, %v2047_v56  ;;  %vm1240_vm15 = vweird.f32 %v2173_v44  ;;  %1741 = vrcp.f32 %v2218_v53  ;;  %v2231_v33 = vmul.f32 0.5, %v2080_v38 }
  0xd7   : > { %v1489_v60 = vmul.f32 %v1464_v11, %v2111_v6  ;;  %v1239_v18 = vadd.f32 %v1740_v51, %v1238_v12  ;;  %v503_v19 = vadd.f32 1.1283791, %v502_v7  ;;  %v750_v20 = vadd.f32 0.112945676, %v749_v10  ;;  %vm1242_vm0 = vmor %vm1240_vm15, %vm1241_vm14 }
  0xd8   : > { %vm1245_vm1 = vcmp.eq.f32.partialorder %v1244_v62, 8.507059e+37  ;;  %v1247_v35 = vor.u32 1.1754944e-38, %v1246_v5  ;;  %v974_v22 = vmul.f32 2.1237322e-06, %v2221_v57  ;;  %v985_v56 = vmul.f32 3.8918573e-05, %v2221_v57 }
  0xd9   : > { %1514 = vst [vmem:[%s2200_s26 + $0x60] sm:$0xff] %v1489_v60  ;;  %v1243_v44 = vsel %vm1242_vm0, %v1740_v51, %v1239_v18  ;;  %v741_v15 = vadd.f32 0.18741608, %v740_v34  ;;  %v751_v38 = vmul.f32 %v750_v20, %v2150_v41  ;;  %v2240_v23 = vmul.f32 0.70710677, %v2225_v43 }
  0xda   : > { %v1248_v6 = vsel %vm1245_vm1, %v1247_v35, %v1243_v44  ;;  %v975_v24 = vadd.f32 0.00028619796, %v974_v22  ;;  %v986_v25 = vadd.f32 0.001143296, %v985_v56  ;;  %v2243_v61 = vadd.f32 %v2009_v30, %v333_v21 }
  0xdb   : > { %v1249_v26 = vmul.f32 %v1248_v6, %v1224_v16  ;;  %v504_v17 = vmul.f32 %v503_v19, %v2069_v13  ;;  %v752_v27 = vadd.f32 0.4994258, %v751_v38  ;;  %v1252_v28 = vmul.f32 %v2240_v23, %v2240_v23 }
  0xdc   : > { %v1742_v29 = vpop.eup %1741  ;;  %v524_v31 = vand.u32 2147483647, %v2218_v53  ;;  %v976_v9 = vmul.f32 %v975_v24, %v2221_v57  ;;  %v987_v32 = vmul.f32 %v986_v25, %v2221_v57  ;;  %v2252_v37 = vmul.f32 0.70710677, %v2243_v61 }
  0xdd   : > { %v1662_v42 = vclamps-f32 %v1249_v26, 1.0  ;;  %v516_v45 = vmul.f32 %v1742_v29, %v2218_v53  ;;  %v526_v46 = vand.u32 2147483648, %v2218_v53  ;;  %v753_v13 = vmul.f32 %v752_v27, %v2150_v41 }
  0xde   : > { %v977_v47 = vadd.f32 0.0036580483, %v976_v9  ;;  %v988_v48 = vadd.f32 0.014752088, %v987_v32  ;;  %v2257_v51 = vmin.f32 %v1252_v28, 16.0  ;;  %v532_v40 = vmul.f32 %v2252_v37, %v2252_v37 }
  0xdf   : > { %v1471_v52 = vadd.f32 1.0, %v1662_v42  ;;  %v517_v4 = vsub.f32 1.0, %v516_v45  ;;  %v742_v54 = vmul.f32 %v741_v15, %v2150_v41  ;;  %v2262_v55 = vadd.f32 1.0, %v753_v13 }
  0xe0   : > { %v978_v58 = vmul.f32 %v977_v47, %v2221_v57  ;;  %v989_v39 = vmul.f32 %v988_v48, %v2221_v57  ;;  %v1254_v62 = vmul.f32 2.1237322e-06, %v2257_v51  ;;  %v1265_v0 = vmul.f32 3.8918573e-05, %v2257_v51 }
  0xe1   : > { %v1496_v1 = vmul.f32 %v1471_v52, %v2114_v8  ;;  %v518_v49 = vmul.f32 %v1742_v29, %v517_v4  ;;  %vm521_vm2 = vweird.f32 %v1742_v29  ;;  %1743 = vrcp.f32 %v2262_v55 }
  0xe2   : > { %vm520_vm3 = vweird.f32 %v2218_v53  ;;  %vm2271_vm4 = vcmp.eq.f32.partialorder %v524_v31, 8.507059e+37  ;;  %v979_v2 = vadd.f32 0.05243302, %v978_v58  ;;  %v2275_v3 = vmin.f32 %v532_v40, 16.0 }
  0xe3   : > { %1521 = vst [vmem:[%s2200_s26 + $0x98] sm:$0xff] %v1496_v1  ;;  %v519_v5 = vadd.f32 %v1742_v29, %v518_v49  ;;  %v527_v7 = vor.u32 1.1754944e-38, %v526_v46  ;;  %v990_v10 = vadd.f32 0.112945676, %v989_v39  ;;  %v1255_v11 = vadd.f32 0.00028619796, %v1254_v62  ;;  %vm522_vm5 = vmor %vm520_vm3, %vm521_vm2 }
  0xe4   : > { %v743_v8 = vadd.f32 1.1283791, %v742_v54  ;;  %v980_v12 = vmul.f32 %v979_v2, %v2221_v57  ;;  %v1266_v34 = vadd.f32 0.001143296, %v1265_v0  ;;  %v2280_v16 = vadd.f32 %v2009_v30, %v351_v63 }
  0xe5   : > { %v523_v53 = vsel %vm522_vm5, %v1742_v29, %v519_v5  ;;  %v991_v60 = vmul.f32 %v990_v10, %v2221_v57  ;;  %v1256_v18 = vmul.f32 %v1255_v11, %v2257_v51  ;;  %v534_v19 = vmul.f32 2.1237322e-06, %v2275_v3 }
  0xe6   : > { %v528_v20 = vsel %vm2271_vm4, %v527_v7, %v523_v53  ;;  %v981_v21 = vadd.f32 0.18741608, %v980_v12  ;;  %v1267_v35 = vmul.f32 %v1266_v34, %v2257_v51  ;;  %v545_v22 = vmul.f32 3.8918573e-05, %v2275_v3 }
  0xe7   : > { %v1744_v56 = vpop.eup %1743  ;;  %v529_v44 = vmul.f32 %v528_v20, %v504_v17  ;;  %v992_v15 = vadd.f32 0.4994258, %v991_v60  ;;  %v1257_v38 = vadd.f32 0.0036580483, %v1256_v18  ;;  %v535_v6 = vadd.f32 0.00028619796, %v534_v19 }
  0xe8   : > { %v756_v24 = vmul.f32 %v1744_v56, %v2262_v55  ;;  %v764_v25 = vand.u32 2147483647, %v2262_v55  ;;  %v766_v26 = vand.u32 2147483648, %v2262_v55  ;;  %v1268_v27 = vadd.f32 0.014752088, %v1267_v35 }
  0xe9   : > { %v1644_v28 = vclamps-f32 %v529_v44, 1.0  ;;  %v993_v29 = vmul.f32 %v992_v15, %v2221_v57  ;;  %v1258_v31 = vmul.f32 %v1257_v38, %v2257_v51  ;;  %v536_v9 = vmul.f32 %v535_v6, %v2275_v3 }
  0xea   : > { %v757_v32 = vsub.f32 1.0, %v756_v24  ;;  %v982_v17 = vmul.f32 %v981_v21, %v2221_v57  ;;  %v1269_v42 = vmul.f32 %v1268_v27, %v2257_v51  ;;  %v546_v45 = vadd.f32 0.001143296, %v545_v22  ;;  %v369_v22 = vpop.f32.mrf.mxu2 }
  0xeb   : > { %v1453_v46 = vadd.f32 1.0, %v1644_v28  ;;  %v2297_v13 = vadd.f32 1.0, %v993_v29  ;;  %v1259_v47 = vadd.f32 0.05243302, %v1258_v31  ;;  %v537_v48 = vadd.f32 0.0036580483, %v536_v9 }
  0xec   : > { %v758_v40 = vmul.f32 %v1744_v56, %v757_v32  ;;  %vm761_vm6 = vweird.f32 %v1744_v56  ;;  %v1270_v52 = vadd.f32 0.112945676, %v1269_v42  ;;  %v547_v4 = vmul.f32 %v546_v45, %v2275_v3 }
  0xed   : > { %v1478_v54 = vmul.f32 %v1453_v46, %v2206_v36  ;;  %vm760_vm7 = vweird.f32 %v2262_v55  ;;  %v2303_v57 = vmul.f32 0.5, %v2122_v14  ;;  %1745 = vrcp.f32 %v2297_v13 }
  0xee   : > { %v759_v58 = vadd.f32 %v1744_v56, %v758_v40  ;;  %v983_v39 = vadd.f32 1.1283791, %v982_v17  ;;  %v1260_v62 = vmul.f32 %v1259_v47, %v2257_v51  ;;  %v1271_v0 = vmul.f32 %v1270_v52, %v2257_v51  ;;  %vm762_vm8 = vmor %vm760_vm7, %vm761_vm6 }
  0xef   : > { %1503 = vst [vmem:[%s2200_s26 + $0x8] sm:$0xff] %v1478_v54  ;;  %v767_v1 = vor.u32 1.1754944e-38, %v766_v26  ;;  %v538_v49 = vmul.f32 %v537_v48, %v2275_v3  ;;  %v548_v63 = vadd.f32 0.014752088, %v547_v4  ;;  %v2311_v36 = vmul.f32 0.70710677, %v2280_v16 }
  0xf0   : > { %v744_v14 = vmul.f32 %v743_v8, %v2094_v59  ;;  %v763_v55 = vsel %vm762_vm8, %v1744_v56, %v759_v58  ;;  %vm765_vm9 = vcmp.eq.f32.partialorder %v764_v25, 8.507059e+37  ;;  %v1272_v41 = vadd.f32 0.4994258, %v1271_v0 }
  0xf1   : > { %v768_v2 = vsel %vm765_vm9, %v767_v1, %v763_v55  ;;  %v539_v5 = vadd.f32 0.05243302, %v538_v49  ;;  %v549_v7 = vmul.f32 %v548_v63, %v2275_v3  ;;  %v772_v10 = vmul.f32 %v2311_v36, %v2311_v36 }
  0xf2   : > { %v769_v11 = vmul.f32 %v768_v2, %v744_v14  ;;  %v984_v12 = vmul.f32 %v983_v39, %v2197_v50  ;;  %v1261_v34 = vadd.f32 0.18741608, %v1260_v62  ;;  %v1273_v53 = vmul.f32 %v1272_v41, %v2257_v51  ;;  %v390_v50 = vpop.f32.mrf.mxu3 }
  0xf3   : > { %v1746_v60 = vpop.eup %1745  ;;  %vm1000_vm10 = vweird.f32 %v2297_v13  ;;  %v540_v59 = vmul.f32 %v539_v5, %v2275_v3  ;;  %v550_v8 = vadd.f32 0.112945676, %v549_v7  ;;  %v2321_v18 = vmin.f32 %v772_v10, 16.0 }
  0xf4   : > { %v1650_v19 = vclamps-f32 %v769_v11, 1.0  ;;  %v996_v20 = vmul.f32 %v1746_v60, %v2297_v13  ;;  %v1004_v21 = vand.u32 2147483647, %v2297_v13  ;;  %v1006_v35 = vand.u32 2147483648, %v2297_v13 }
  0xf5   : > { %v2326_v56 = vadd.f32 1.0, %v1273_v53  ;;  %v541_v44 = vadd.f32 0.18741608, %v540_v59  ;;  %v551_v15 = vmul.f32 %v550_v8, %v2275_v3  ;;  %v774_v38 = vmul.f32 2.1237322e-06, %v2321_v18 }
  0xf6   : > { %v1459_v6 = vadd.f32 1.0, %v1650_v19  ;;  %v997_v24 = vsub.f32 1.0, %v996_v20  ;;  %v1262_v25 = vmul.f32 %v1261_v34, %v2257_v51  ;;  %v785_v26 = vmul.f32 3.8918573e-05, %v2321_v18 }
  0xf7   : > { %vm1001_vm11 = vweird.f32 %v1746_v60  ;;  %1747 = vrcp.f32 %v2326_v56  ;;  %v2334_v27 = vadd.f32 %v2009_v30, %v369_v22  ;;  %v2337_v28 = vadd.f32 %v2009_v30, %v390_v50 }
  0xf8   : > { %v1484_v29 = vmul.f32 %v1459_v6, %v2231_v33  ;;  %v998_v31 = vmul.f32 %v1746_v60, %v997_v24  ;;  %v542_v9 = vmul.f32 %v541_v44, %v2275_v3  ;;  %v552_v32 = vadd.f32 0.4994258, %v551_v15  ;;  %vm1002_vm13 = vmor %vm1000_vm10, %vm1001_vm11 }
  0xf9   : > { %vm2341_vm12 = vcmp.eq.f32.partialorder %v1004_v21, 8.507059e+37  ;;  %v1007_v51 = vor.u32 1.1754944e-38, %v1006_v35  ;;  %v775_v42 = vadd.f32 0.00028619796, %v774_v38  ;;  %v786_v45 = vadd.f32 0.001143296, %v785_v26 }
  0xfa   : > { %1509 = vst [vmem:[%s2200_s26 + $0x38] sm:$0xff] %v1484_v29  ;;  %v999_v46 = vadd.f32 %v1746_v60, %v998_v31  ;;  %v1263_v47 = vadd.f32 1.1283791, %v1262_v25  ;;  %v1284_v48 = vand.u32 2147483647, %v2326_v56  ;;  %v553_v40 = vmul.f32 %v552_v32, %v2275_v3 }
  0xfb   : > { %v1286_v33 = vand.u32 2147483648, %v2326_v56  ;;  %v776_v52 = vmul.f32 %v775_v42, %v2321_v18  ;;  %v787_v4 = vmul.f32 %v786_v45, %v2321_v18  ;;  %v2355_v54 = vmul.f32 0.70710677, %v2334_v27 }
  0xfc   : > { %v1003_v58 = vsel %vm1002_vm13, %v1746_v60, %v999_v46  ;;  %v543_v39 = vadd.f32 1.1283791, %v542_v9  ;;  %v2357_v62 = vadd.f32 1.0, %v553_v40  ;;  %v2360_v0 = vmul.f32 0.70710677, %v2337_v28 }
  0xfd   : > { %v1748_v3 = vpop.eup %1747  ;;  %v1008_v13 = vsel %vm2341_vm12, %v1007_v51, %v1003_v58  ;;  %v777_v1 = vadd.f32 0.0036580483, %v776_v52  ;;  %v788_v49 = vadd.f32 0.014752088, %v787_v4  ;;  %v1012_v63 = vmul.f32 %v2355_v54, %v2355_v54 }
  0xfe   : > { %v1009_v14 = vmul.f32 %v1008_v13, %v984_v12  ;;  %v2367_v55 = vmul.f32 0.5, %v2225_v43  ;;  %v1276_v41 = vmul.f32 %v1748_v3, %v2326_v56  ;;  %1749 = vrcp.f32 %v2357_v62 }
  0xff   : > { %v1264_v2 = vmul.f32 %v1263_v47, %v2240_v23  ;;  %vm1280_vm14 = vweird.f32 %v2326_v56  ;;  %vm2373_vm15 = vcmp.eq.f32.partialorder %v1284_v48, 8.507059e+37  ;;  %v778_v7 = vmul.f32 %v777_v1, %v2321_v18 }
 0x100   : > { %v1656_v10 = vclamps-f32 %v1009_v14, 1.0  ;;  %v1277_v11 = vsub.f32 1.0, %v1276_v41  ;;  %v789_v12 = vmul.f32 %v788_v49, %v2321_v18  ;;  %v2379_v43 = vmin.f32 %v1012_v63, 16.0 }
 0x101   : > { %vm1281_vm0 = vweird.f32 %v1748_v3  ;;  %v1287_v34 = vor.u32 1.1754944e-38, %v1286_v33  ;;  %v544_v53 = vmul.f32 %v543_v39, %v2252_v37  ;;  %v1292_v23 = vmul.f32 %v2360_v0, %v2360_v0  ;;  %v336_v33 = vpop.f32.mrf.mxu0 }
 0x102   : > { %v1465_v60 = vadd.f32 1.0, %v1656_v10  ;;  %v1278_v59 = vmul.f32 %v1748_v3, %v1277_v11  ;;  %v790_v8 = vadd.f32 0.112945676, %v789_v12  ;;  %v1014_v19 = vmul.f32 2.1237322e-06, %v2379_v43  ;;  %vm1282_vm2 = vmor %vm1280_vm14, %vm1281_vm0 }
 0x103   : > { %vm560_vm1 = vweird.f32 %v2357_v62  ;;  %v779_v20 = vadd.f32 0.05243302, %v778_v7  ;;  %v1025_v21 = vmul.f32 3.8918573e-05, %v2379_v43  ;;  %v2387_v35 = vmin.f32 %v1292_v23, 16.0 }
 0x104   : > { %v1750_v22 = vpop.eup %1749  ;;  %v1490_v50 = vmul.f32 %v1465_v60, %v2303_v57  ;;  %v1279_v37 = vadd.f32 %v1748_v3, %v1278_v59  ;;  %v791_v44 = vmul.f32 %v790_v8, %v2321_v18  ;;  %v1015_v15 = vadd.f32 0.00028619796, %v1014_v19 }
 0x105   : > { %v556_v38 = vmul.f32 %v1750_v22, %v2357_v62  ;;  %v564_v6 = vand.u32 2147483647, %v2357_v62  ;;  %v566_v24 = vand.u32 2147483648, %v2357_v62  ;;  %v1026_v25 = vadd.f32 0.001143296, %v1025_v21 }
 0x106   : > { %1515 = vst [vmem:[%s2200_s26 + $0x68] sm:$0xff] %v1490_v50  ;;  %v1283_v26 = vsel %vm1282_vm2, %v1748_v3, %v1279_v37  ;;  %v792_v29 = vadd.f32 0.4994258, %v791_v44  ;;  %v1016_v57 = vmul.f32 %v1015_v15, %v2379_v43  ;;  %v1294_v31 = vmul.f32 2.1237322e-06, %v2387_v35 }
 0x107   : > { %v1288_v9 = vsel %vm2373_vm15, %v1287_v34, %v1283_v26  ;;  %v557_v32 = vsub.f32 1.0, %v556_v38  ;;  %v780_v56 = vmul.f32 %v779_v20, %v2321_v18  ;;  %v1027_v17 = vmul.f32 %v1026_v25, %v2379_v43 }
 0x108   : > { %v1289_v51 = vmul.f32 %v1288_v9, %v1264_v2  ;;  %v793_v42 = vmul.f32 %v792_v29, %v2321_v18  ;;  %v1017_v45 = vadd.f32 0.0036580483, %v1016_v57  ;;  %v1295_v46 = vadd.f32 0.00028619796, %v1294_v31 }
 0x109   : > { %v558_v47 = vmul.f32 %v1750_v22, %v557_v32  ;;  %vm561_vm3 = vweird.f32 %v1750_v22  ;;  %v1028_v48 = vadd.f32 0.014752088, %v1027_v17  ;;  %v1305_v40 = vmul.f32 3.8918573e-05, %v2387_v35  ;;  %v372_v32 = vpop.f32.mrf.mxu2 }
 0x10a   : > { %v1663_v52 = vclamps-f32 %v1289_v51, 1.0  ;;  %v2406_v4 = vadd.f32 1.0, %v793_v42  ;;  %v1018_v58 = vmul.f32 %v1017_v45, %v2379_v43  ;;  %v1296_v39 = vmul.f32 %v1295_v46, %v2387_v35  ;;  %vm562_vm4 = vmor %vm560_vm1, %vm561_vm3 }
 0x10b   : > { %v559_v3 = vadd.f32 %v1750_v22, %v558_v47  ;;  %v567_v13 = vor.u32 1.1754944e-38, %v566_v24  ;;  %v781_v1 = vadd.f32 0.18741608, %v780_v56  ;;  %v1029_v49 = vmul.f32 %v1028_v48, %v2379_v43  ;;  %v354_v24 = vpop.f32.mrf.mxu1 }
 0x10c   : > { %v1472_v63 = vadd.f32 1.0, %v1663_v52  ;;  %1751 = vrcp.f32 %v2406_v4  ;;  %v1306_v14 = vadd.f32 0.001143296, %v1305_v40  ;;  %v2415_v41 = vadd.f32 %v2009_v30, %v336_v33 }
 0x10d   : > { %v563_v2 = vsel %vm562_vm4, %v1750_v22, %v559_v3  ;;  %vm565_vm5 = vcmp.eq.f32.partialorder %v564_v6, 8.507059e+37  ;;  %v1019_v5 = vadd.f32 0.05243302, %v1018_v58  ;;  %v1030_v7 = vadd.f32 0.112945676, %v1029_v49 }
 0x10e   : > { %v1497_v10 = vmul.f32 %v1472_v63, %v2367_v55  ;;  %v568_v11 = vsel %vm565_vm5, %v567_v13, %v563_v2  ;;  %v1297_v12 = vadd.f32 0.0036580483, %v1296_v39  ;;  %v782_v23 = vmul.f32 %v781_v1, %v2321_v18 }
 0x10f   : > { %v569_v34 = vmul.f32 %v568_v11, %v544_v53  ;;  %v1020_v62 = vmul.f32 %v1019_v5, %v2379_v43  ;;  %v1031_v60 = vmul.f32 %v1030_v7, %v2379_v43  ;;  %v404_v59 = vmul.f32 0.5, %v2243_v61 }
 0x110   : > { %1522 = vst [vmem:[%s2200_s26 + $0xa0] sm:$0xff] %v1497_v10  ;;  %v1298_v8 = vmul.f32 %v1297_v12, %v2387_v35  ;;  %v1307_v19 = vmul.f32 %v1306_v14, %v2387_v35  ;;  %v2426_v20 = vmul.f32 0.70710677, %v2415_v41  ;;  %v2429_v21 = vmul.f32 0.5, %v2280_v16 }
 0x111   : > { %v1645_v55 = vclamps-f32 %v569_v34, 1.0  ;;  %v1021_v53 = vadd.f32 0.18741608, %v1020_v62  ;;  %v1032_v18 = vadd.f32 0.4994258, %v1031_v60  ;;  %v2432_v50 = vmul.f32 0.5, %v2334_v27 }
 0x112   : > { %v1752_v22 = vpop.eup %1751  ;;  %v2435_v37 = vmul.f32 0.5, %v2337_v28  ;;  %v1308_v61 = vadd.f32 0.014752088, %v1307_v19  ;;  %v572_v44 = vmul.f32 %v2426_v20, %v2426_v20  ;;  %v783_v38 = vadd.f32 1.1283791, %v782_v23 }
 0x113   : > { %v1454_v15 = vadd.f32 1.0, %v1645_v55  ;;  %v796_v6 = vmul.f32 %v1752_v22, %v2406_v4  ;;  %v1299_v16 = vadd.f32 0.05243302, %v1298_v8  ;;  %v804_v25 = vand.u32 2147483647, %v2406_v4 }
 0x114   : > { %v1033_v26 = vmul.f32 %v1032_v18, %v2379_v43  ;;  %v1309_v27 = vmul.f32 %v1308_v61, %v2387_v35  ;;  %v2443_v29 = vmin.f32 %v572_v44, 16.0  ;;  %v806_v31 = vand.u32 2147483648, %v2406_v4 }
 0x115   : > { %v1479_v28 = vmul.f32 %v1454_v15, %v404_v59  ;;  %v797_v57 = vsub.f32 1.0, %v796_v6  ;;  %v1022_v9 = vmul.f32 %v1021_v53, %v2379_v43  ;;  %vm801_vm6 = vweird.f32 %v1752_v22  ;;  %v2462_v43 = vld [vmem:[%s2975_s2] ss:$0 sm:$0xff] }
 0x116   : > { %v2447_v56 = vadd.f32 1.0, %v1033_v26  ;;  %v1310_v17 = vadd.f32 0.112945676, %v1309_v27  ;;  %v2450_v51 = vadd.f32 %v2009_v30, %v354_v24  ;;  %v1300_v45 = vmul.f32 %v1299_v16, %v2387_v35 }
 0x117   : > { %1504 = vst [vmem:[%s2200_s26 + $0x10] sm:$0xff] %v1479_v28  ;;  %v798_v42 = vmul.f32 %v1752_v22, %v797_v57  ;;  %v574_v46 = vmul.f32 2.1237322e-06, %v2443_v29  ;;  %v585_v47 = vmul.f32 3.8918573e-05, %v2443_v29  ;;  %v784_v48 = vmul.f32 %v783_v38, %v2311_v36 }
 0x118   : > { %vm800_vm7 = vweird.f32 %v2406_v4  ;;  %1753 = vrcp.f32 %v2447_v56  ;;  %v2465_v30 = vadd.f32 %v2462_v43, %v372_v32  ;;  %v1023_v33 = vadd.f32 1.1283791, %v1022_v9 }
 0x119   : > { %v799_v40 = vadd.f32 %v1752_v22, %v798_v42  ;;  %v1311_v52 = vmul.f32 %v1310_v17, %v2387_v35  ;;  %v575_v58 = vadd.f32 0.00028619796, %v574_v46  ;;  %vm802_vm8 = vmor %vm800_vm7, %vm801_vm6  ;;  %vm805_vm9 = vcmp.eq.f32.partialorder %v804_v25, 8.507059e+37 }
 0x11a   : > { %v807_v36 = vor.u32 1.1754944e-38, %v806_v31  ;;  %v586_v4 = vadd.f32 0.001143296, %v585_v47  ;;  %v2470_v39 = vmul.f32 0.70710677, %v2450_v51  ;;  %v1024_v10 = vmul.f32 %v1023_v33, %v2355_v54 }
 0x11b   : > { %v803_v3 = vsel %vm802_vm8, %v1752_v22, %v799_v40  ;;  %v1301_v13 = vadd.f32 0.18741608, %v1300_v45  ;;  %v1312_v1 = vadd.f32 0.4994258, %v1311_v52  ;;  %v576_v49 = vmul.f32 %v575_v58, %v2443_v29 }
 0x11c   : > { %v808_v63 = vsel %vm805_vm9, %v807_v36, %v803_v3  ;;  %v587_v14 = vmul.f32 %v586_v4, %v2443_v29  ;;  %v812_v2 = vmul.f32 %v2470_v39, %v2470_v39  ;;  %v2477_v5 = vmul.f32 0.70710677, %v2465_v30 }
 0x11d   : > { %v809_v7 = vmul.f32 %v808_v63, %v784_v48  ;;  %v1313_v11 = vmul.f32 %v1312_v1, %v2387_v35  ;;  %v577_v12 = vadd.f32 0.0036580483, %v576_v49  ;;  %v1044_v23 = vand.u32 2147483647, %v2447_v56 }
 0x11e   : > { %v1754_v34 = vpop.eup %1753  ;;  %v588_v62 = vadd.f32 0.014752088, %v587_v14  ;;  %v2482_v60 = vmin.f32 %v812_v2, 16.0  ;;  %v1052_v59 = vmul.f32 %v2477_v5, %v2477_v5  ;;  %v1046_v55 = vand.u32 2147483648, %v2447_v56 }
 0x11f   : > { %v1651_v8 = vclamps-f32 %v809_v7, 1.0  ;;  %v1036_v19 = vmul.f32 %v1754_v34, %v2447_v56  ;;  %v2488_v53 = vadd.f32 1.0, %v1313_v11  ;;  %v578_v54 = vmul.f32 %v577_v12, %v2443_v29  ;;  %v393_v12 = vpop.f32.mrf.mxu3 }
 0x120   : > { %v589_v18 = vmul.f32 %v588_v62, %v2443_v29  ;;  %v814_v22 = vmul.f32 2.1237322e-06, %v2482_v60  ;;  %v825_v61 = vmul.f32 3.8918573e-05, %v2482_v60  ;;  %vm1040_vm10 = vweird.f32 %v2447_v56 }
 0x121   : > { %v1460_v44 = vadd.f32 1.0, %v1651_v8  ;;  %v1037_v15 = vsub.f32 1.0, %v1036_v19  ;;  %1755 = vrcp.f32 %v2488_v53  ;;  %vm1041_vm11 = vweird.f32 %v1754_v34 }
 0x122   : > { %v1302_v38 = vmul.f32 %v1301_v13, %v2387_v35  ;;  %v579_v6 = vadd.f32 0.05243302, %v578_v54  ;;  %v2497_v16 = vmin.f32 %v1052_v59, 16.0  ;;  %v590_v26 = vadd.f32 0.112945676, %v589_v18  ;;  %vm1042_vm13 = vmor %vm1040_vm10, %vm1041_vm11 }
 0x123   : > { %v1485_v24 = vmul.f32 %v1460_v44, %v2429_v21  ;;  %v1038_v25 = vmul.f32 %v1754_v34, %v1037_v15  ;;  %v815_v27 = vadd.f32 0.00028619796, %v814_v22  ;;  %vm2500_vm12 = vcmp.eq.f32.partialorder %v1044_v23, 8.507059e+37 }
 0x124   : > { %v1047_v57 = vor.u32 1.1754944e-38, %v1046_v55  ;;  %v580_v31 = vmul.f32 %v579_v6, %v2443_v29  ;;  %v826_v9 = vadd.f32 0.001143296, %v825_v61  ;;  %v591_v35 = vmul.f32 %v590_v26, %v2443_v29 }
 0x125   : > { %1510 = vst [vmem:[%s2200_s26 + $0x40] sm:$0xff] %v1485_v24  ;;  %v1039_v32 = vadd.f32 %v1754_v34, %v1038_v25  ;;  %v816_v17 = vmul.f32 %v815_v27, %v2482_v60  ;;  %v1054_v42 = vmul.f32 2.1237322e-06, %v2497_v16  ;;  %v1303_v21 = vadd.f32 1.1283791, %v1302_v38 }
 0x126   : > { %v581_v45 = vadd.f32 0.18741608, %v580_v31  ;;  %v827_v46 = vmul.f32 %v826_v9, %v2482_v60  ;;  %v1065_v47 = vmul.f32 3.8918573e-05, %v2497_v16  ;;  %v592_v33 = vadd.f32 0.4994258, %v591_v35 }
 0x127   : > { %v1756_v48 = vpop.eup %1755  ;;  %v1043_v40 = vsel %vm1042_vm13, %v1754_v34, %v1039_v32  ;;  %v817_v52 = vadd.f32 0.0036580483, %v816_v17  ;;  %v1055_v58 = vadd.f32 0.00028619796, %v1054_v42  ;;  %v1324_v3 = vand.u32 2147483647, %v2488_v53 }
 0x128   : > { %v1048_v36 = vsel %vm2500_vm12, %v1047_v57, %v1043_v40  ;;  %v1316_v4 = vmul.f32 %v1756_v48, %v2488_v53  ;;  %v1326_v56 = vand.u32 2147483648, %v2488_v53  ;;  %v593_v1 = vmul.f32 %v592_v33, %v2443_v29 }
 0x129   : > { %v1049_v13 = vmul.f32 %v1048_v36, %v1024_v10  ;;  %v818_v49 = vmul.f32 %v817_v52, %v2482_v60  ;;  %v828_v63 = vadd.f32 0.014752088, %v827_v46  ;;  %v582_v2 = vmul.f32 %v581_v45, %v2443_v29 }
 0x12a   : > { %v1317_v14 = vsub.f32 1.0, %v1316_v4  ;;  %v1056_v7 = vmul.f32 %v1055_v58, %v2497_v16  ;;  %v1066_v11 = vadd.f32 0.001143296, %v1065_v47  ;;  %v2523_v23 = vadd.f32 1.0, %v593_v1 }
 0x12b   : > { %v1657_v34 = vclamps-f32 %v1049_v13, 1.0  ;;  %v819_v62 = vadd.f32 0.05243302, %v818_v49  ;;  %v829_v59 = vmul.f32 %v828_v63, %v2482_v60  ;;  %vm1321_vm14 = vweird.f32 %v1756_v48 }
 0x12c   : > { %v1318_v8 = vmul.f32 %v1756_v48, %v1317_v14  ;;  %v1057_v10 = vadd.f32 0.0036580483, %v1056_v7  ;;  %v1067_v19 = vmul.f32 %v1066_v11, %v2497_v16  ;;  %vm1320_vm15 = vweird.f32 %v2488_v53 }
 0x12d   : > { %v1466_v55 = vadd.f32 1.0, %v1657_v34  ;;  %1757 = vrcp.f32 %v2523_v23  ;;  %v2530_v29 = vadd.f32 %v2462_v43, %v393_v12  ;;  %v1327_v18 = vor.u32 1.1754944e-38, %v1326_v56  ;;  %vm1322_vm0 = vmor %vm1320_vm15, %vm1321_vm14 }
 0x12e   : > { %v1319_v54 = vadd.f32 %v1756_v48, %v1318_v8  ;;  %v820_v22 = vmul.f32 %v819_v62, %v2482_v60  ;;  %v830_v61 = vadd.f32 0.112945676, %v829_v59  ;;  %v583_v15 = vadd.f32 1.1283791, %v582_v2 }
 0x12f   : > { %v1491_v44 = vmul.f32 %v1466_v55, %v2432_v50  ;;  %v1058_v38 = vmul.f32 %v1057_v10, %v2497_v16  ;;  %v1068_v6 = vadd.f32 0.014752088, %v1067_v19  ;;  %v1304_v53 = vmul.f32 %v1303_v21, %v2360_v0  ;;  %v339_v50 = vpop.f32.mrf.mxu0  ;;  %v357_v10 = vpop.f32.mrf.mxu1 }
 0x130   : > { %v1323_v24 = vsel %vm1322_vm0, %v1756_v48, %v1319_v54  ;;  %vm1325_vm1 = vcmp.eq.f32.partialorder %v1324_v3, 8.507059e+37  ;;  %v831_v25 = vmul.f32 %v830_v61, %v2482_v60  ;;  %v2540_v57 = vmul.f32 0.70710677, %v2530_v29 }
 0x131   : > { %1516 = vst [vmem:[%s2200_s26 + $0x70] sm:$0xff] %v1491_v44  ;;  %v1328_v26 = vsel %vm1325_vm1, %v1327_v18, %v1323_v24  ;;  %v1059_v27 = vadd.f32 0.05243302, %v1058_v38  ;;  %v1069_v28 = vmul.f32 %v1068_v6, %v2497_v16  ;;  %v2543_v9 = vmul.f32 0.5, %v2415_v41 }
 0x132   : > { %v1329_v31 = vmul.f32 %v1328_v26, %v1304_v53  ;;  %v821_v32 = vadd.f32 0.18741608, %v820_v22  ;;  %v832_v35 = vadd.f32 0.4994258, %v831_v25  ;;  %v584_v17 = vmul.f32 %v583_v15, %v2426_v20 }
 0x133   : > { %v1758_v0 = vpop.eup %1757  ;;  %v1060_v42 = vmul.f32 %v1059_v27, %v2497_v16  ;;  %v1070_v21 = vadd.f32 0.112945676, %v1069_v28  ;;  %v1332_v45 = vmul.f32 %v2540_v57, %v2540_v57  ;;  %v604_v48 = vand.u32 2147483647, %v2523_v23 }
 0x134   : > { %v1664_v46 = vclamps-f32 %v1329_v31, 1.0  ;;  %v596_v47 = vmul.f32 %v1758_v0, %v2523_v23  ;;  %v2552_v40 = vadd.f32 %v2462_v43, %v339_v50  ;;  %v833_v41 = vmul.f32 %v832_v35, %v2482_v60 }
 0x135   : > { %v1061_v33 = vadd.f32 0.18741608, %v1060_v42  ;;  %v1071_v52 = vmul.f32 %v1070_v21, %v2497_v16  ;;  %v2556_v20 = vmin.f32 %v1332_v45, 16.0  ;;  %v606_v4 = vand.u32 2147483648, %v2523_v23 }
 0x136   : > { %v1473_v58 = vadd.f32 1.0, %v1664_v46  ;;  %v597_v36 = vsub.f32 1.0, %v596_v47  ;;  %v822_v3 = vmul.f32 %v821_v32, %v2482_v60  ;;  %vm601_vm2 = vweird.f32 %v1758_v0 }
 0x137   : > { %v2560_v56 = vadd.f32 1.0, %v833_v41  ;;  %v1072_v13 = vadd.f32 0.4994258, %v1071_v52  ;;  %v1334_v1 = vmul.f32 2.1237322e-06, %v2556_v20  ;;  %vm600_vm3 = vweird.f32 %v2523_v23 }
 0x138   : > { %v1498_v49 = vmul.f32 %v1473_v58, %v2435_v37  ;;  %v598_v63 = vmul.f32 %v1758_v0, %v597_v36  ;;  %v1345_v14 = vmul.f32 3.8918573e-05, %v2556_v20  ;;  %v2566_v2 = vmul.f32 0.70710677, %v2552_v40  ;;  %vm602_vm5 = vmor %vm600_vm3, %vm601_vm2 }
 0x139   : > { %vm2569_vm4 = vcmp.eq.f32.partialorder %v604_v48, 8.507059e+37  ;;  %1759 = vrcp.f32 %v2560_v56  ;;  %v1062_v60 = vmul.f32 %v1061_v33, %v2497_v16  ;;  %v607_v12 = vor.u32 1.1754944e-38, %v606_v4 }
 0x13a   : > { %1523 = vst [vmem:[%s2200_s26 + $0xa8] sm:$0xff] %v1498_v49  ;;  %v599_v11 = vadd.f32 %v1758_v0, %v598_v63  ;;  %v1073_v37 = vmul.f32 %v1072_v13, %v2497_v16  ;;  %v1335_v34 = vadd.f32 0.00028619796, %v1334_v1  ;;  %v823_v62 = vadd.f32 1.1283791, %v822_v3 }
 0x13b   : > { %v844_v59 = vand.u32 2147483647, %v2560_v56  ;;  %v1346_v23 = vadd.f32 0.001143296, %v1345_v14  ;;  %v612_v8 = vmul.f32 %v2566_v2, %v2566_v2  ;;  %v846_v55 = vand.u32 2147483648, %v2560_v56 }
 0x13c   : > { %v603_v19 = vsel %vm602_vm5, %v1758_v0, %v599_v11  ;;  %v2582_v54 = vadd.f32 1.0, %v1073_v37  ;;  %v1336_v18 = vmul.f32 %v1335_v34, %v2556_v20  ;;  %v1063_v22 = vadd.f32 1.1283791, %v1062_v60 }
 0x13d   : > { %v608_v16 = vsel %vm2569_vm4, %v607_v12, %v603_v19  ;;  %v1347_v61 = vmul.f32 %v1346_v23, %v2556_v20  ;;  %v2588_v44 = vmin.f32 %v612_v8, 16.0  ;;  %v2591_v38 = vmul.f32 0.5, %v2450_v51  ;;  %v375_v19 = vpop.f32.mrf.mxu2 }
 0x13e   : > { %v609_v15 = vmul.f32 %v608_v16, %v584_v17  ;;  %1761 = vrcp.f32 %v2582_v54  ;;  %v2595_v6 = vadd.f32 %v2462_v43, %v357_v10  ;;  %v824_v24 = vmul.f32 %v823_v62, %v2470_v39 }
 0x13f   : > { %v1760_v53 = vpop.eup %1759  ;;  %vm840_vm6 = vweird.f32 %v2560_v56  ;;  %v1337_v25 = vadd.f32 0.0036580483, %v1336_v18  ;;  %v1348_v26 = vadd.f32 0.014752088, %v1347_v61  ;;  %vm2600_vm7 = vcmp.eq.f32.partialorder %v844_v59, 8.507059e+37  ;;  %v396_v61 = vpop.f32.mrf.mxu3 }
 0x140   : > { %v1646_v27 = vclamps-f32 %v609_v15, 1.0  ;;  %v836_v28 = vmul.f32 %v1760_v53, %v2560_v56  ;;  %v847_v51 = vor.u32 1.1754944e-38, %v846_v55  ;;  %v1064_v31 = vmul.f32 %v1063_v22, %v2477_v5 }
 0x141   : > { %v1338_v32 = vmul.f32 %v1337_v25, %v2556_v20  ;;  %v1349_v35 = vmul.f32 %v1348_v26, %v2556_v20  ;;  %v614_v39 = vmul.f32 2.1237322e-06, %v2588_v44  ;;  %v625_v42 = vmul.f32 3.8918573e-05, %v2588_v44 }
 0x142   : > { %v1455_v0 = vadd.f32 1.0, %v1646_v27  ;;  %v837_v17 = vsub.f32 1.0, %v836_v28  ;;  %v2610_v21 = vmul.f32 0.70710677, %v2595_v6  ;;  %vm841_vm8 = vweird.f32 %v1760_v53 }
 0x143   : > { %vm1080_vm9 = vweird.f32 %v2582_v54  ;;  %v1350_v45 = vadd.f32 0.112945676, %v1349_v35  ;;  %v615_v46 = vadd.f32 0.00028619796, %v614_v39  ;;  %v626_v41 = vadd.f32 0.001143296, %v625_v42  ;;  %vm842_vm10 = vmor %vm840_vm6, %vm841_vm8 }
 0x144   : > { %v1762_v5 = vpop.eup %1761  ;;  %v1480_v47 = vmul.f32 %v1455_v0, %v2543_v9  ;;  %v838_v48 = vmul.f32 %v1760_v53, %v837_v17  ;;  %v852_v33 = vmul.f32 %v2610_v21, %v2610_v21  ;;  %v1084_v58 = vand.u32 2147483647, %v2582_v54 }
 0x145   : > { %v1076_v52 = vmul.f32 %v1762_v5, %v2582_v54  ;;  %v1339_v36 = vadd.f32 0.05243302, %v1338_v32  ;;  %v1351_v4 = vmul.f32 %v1350_v45, %v2556_v20  ;;  %v616_v13 = vmul.f32 %v615_v46, %v2588_v44 }
 0x146   : > { %1505 = vst [vmem:[%s2200_s26 + $0x18] sm:$0xff] %v1480_v47  ;;  %v839_v3 = vadd.f32 %v1760_v53, %v838_v48  ;;  %v627_v1 = vmul.f32 %v626_v41, %v2588_v44  ;;  %v2622_v49 = vmin.f32 %v852_v33, 16.0  ;;  %vm1081_vm11 = vweird.f32 %v1762_v5 }
 0x147   : > { %v1077_v9 = vsub.f32 1.0, %v1076_v52  ;;  %v1086_v63 = vand.u32 2147483648, %v2582_v54  ;;  %v1352_v14 = vadd.f32 0.4994258, %v1351_v4  ;;  %v617_v60 = vadd.f32 0.0036580483, %v616_v13  ;;  %vm1082_vm12 = vmor %vm1080_vm9, %vm1081_vm11 }
 0x148   : > { %v843_v7 = vsel %vm842_vm10, %v1760_v53, %v839_v3  ;;  %v628_v11 = vadd.f32 0.014752088, %v627_v1  ;;  %v854_v12 = vmul.f32 2.1237322e-06, %v2622_v49  ;;  %v1340_v62 = vmul.f32 %v1339_v36, %v2556_v20 }
 0x149   : > { %v848_v37 = vsel %vm2600_vm7, %v847_v51, %v843_v7  ;;  %v1078_v34 = vmul.f32 %v1762_v5, %v1077_v9  ;;  %v1353_v59 = vmul.f32 %v1352_v14, %v2556_v20  ;;  %v618_v23 = vmul.f32 %v617_v60, %v2588_v44 }
 0x14a   : > { %v849_v56 = vmul.f32 %v848_v37, %v824_v24  ;;  %v629_v8 = vmul.f32 %v628_v11, %v2588_v44  ;;  %v855_v10 = vadd.f32 0.00028619796, %v854_v12  ;;  %v1087_v18 = vor.u32 1.1754944e-38, %v1086_v63  ;;  %v360_v37 = vpop.f32.mrf.mxu1 }
 0x14b   : > { %v1079_v55 = vadd.f32 %v1762_v5, %v1078_v34  ;;  %v2635_v16 = vadd.f32 1.0, %v1353_v59  ;;  %v865_v22 = vmul.f32 3.8918573e-05, %v2622_v49  ;;  %v619_v53 = vadd.f32 0.05243302, %v618_v23 }
 0x14c   : > { %v1652_v15 = vclamps-f32 %v849_v56, 1.0  ;;  %v630_v24 = vadd.f32 0.112945676, %v629_v8  ;;  %v856_v25 = vmul.f32 %v855_v10, %v2622_v49  ;;  %vm1085_vm13 = vcmp.eq.f32.partialorder %v1084_v58, 8.507059e+37 }
 0x14d   : > { %v1083_v26 = vsel %vm1082_vm12, %v1762_v5, %v1079_v55  ;;  %1763 = vrcp.f32 %v2635_v16  ;;  %v2644_v27 = vadd.f32 %v2462_v43, %v375_v19  ;;  %v1341_v51 = vadd.f32 0.18741608, %v1340_v62 }
 0x14e   : > { %v1461_v28 = vadd.f32 1.0, %v1652_v15  ;;  %v1088_v50 = vsel %vm1085_vm13, %v1087_v18, %v1083_v26  ;;  %v2647_v32 = vadd.f32 %v2462_v43, %v396_v61  ;;  %v620_v35 = vmul.f32 %v619_v53, %v2588_v44 }
 0x14f   : > { %v1089_v54 = vmul.f32 %v1088_v50, %v1064_v31  ;;  %v631_v39 = vmul.f32 %v630_v24, %v2588_v44  ;;  %v857_v0 = vadd.f32 0.0036580483, %v856_v25  ;;  %v417_v42 = vmul.f32 0.5, %v2465_v30  ;;  %v342_v25 = vpop.f32.mrf.mxu0 }
 0x150   : > { %v1486_v17 = vmul.f32 %v1461_v28, %v2591_v38  ;;  %v866_v45 = vadd.f32 0.001143296, %v865_v22  ;;  %v621_v5 = vadd.f32 0.18741608, %v620_v35  ;;  %v2656_v41 = vmul.f32 0.5, %v2530_v29 }
 0x151   : > { %v1658_v46 = vclamps-f32 %v1089_v54, 1.0  ;;  %v632_v47 = vadd.f32 0.4994258, %v631_v39  ;;  %v858_v48 = vmul.f32 %v857_v0, %v2622_v49  ;;  %v2660_v33 = vmul.f32 0.70710677, %v2644_v27 }
 0x152   : > { %1511 = vst [vmem:[%s2200_s26 + $0x48] sm:$0xff] %v1486_v17  ;;  %v867_v31 = vmul.f32 %v866_v45, %v2622_v49  ;;  %v2663_v52 = vmul.f32 0.70710677, %v2647_v32  ;;  %v1342_v58 = vmul.f32 %v1341_v51, %v2556_v20  ;;  %v1364_v36 = vand.u32 2147483647, %v2635_v16 }
 0x153   : > { %v1764_v38 = vpop.eup %1763  ;;  %v1467_v30 = vadd.f32 1.0, %v1658_v46  ;;  %v633_v4 = vmul.f32 %v632_v47, %v2588_v44  ;;  %v622_v3 = vmul.f32 %v621_v5, %v2588_v44  ;;  %v1092_v1 = vmul.f32 %v2660_v33, %v2660_v33 }
 0x154   : > { %v1356_v29 = vmul.f32 %v1764_v38, %v2635_v16  ;;  %v868_v13 = vadd.f32 0.014752088, %v867_v31  ;;  %v1366_v63 = vand.u32 2147483648, %v2635_v16  ;;  %v859_v7 = vadd.f32 0.05243302, %v858_v48 }
 0x155   : > { %v1492_v9 = vmul.f32 %v1467_v30, %v417_v42  ;;  %v2673_v14 = vadd.f32 1.0, %v633_v4  ;;  %v2676_v11 = vmin.f32 %v1092_v1, 16.0  ;;  %v1372_v12 = vmul.f32 %v2663_v52, %v2663_v52 }
 0x156   : > { %v1357_v60 = vsub.f32 1.0, %v1356_v29  ;;  %v869_v20 = vmul.f32 %v868_v13, %v2622_v49  ;;  %v1343_v44 = vadd.f32 1.1283791, %v1342_v58  ;;  %vm1360_vm14 = vweird.f32 %v2635_v16 }
 0x157   : > { %1517 = vst [vmem:[%s2200_s26 + $0x78] sm:$0xff] %v1492_v9  ;;  %vm2682_vm15 = vcmp.eq.f32.partialorder %v1364_v36, 8.507059e+37  ;;  %1765 = vrcp.f32 %v2673_v14  ;;  %vm1361_vm0 = vweird.f32 %v1764_v38  ;;  %v623_v62 = vadd.f32 1.1283791, %v622_v3 }
 0x158   : > { %v1358_v34 = vmul.f32 %v1764_v38, %v1357_v60  ;;  %v870_v59 = vadd.f32 0.112945676, %v869_v20  ;;  %v1367_v56 = vor.u32 1.1754944e-38, %v1366_v63  ;;  %v1094_v23 = vmul.f32 2.1237322e-06, %v2676_v11  ;;  %vm1362_vm1 = vmor %vm1360_vm14, %vm1361_vm0 }
 0x159   : > { %v1105_v8 = vmul.f32 3.8918573e-05, %v2676_v11  ;;  %v2689_v10 = vmin.f32 %v1372_v12, 16.0  ;;  %v644_v55 = vand.u32 2147483647, %v2673_v14  ;;  %v860_v18 = vmul.f32 %v859_v7, %v2622_v49 }
 0x15a   : > { %v1359_v19 = vadd.f32 %v1764_v38, %v1358_v34  ;;  %v871_v22 = vmul.f32 %v870_v59, %v2622_v49  ;;  %v1344_v61 = vmul.f32 %v1343_v44, %v2540_v57  ;;  %v1095_v15 = vadd.f32 0.00028619796, %v1094_v23 }
 0x15b   : > { %v1106_v53 = vadd.f32 0.001143296, %v1105_v8  ;;  %v1374_v24 = vmul.f32 2.1237322e-06, %v2689_v10  ;;  %v646_v28 = vand.u32 2147483648, %v2673_v14  ;;  %v2706_v45 = vadd.f32 %v2462_v43, %v342_v25 }
 0x15c   : > { %v1363_v26 = vsel %vm1362_vm1, %v1764_v38, %v1359_v19  ;;  %v872_v50 = vadd.f32 0.4994258, %v871_v22  ;;  %v1385_v51 = vmul.f32 3.8918573e-05, %v2689_v10  ;;  %v1096_v57 = vmul.f32 %v1095_v15, %v2676_v11 }
 0x15d   : > { %v1766_v54 = vpop.eup %1765  ;;  %v1368_v35 = vsel %vm2682_vm15, %v1367_v56, %v1363_v26  ;;  %v1107_v16 = vmul.f32 %v1106_v53, %v2676_v11  ;;  %v1375_v39 = vadd.f32 0.00028619796, %v1374_v24  ;;  %v861_v42 = vadd.f32 0.18741608, %v860_v18 }
 0x15e   : > { %v1369_v0 = vmul.f32 %v1368_v35, %v1344_v61  ;;  %v636_v17 = vmul.f32 %v1766_v54, %v2673_v14  ;;  %v873_v46 = vmul.f32 %v872_v50, %v2622_v49  ;;  %v1097_v5 = vadd.f32 0.0036580483, %v1096_v57 }
 0x15f   : > { %v1108_v47 = vadd.f32 0.014752088, %v1107_v16  ;;  %v1376_v48 = vmul.f32 %v1375_v39, %v2689_v10  ;;  %vm641_vm2 = vweird.f32 %v1766_v54  ;;  %v1386_v30 = vadd.f32 0.001143296, %v1385_v51 }
 0x160   : > { %v1665_v31 = vclamps-f32 %v1369_v0, 1.0  ;;  %v637_v38 = vsub.f32 1.0, %v636_v17  ;;  %v2710_v58 = vadd.f32 1.0, %v873_v46  ;;  %v1098_v36 = vmul.f32 %v1097_v5, %v2676_v11 }
 0x161   : > { %v1109_v4 = vmul.f32 %v1108_v47, %v2676_v11  ;;  %v1377_v29 = vadd.f32 0.0036580483, %v1376_v48  ;;  %v1387_v1 = vmul.f32 %v1386_v30, %v2689_v10  ;;  %v2716_v9 = vmul.f32 0.70710677, %v2706_v45 }
 0x162   : > { %v1474_v3 = vadd.f32 1.0, %v1665_v31  ;;  %v638_v13 = vmul.f32 %v1766_v54, %v637_v38  ;;  %v624_v63 = vmul.f32 %v623_v62, %v2566_v2  ;;  %vm640_vm3 = vweird.f32 %v2673_v14 }
 0x163   : > { %vm2720_vm4 = vcmp.eq.f32.partialorder %v644_v55, 8.507059e+37  ;;  %1767 = vrcp.f32 %v2710_v58  ;;  %v1099_v12 = vadd.f32 0.05243302, %v1098_v36  ;;  %v1110_v44 = vadd.f32 0.112945676, %v1109_v4  ;;  %vm642_vm5 = vmor %vm640_vm3, %vm641_vm2 }
 0x164   : > { %v1499_v60 = vmul.f32 %v1474_v3, %v2656_v41  ;;  %v639_v20 = vadd.f32 %v1766_v54, %v638_v13  ;;  %v647_v34 = vor.u32 1.1754944e-38, %v646_v28  ;;  %v862_v59 = vmul.f32 %v861_v42, %v2622_v49 }
 0x165   : > { %v1378_v2 = vmul.f32 %v1377_v29, %v2689_v10  ;;  %v1388_v14 = vadd.f32 0.014752088, %v1387_v1  ;;  %v1100_v56 = vmul.f32 %v1099_v12, %v2676_v11  ;;  %v1111_v23 = vmul.f32 %v1110_v44, %v2676_v11 }
 0x166   : > { %1524 = vst [vmem:[%s2200_s26 + $0xb0] sm:$0xff] %v1499_v60  ;;  %v643_v62 = vsel %vm642_vm5, %v1766_v54, %v639_v20  ;;  %v652_v41 = vmul.f32 %v2716_v9, %v2716_v9  ;;  %v2738_v49 = vadd.f32 %v2462_v43, %v360_v37  ;;  %v406_v24 = vmul.f32 0.5, %v2552_v40  ;;  %v378_v37 = vpop.f32.mrf.mxu2 }
 0x167   : > { %v648_v8 = vsel %vm2720_vm4, %v647_v34, %v643_v62  ;;  %v1379_v19 = vadd.f32 0.05243302, %v1378_v2  ;;  %v1389_v55 = vmul.f32 %v1388_v14, %v2689_v10  ;;  %v1101_v22 = vadd.f32 0.18741608, %v1100_v56 }
 0x168   : > { %v649_v18 = vmul.f32 %v648_v8, %v624_v63  ;;  %v1112_v61 = vadd.f32 0.4994258, %v1111_v23  ;;  %v2740_v15 = vmin.f32 %v652_v41, 16.0  ;;  %v863_v25 = vadd.f32 1.1283791, %v862_v59 }
 0x169   : > { %v1768_v53 = vpop.eup %1767  ;;  %v1380_v26 = vmul.f32 %v1379_v19, %v2689_v10  ;;  %v1390_v28 = vadd.f32 0.112945676, %v1389_v55  ;;  %v884_v54 = vand.u32 2147483647, %v2710_v58  ;;  %v2747_v35 = vmul.f32 0.70710677, %v2738_v49 }
 0x16a   : > { %v1647_v50 = vclamps-f32 %v649_v18, 1.0  ;;  %v876_v51 = vmul.f32 %v1768_v53, %v2710_v58  ;;  %v1102_v57 = vmul.f32 %v1101_v22, %v2676_v11  ;;  %v1113_v16 = vmul.f32 %v1112_v61, %v2676_v11 }
 0x16b   : > { %v1391_v39 = vmul.f32 %v1390_v28, %v2689_v10  ;;  %v654_v40 = vmul.f32 2.1237322e-06, %v2740_v15  ;;  %v1381_v42 = vadd.f32 0.18741608, %v1380_v26  ;;  %v665_v46 = vmul.f32 3.8918573e-05, %v2740_v15 }
 0x16c   : > { %v1456_v0 = vadd.f32 1.0, %v1647_v50  ;;  %v877_v17 = vsub.f32 1.0, %v876_v51  ;;  %v886_v5 = vand.u32 2147483648, %v2710_v58  ;;  %v2755_v47 = vadd.f32 1.0, %v1113_v16 }
 0x16d   : > { %v1392_v48 = vadd.f32 0.4994258, %v1391_v39  ;;  %v655_v31 = vadd.f32 0.00028619796, %v654_v40  ;;  %vm881_vm6 = vweird.f32 %v1768_v53  ;;  %v666_v11 = vadd.f32 0.001143296, %v665_v46 }
 0x16e   : > { %v1481_v38 = vmul.f32 %v1456_v0, %v406_v24  ;;  %v878_v30 = vmul.f32 %v1768_v53, %v877_v17  ;;  %v864_v36 = vmul.f32 %v863_v25, %v2610_v21  ;;  %vm880_vm7 = vweird.f32 %v2710_v58 }
 0x16f   : > { %vm2759_vm8 = vcmp.eq.f32.partialorder %v884_v54, 8.507059e+37  ;;  %1769 = vrcp.f32 %v2755_v47  ;;  %v1103_v3 = vadd.f32 1.1283791, %v1102_v57  ;;  %v1393_v13 = vmul.f32 %v1392_v48, %v2689_v10  ;;  %vm882_vm9 = vmor %vm880_vm7, %vm881_vm6 }
 0x170   : > { %1506 = vst [vmem:[%s2200_s26 + $0x20] sm:$0xff] %v1481_v38  ;;  %v879_v29 = vadd.f32 %v1768_v53, %v878_v30  ;;  %v656_v1 = vmul.f32 %v655_v31, %v2740_v15  ;;  %v887_v63 = vor.u32 1.1754944e-38, %v886_v5  ;;  %v1382_v7 = vmul.f32 %v1381_v42, %v2689_v10 }
 0x171   : > { %v667_v21 = vmul.f32 %v666_v11, %v2740_v15  ;;  %v892_v58 = vmul.f32 %v2747_v35, %v2747_v35  ;;  %v1124_v20 = vand.u32 2147483647, %v2755_v47  ;;  %v2772_v12 = vadd.f32 1.0, %v1393_v13 }
 0x172   : > { %v883_v60 = vsel %vm882_vm9, %v1768_v53, %v879_v29  ;;  %v657_v44 = vadd.f32 0.0036580483, %v656_v1  ;;  %v1126_v59 = vand.u32 2147483648, %v2755_v47  ;;  %v412_v10 = vmul.f32 0.5, %v2595_v6 }
 0x173   : > { %v888_v34 = vsel %vm2759_vm8, %v887_v63, %v883_v60  ;;  %v668_v2 = vadd.f32 0.014752088, %v667_v21  ;;  %v2777_v14 = vmin.f32 %v892_v58, 16.0  ;;  %v1104_v56 = vmul.f32 %v1103_v3, %v2660_v33 }
 0x174   : > { %v889_v62 = vmul.f32 %v888_v34, %v864_v36  ;;  %1771 = vrcp.f32 %v2772_v12  ;;  %v658_v41 = vmul.f32 %v657_v44, %v2740_v15  ;;  %v2786_v55 = vadd.f32 %v2462_v43, %v378_v37 }
 0x175   : > { %v1770_v23 = vpop.eup %1769  ;;  %v669_v8 = vmul.f32 %v668_v2, %v2740_v15  ;;  %v894_v19 = vmul.f32 2.1237322e-06, %v2777_v14  ;;  %vm1120_vm10 = vweird.f32 %v2755_v47  ;;  %v1383_v6 = vadd.f32 1.1283791, %v1382_v7 }
 0x176   : > { %v1653_v18 = vclamps-f32 %v889_v62, 1.0  ;;  %v1116_v22 = vmul.f32 %v1770_v23, %v2755_v47  ;;  %vm2790_vm11 = vcmp.eq.f32.partialorder %v1124_v20, 8.507059e+37  ;;  %v1127_v61 = vor.u32 1.1754944e-38, %v1126_v59  ;;  %v399_v47 = vpop.f32.mrf.mxu3 }
 0x177   : > { %v659_v53 = vadd.f32 0.05243302, %v658_v41  ;;  %v670_v24 = vadd.f32 0.112945676, %v669_v8  ;;  %v895_v28 = vadd.f32 0.00028619796, %v894_v19  ;;  %vm1121_vm12 = vweird.f32 %v1770_v23 }
 0x178   : > { %v1462_v25 = vadd.f32 1.0, %v1653_v18  ;;  %v1117_v26 = vsub.f32 1.0, %v1116_v22  ;;  %v905_v50 = vmul.f32 3.8918573e-05, %v2777_v14  ;;  %v2798_v57 = vmul.f32 0.70710677, %v2786_v55  ;;  %vm1122_vm13 = vmor %vm1120_vm10, %vm1121_vm12 }
 0x179   : > { %v660_v51 = vmul.f32 %v659_v53, %v2740_v15  ;;  %v671_v54 = vmul.f32 %v670_v24, %v2740_v15  ;;  %v896_v0 = vmul.f32 %v895_v28, %v2777_v14  ;;  %v1384_v42 = vmul.f32 %v1383_v6, %v2663_v52 }
 0x17a   : > { %v1772_v16 = vpop.eup %1771  ;;  %v1487_v39 = vmul.f32 %v1462_v25, %v412_v10  ;;  %v1118_v40 = vmul.f32 %v1770_v23, %v1117_v26  ;;  %v906_v17 = vadd.f32 0.001143296, %v905_v50  ;;  %v1404_v5 = vand.u32 2147483647, %v2772_v12 }
 0x17b   : > { %v1396_v46 = vmul.f32 %v1772_v16, %v2772_v12  ;;  %v672_v48 = vadd.f32 0.4994258, %v671_v54  ;;  %v897_v38 = vadd.f32 0.0036580483, %v896_v0  ;;  %v1132_v11 = vmul.f32 %v2798_v57, %v2798_v57 }
 0x17c   : > { %1512 = vst [vmem:[%s2200_s26 + $0x50] sm:$0xff] %v1487_v39  ;;  %v1119_v31 = vadd.f32 %v1770_v23, %v1118_v40  ;;  %v907_v30 = vmul.f32 %v906_v17, %v2777_v14  ;;  %v1406_v52 = vand.u32 2147483648, %v2772_v12  ;;  %v661_v4 = vadd.f32 0.18741608, %v660_v51  ;;  %v381_v40 = vpop.f32.mrf.mxu2 }
 0x17d   : > { %v1397_v36 = vsub.f32 1.0, %v1396_v46  ;;  %v673_v29 = vmul.f32 %v672_v48, %v2740_v15  ;;  %v898_v13 = vmul.f32 %v897_v38, %v2777_v14  ;;  %v2814_v63 = vmin.f32 %v1132_v11, 16.0 }
 0x17e   : > { %v1123_v3 = vsel %vm1122_vm13, %v1770_v23, %v1119_v31  ;;  %v908_v1 = vadd.f32 0.014752088, %v907_v30  ;;  %vm1401_vm14 = vweird.f32 %v1772_v16  ;;  %vm1400_vm15 = vweird.f32 %v2772_v12 }
 0x17f   : > { %v1128_v7 = vsel %vm2790_vm11, %v1127_v61, %v1123_v3  ;;  %v1398_v21 = vmul.f32 %v1772_v16, %v1397_v36  ;;  %v2818_v58 = vadd.f32 1.0, %v673_v29  ;;  %v1134_v44 = vmul.f32 2.1237322e-06, %v2814_v63  ;;  %vm1402_vm1 = vmor %vm1400_vm15, %vm1401_vm14 }
 0x180   : > { %v1129_v60 = vmul.f32 %v1128_v7, %v1104_v56  ;;  %v909_v20 = vmul.f32 %v908_v1, %v2777_v14  ;;  %vm1405_vm0 = vcmp.eq.f32.partialorder %v1404_v5, 8.507059e+37  ;;  %v899_v34 = vadd.f32 0.05243302, %v898_v13 }
 0x181   : > { %v1399_v37 = vadd.f32 %v1772_v16, %v1398_v21  ;;  %1773 = vrcp.f32 %v2818_v58  ;;  %v1407_v2 = vor.u32 1.1754944e-38, %v1406_v52  ;;  %v662_v10 = vmul.f32 %v661_v4, %v2740_v15 }
 0x182   : > { %v1659_v59 = vclamps-f32 %v1129_v60, 1.0  ;;  %v2826_v62 = vadd.f32 %v2462_v43, %v399_v47  ;;  %v910_v23 = vadd.f32 0.112945676, %v909_v20  ;;  %v1135_v12 = vadd.f32 0.00028619796, %v1134_v44 }
 0x183   : > { %v1403_v56 = vsel %vm1402_vm1, %v1772_v16, %v1399_v37  ;;  %v1145_v41 = vmul.f32 3.8918573e-05, %v2814_v63  ;;  %v418_v8 = vmul.f32 0.5, %v2644_v27  ;;  %v900_v6 = vmul.f32 %v899_v34, %v2777_v14 }
 0x184   : > { %v1468_v19 = vadd.f32 1.0, %v1659_v59  ;;  %v1408_v18 = vsel %vm1405_vm0, %v1407_v2, %v1403_v56  ;;  %v911_v33 = vmul.f32 %v910_v23, %v2777_v14  ;;  %v1136_v15 = vmul.f32 %v1135_v12, %v2814_v63 }
 0x185   : > { %v1409_v22 = vmul.f32 %v1408_v18, %v1384_v42  ;;  %v1146_v53 = vadd.f32 0.001143296, %v1145_v41  ;;  %v2834_v24 = vmul.f32 0.70710677, %v2826_v62  ;;  %v425_v26 = vmul.f32 0.5, %v2647_v32 }
 0x186   : > { %v1493_v61 = vmul.f32 %v1468_v19, %v418_v8  ;;  %v663_v50 = vadd.f32 1.1283791, %v662_v10  ;;  %v912_v27 = vadd.f32 0.4994258, %v911_v33  ;;  %v684_v54 = vand.u32 2147483647, %v2818_v58 }
 0x187   : > { %v1774_v25 = vpop.eup %1773  ;;  %v1666_v28 = vclamps-f32 %v1409_v22, 1.0  ;;  %v1147_v16 = vmul.f32 %v1146_v53, %v2814_v63  ;;  %v1412_v39 = vmul.f32 %v2834_v24, %v2834_v24  ;;  %v686_v17 = vand.u32 2147483648, %v2818_v58 }
 0x188   : > { %1518 = vst [vmem:[%s2200_s26 + $0x80] sm:$0xff] %v1493_v61  ;;  %v676_v51 = vmul.f32 %v1774_v25, %v2818_v58  ;;  %v901_v42 = vadd.f32 0.18741608, %v900_v6  ;;  %v913_v32 = vmul.f32 %v912_v27, %v2777_v14  ;;  %v1137_v5 = vadd.f32 0.0036580483, %v1136_v15 }
 0x189   : > { %v1475_v0 = vadd.f32 1.0, %v1666_v28  ;;  %v1148_v48 = vadd.f32 0.014752088, %v1147_v16  ;;  %v2845_v31 = vmin.f32 %v1412_v39, 16.0  ;;  %vm681_vm2 = vweird.f32 %v1774_v25 }
 0x18a   : > { %v677_v46 = vsub.f32 1.0, %v676_v51  ;;  %v2847_v30 = vadd.f32 1.0, %v913_v32  ;;  %v2850_v11 = vadd.f32 %v2462_v43, %v381_v40  ;;  %vm680_vm3 = vweird.f32 %v2818_v58 }
 0x18b   : > { %v1500_v38 = vmul.f32 %v1475_v0, %v425_v26  ;;  %v1149_v52 = vmul.f32 %v1148_v48, %v2814_v63  ;;  %v1414_v4 = vmul.f32 2.1237322e-06, %v2845_v31  ;;  %v1425_v29 = vmul.f32 3.8918573e-05, %v2845_v31  ;;  %vm682_vm4 = vmor %vm680_vm3, %vm681_vm2 }
 0x18c   : > { %v678_v36 = vmul.f32 %v1774_v25, %v677_v46  ;;  %1775 = vrcp.f32 %v2847_v30  ;;  %v1138_v13 = vmul.f32 %v1137_v5, %v2814_v63  ;;  %v664_v43 = vmul.f32 %v663_v50, %v2716_v9 }
 0x18d   : > { %1525 = vst [vmem:[%s2200_s26 + $0xb8] sm:$0xff] %v1500_v38  ;;  %v1150_v1 = vadd.f32 0.112945676, %v1149_v52  ;;  %v1415_v7 = vadd.f32 0.00028619796, %v1414_v4  ;;  %v687_v21 = vor.u32 1.1754944e-38, %v686_v17  ;;  %v902_v58 = vmul.f32 %v901_v42, %v2777_v14 }
 0x18e   : > { %v679_v3 = vadd.f32 %v1774_v25, %v678_v36  ;;  %v1426_v47 = vadd.f32 0.001143296, %v1425_v29  ;;  %v2862_v60 = vmul.f32 0.70710677, %v2850_v11  ;;  %vm685_vm5 = vcmp.eq.f32.partialorder %v684_v54, 8.507059e+37 }
 0x18f   : > { %v1151_v44 = vmul.f32 %v1150_v1, %v2814_v63  ;;  %v1416_v34 = vmul.f32 %v1415_v7, %v2845_v31  ;;  %v1139_v10 = vadd.f32 0.05243302, %v1138_v13  ;;  %v407_v12 = vmul.f32 0.5, %v2706_v45 }
 0x190   : > { %v683_v20 = vsel %vm682_vm4, %v1774_v25, %v679_v3  ;;  %v1427_v59 = vmul.f32 %v1426_v47, %v2845_v31  ;;  %v1172_v9 = vmul.f32 %v2862_v60, %v2862_v60  ;;  %v903_v19 = vadd.f32 1.1283791, %v902_v58 }
 0x191   : > { %v688_v37 = vsel %vm685_vm5, %v687_v21, %v683_v20  ;;  %v1152_v56 = vadd.f32 0.4994258, %v1151_v44  ;;  %v924_v22 = vand.u32 2147483647, %v2847_v30  ;;  %v1417_v33 = vadd.f32 0.0036580483, %v1416_v34 }
 0x192   : > { %v689_v2 = vmul.f32 %v688_v37, %v664_v43  ;;  %v1776_v23 = vpop.eup %1775  ;;  %v1428_v41 = vadd.f32 0.014752088, %v1427_v59  ;;  %v2871_v8 = vmin.f32 %v1172_v9, 16.0  ;;  %v1140_v45 = vmul.f32 %v1139_v10, %v2814_v63 }
 0x193   : > { %v916_v18 = vmul.f32 %v1776_v23, %v2847_v30  ;;  %v1153_v6 = vmul.f32 %v1152_v56, %v2814_v63  ;;  %vm921_vm6 = vweird.f32 %v1776_v23  ;;  %v926_v28 = vand.u32 2147483648, %v2847_v30 }
 0x194   : > { %v1648_v14 = vclamps-f32 %v689_v2, 1.0  ;;  %v1429_v61 = vmul.f32 %v1428_v41, %v2845_v31  ;;  %v1174_v15 = vmul.f32 2.1237322e-06, %v2871_v8  ;;  %v1185_v26 = vmul.f32 3.8918573e-05, %v2871_v8 }
 0x195   : > { %v917_v25 = vsub.f32 1.0, %v916_v18  ;;  %v1154_v50 = vadd.f32 1.0, %v1153_v6  ;;  %v1418_v40 = vmul.f32 %v1417_v33, %v2845_v31  ;;  %vm920_vm7 = vweird.f32 %v2847_v30 }
 0x196   : > { %v1457_v53 = vadd.f32 1.0, %v1648_v14  ;;  %v1430_v27 = vadd.f32 0.112945676, %v1429_v61  ;;  %v1175_v16 = vadd.f32 0.00028619796, %v1174_v15  ;;  %vm922_vm8 = vmor %vm920_vm7, %vm921_vm6  ;;  %v927_v32 = vor.u32 1.1754944e-38, %v926_v28 }
 0x197   : > { %v918_v54 = vmul.f32 %v1776_v23, %v917_v25  ;;  %v1186_v39 = vadd.f32 0.001143296, %v1185_v26  ;;  %1777 = vrcp.f32 %v1154_v50  ;;  %v1141_v17 = vadd.f32 0.18741608, %v1140_v45 }
 0x198   : > { %v1482_v51 = vmul.f32 %v1457_v53, %v407_v12  ;;  %v1431_v42 = vmul.f32 %v1430_v27, %v2845_v31  ;;  %v1176_v46 = vmul.f32 %v1175_v16, %v2871_v8  ;;  %v904_v48 = vmul.f32 %v903_v19, %v2747_v35 }
 0x199   : > { %v919_v0 = vadd.f32 %v1776_v23, %v918_v54  ;;  %v1187_v5 = vmul.f32 %v1186_v39, %v2871_v8  ;;  %vm925_vm9 = vcmp.eq.f32.partialorder %v924_v22, 8.507059e+37  ;;  %v1419_v4 = vadd.f32 0.05243302, %v1418_v40 }
 0x19a   : > { %1507 = vst [vmem:[%s2200_s26 + $0x28] sm:$0xff] %v1482_v51  ;;  %v1432_v36 = vadd.f32 0.4994258, %v1431_v42  ;;  %v1142_v30 = vmul.f32 %v1141_v17, %v2814_v63  ;;  %v1177_v7 = vadd.f32 0.0036580483, %v1176_v46  ;;  %v413_v44 = vmul.f32 0.5, %v2738_v49 }
 0x19b   : > { %v923_v38 = vsel %vm922_vm8, %v1776_v23, %v919_v0  ;;  %v1188_v29 = vadd.f32 0.014752088, %v1187_v5  ;;  %v1420_v20 = vmul.f32 %v1419_v4, %v2845_v31  ;;  %v1164_v9 = vand.u32 2147483647, %v1154_v50 }
 0x19c   : > { %v928_v52 = vsel %vm925_vm9, %v927_v32, %v923_v38  ;;  %v1433_v13 = vmul.f32 %v1432_v36, %v2845_v31  ;;  %v1143_v34 = vadd.f32 1.1283791, %v1142_v30  ;;  %v1166_v63 = vand.u32 2147483648, %v1154_v50 }
 0x19d   : > { %v929_v3 = vmul.f32 %v928_v52, %v904_v48  ;;  %v1778_v1 = vpop.eup %1777  ;;  %v1189_v43 = vmul.f32 %v1188_v29, %v2871_v8  ;;  %v1178_v2 = vmul.f32 %v1177_v7, %v2871_v8  ;;  %v1421_v12 = vadd.f32 0.18741608, %v1420_v20 }
 0x19e   : > { %v1156_v47 = vmul.f32 %v1778_v1, %v1154_v50  ;;  %v1434_v35 = vadd.f32 1.0, %v1433_v13  ;;  %vm1161_vm10 = vweird.f32 %v1778_v1  ;;  %vm1160_vm11 = vweird.f32 %v1154_v50 }
 0x19f   : > { %v1654_v21 = vclamps-f32 %v929_v3, 1.0  ;;  %v1190_v58 = vadd.f32 0.112945676, %v1189_v43  ;;  %vm1162_vm12 = vmor %vm1160_vm11, %vm1161_vm10  ;;  %v1167_v49 = vor.u32 1.1754944e-38, %v1166_v63  ;;  %v1179_v19 = vadd.f32 0.05243302, %v1178_v2 }
 0x1a0   : > { %v1157_v59 = vsub.f32 1.0, %v1156_v47  ;;  %1779 = vrcp.f32 %v1434_v35  ;;  %v1144_v18 = vmul.f32 %v1143_v34, %v2798_v57  ;;  %vm1165_vm13 = vcmp.eq.f32.partialorder %v1164_v9, 8.507059e+37 }
 0x1a1   : > { %v1463_v37 = vadd.f32 1.0, %v1654_v21  ;;  %v1191_v23 = vmul.f32 %v1190_v58, %v2871_v8  ;;  %v1422_v15 = vmul.f32 %v1421_v12, %v2845_v31  ;;  %v1180_v45 = vmul.f32 %v1179_v19, %v2871_v8 }
 0x1a2   : > { %v1158_v56 = vmul.f32 %v1778_v1, %v1157_v59  ;;  %v419_v27 = vmul.f32 0.5, %v2786_v55  ;;  %v1446_v57 = vand.u32 2147483648, %v1434_v35  ;;  %v1444_v39 = vand.u32 2147483647, %v1434_v35 }
 0x1a3   : > { %v1488_v10 = vmul.f32 %v1463_v37, %v413_v44  ;;  %v1192_v14 = vadd.f32 0.4994258, %v1191_v23  ;;  %v1423_v51 = vadd.f32 1.1283791, %v1422_v15  ;;  %v1181_v40 = vadd.f32 0.18741608, %v1180_v45 }
 0x1a4   : > { %v1159_v41 = vadd.f32 %v1778_v1, %v1158_v56  ;;  %vm1440_vm15 = vweird.f32 %v1434_v35  ;;  %v1447_v17 = vor.u32 1.1754944e-38, %v1446_v57  ;;  %vm1445_vm1 = vcmp.eq.f32.partialorder %v1444_v39, 8.507059e+37 }
 0x1a5   : > { %1513 = vst [vmem:[%s2200_s26 + $0x58] sm:$0xff] %v1488_v10  ;;  %v1193_v6 = vmul.f32 %v1192_v14, %v2871_v8  ;;  %v1424_v42 = vmul.f32 %v1423_v51, %v2834_v24  ;;  %v1182_v5 = vmul.f32 %v1181_v40, %v2871_v8  ;;  %v426_v4 = vmul.f32 0.5, %v2826_v62 }
 0x1a6   : > { %v1163_v22 = vsel %vm1162_vm12, %v1778_v1, %v1159_v41  ;;  %v1780_v33 = vpop.eup %1779 }
 0x1a7   : > { %v1168_v61 = vsel %vm1165_vm13, %v1167_v49, %v1163_v22  ;;  %v1436_v25 = vmul.f32 %v1780_v33, %v1434_v35  ;;  %v1194_v26 = vadd.f32 1.0, %v1193_v6  ;;  %vm1441_vm14 = vweird.f32 %v1780_v33 }
 0x1a8   : > { %v1169_v53 = vmul.f32 %v1168_v61, %v1144_v18  ;;  %vm1442_vm0 = vmor %vm1440_vm15, %vm1441_vm14  ;;  %v1183_v29 = vadd.f32 1.1283791, %v1182_v5  ;;  %v420_v35 = vmul.f32 0.5, %v2850_v11 }
 0x1a9   : > { %v1437_v50 = vsub.f32 1.0, %v1436_v25  ;;  %1781 = vrcp.f32 %v1194_v26  ;;  %v1206_v3 = vand.u32 2147483648, %v1194_v26  ;;  %v1204_v1 = vand.u32 2147483647, %v1194_v26 }
 0x1aa   : > { %v1660_v28 = vclamps-f32 %v1169_v53, 1.0  ;;  %vm1200_vm3 = vweird.f32 %v1194_v26  ;;  %v1184_v43 = vmul.f32 %v1183_v29, %v2862_v60 }
 0x1ab   : > { %v1438_v16 = vmul.f32 %v1780_v33, %v1437_v50  ;;  %v1207_v8 = vor.u32 1.1754944e-38, %v1206_v3  ;;  %vm1205_vm5 = vcmp.eq.f32.partialorder %v1204_v1, 8.507059e+37 }
 0x1ac   : > { %v1469_v54 = vadd.f32 1.0, %v1660_v28 }
 0x1ad   : > { %v1439_v31 = vadd.f32 %v1780_v33, %v1438_v16 }
 0x1ae   : > { %v1494_v0 = vmul.f32 %v1469_v54, %v419_v27 }
 0x1af   : > { %v1443_v32 = vsel %vm1442_vm0, %v1780_v33, %v1439_v31  ;;  %v1782_v46 = vpop.eup %1781 }
 0x1b0   : > { %1519 = vst [vmem:[%s2200_s26 + $0x88] sm:$0xff] %v1494_v0  ;;  %v1448_v55 = vsel %vm1445_vm1, %v1447_v17, %v1443_v32  ;;  %v1196_v38 = vmul.f32 %v1782_v46, %v1194_v26  ;;  %vm1201_vm2 = vweird.f32 %v1782_v46 }
 0x1b1   : > { %v1449_v48 = vmul.f32 %v1448_v55, %v1424_v42  ;;  %vm1202_vm4 = vmor %vm1200_vm3, %vm1201_vm2 }
 0x1b2   : > { %v1197_v52 = vsub.f32 1.0, %v1196_v38 }
 0x1b3   : > { %v1667_v36 = vclamps-f32 %v1449_v48, 1.0 }
 0x1b4   : > { %v1198_v13 = vmul.f32 %v1782_v46, %v1197_v52 }
 0x1b5   : > { %v1476_v30 = vadd.f32 1.0, %v1667_v36 }
 0x1b6   : > { %v1199_v7 = vadd.f32 %v1782_v46, %v1198_v13 }
 0x1b7   : > { %v1501_v24 = vmul.f32 %v1476_v30, %v426_v4 }
 0x1b8   : > { %v1203_v21 = vsel %vm1202_vm4, %v1782_v46, %v1199_v7 }
 0x1b9   : > { %1526 = vst [vmem:[%s2200_s26 + $0xc0] sm:$0xff] %v1501_v24  ;;  %v1208_v47 = vsel %vm1205_vm5, %v1207_v8, %v1203_v21 }
 0x1ba   : > { %v1209_v62 = vmul.f32 %v1208_v47, %v1184_v43 }
 0x1bc   : > { %v1661_v20 = vclamps-f32 %v1209_v62, 1.0 }
 0x1be   : > { %v1470_v58 = vadd.f32 1.0, %v1661_v20  ;;  %1534 = sbr.rel (!%p1920_p5) target bundleno = 482 (0x1e2), region = 36 }
 0x1c0   : > { %v1495_v44 = vmul.f32 %v1470_v58, %v420_v35 }
 0x1c2   : > { %1520 = vst [vmem:[%s2200_s26 + $0x90] sm:$0xff] %v1495_v44 }
 0x1c3   : > { %s3011_s4 = smov (!%p1537_p11, %s1536_s4), 25 }
 0x1c4   : > { %s1668_s5 = sshll.u32 %s3011_s4, 3 }
 0x1c5   : > { %s1540_s6 = ssub.s32 200, %s1668_s5 }
 0x1c6   : > { %s1541_s7 = sshll.u32 %s1540_s6, 4 }
 0x1c7   : > { %1542 = vsyncadd %s2912_s30, %s1541_s7  ;;  %p2921_p12 = scmp.ne.s32.totalorder %s1668_s5, 0  ;;  %s1675_s22 = smul.u32 200, %s1903_s16 }
 0x1c8   : > { %s1547_s9 = sshll.u32 %s2200_s26, 4  ;;  %s1672_s28 = sshll.u32 %s3011_s4, 7  ;;  %s2931_s9 = int_to_ptr.vmem [resolvable:$true] %s1547_s9 }
 0x1c9   : > { %s1545_s17 = scalar_lea.hbm %s2976_s3, %s1675_s22  ;;  %s1784_s20 = sshra.s32 %s2931_s9, 4  ;;  %s1785_s20 = int_to_ptr.vmem [resolvable:$true] %s1784_s20 }
 0x1ca   : > { %s1549_s19 = sshll.u32 %s1545_s17, 4  ;;  %s1786_s24 = sshrl.u32 %s1672_s28, 4  ;;  %s2933_s19 = int_to_ptr.hbm [resolvable:$true] %s1549_s19 }
 0x1cb   : > { %s1791_s25 = scalar_lea.vmem %s1785_s20, %s1786_s24  ;;  %s1859_s16 = smov [#allocation2]  }
 0x1cc   : > { %p1792_p13 = scmp.ne.s32.totalorder %s1785_s20, %s1791_s25  ;;  %s1795_s26 = scalar_lea.vmem %s1859_s16, 400 }
 0x1cd   : > { %p1797_p2 = scmp.lt.s32.totalorder %s1795_s26, %s1791_s25 }
 0x1ce   : > { %p1793_p0 = pnand %p1792_p13, %p2921_p12 }
 0x1d0   : > { %p1794_p1 = pneg %p1793_p0 }
 0x1d2   : > { %p1799_p3 = pnand %p1797_p2, %p1794_p1 }
 0x1d4   : > { %1802 = shalt.err (!%p1799_p3)
}
 0x1d5   : > { %s1803_s27 = sshra.s32 %s2933_s19, 4  ;;  %s1814_s7 = scalar_lea.hbm %s2976_s3, 392  ;;  %s1804_s27 = int_to_ptr.hbm [resolvable:$true] %s1803_s27 }
 0x1d6   : > { %s1810_s29 = scalar_lea.hbm %s1804_s27, %s1786_s24  ;;  %p1815_p8 = scmp.lt.s32.totalorder %s1804_s27, %s2976_s3 }
 0x1d7   : > { %p1811_p4 = scmp.ne.s32.totalorder %s1804_s27, %s1810_s29  ;;  %p1816_p9 = scmp.lt.s32.totalorder %s1814_s7, %s1810_s29 }
 0x1d9   : > { %p1812_p5 = pnand %p1811_p4, %p2921_p12  ;;  %p1817_p10 = por %p1816_p9, %p1815_p8 }
 0x1db   : > { %p1813_p7 = pneg %p1812_p5 }
 0x1dd   : > { %p1818_p11 = pnand %p1817_p10, %p1813_p7 }
 0x1df   : > { %1821 = shalt.err (!%p1818_p11)
}
 0x1e0   : > { %s1860_s11 = smov 128   ;;  %s1861_s17 = smov 8  }
 0x1e1   : > { %1555 = dma.vmem_to_hbm [thread:$0]  (%p2921_p12), %s2931_s9, %s1672_s28, %s2933_s19, %s2912_s30, %s1860_s11, %s1860_s11, %s1861_s17  }
 0x1e2 PF: > { %p1697_p13 = scmp.ge.s32.totalorder %s1857_s15, 2  ;;  %s1564_s20 = sand.u32 1, %s1845_s12  }
 0x1e3   : > { %s1565_s24 = scalar_lea.sflag [#allocation3], %s1564_s20 }
 0x1e4   : > { %p1694_p0 = pnand %p1697_p13, %p1924_p6 }
 0x1e6   : > { %p1695_p1 = pneg %p1694_p0 }
 0x1e8   : > { %1840 = dma.done.wait (%p1695_p1), %s1565_s24, 3200  }
 0x1e9   : > { %1842 = vsyncadd (%p1695_p1), %s1565_s24, 4294964096  ;;  %p13_p2 = scmp.ge.s32.totalorder %s1907_s18, 4   ;;  %s3006_s12 = smov %s1849_s13 }
 0x1ea   : > { %s3007_s13 = smov %s1853_s14  ;;  %s3008_s14 = smov %s1918_s21 }
 0x1eb   : > { %s3009_s15 = smov %s1907_s18  ;;  %15 = sbr.rel (!%p13_p2) target bundleno = 3 (0x3), region = 67 }
 0x1f0   :  { %1571 = vsyncpa [#allocation3], 1 }
 0x1f1   :  { %1573 = vsyncpa [#allocation3 + $0x1], 1 }

</bundles_post_ra>
